<compile_context>
chip_gen: v6e
topology: v6e:2x2x1
jax: 0.10.0
libtpu: 0.0.40
codegen_flags: <defaults>
</compile_context>

<pallas_src>
import jax
import jax.numpy as jnp
from jax.experimental import pallas as pl
from jax.experimental.pallas import tpu as pltpu

IN_DIM = 28 * 28   # 784
H1 = 512
H2 = 256


def _leaky_relu(x, slope=0.2):
    return jnp.where(x > 0, x, slope * x)


def discriminator_kernel(x_ref, w1_ref, b1_ref, w2_ref, b2_ref, w3_ref, b3_ref,
                         out_ref):
    # x_ref: (bm, 784) f32          w1: (784, 512) bf16   b1: (1, 512) f32
    # w2:    (512, 256) bf16        b2: (1, 256)  f32
    # w3:    (1, 256)  f32 (row vector of the 256->1 layer)   b3: (1, 1) f32
    # out_ref: (1, bm) f32  -- lane-dense result row for this batch tile.
    x = x_ref[...].astype(jnp.bfloat16)

    # Layer 1: Linear + LeakyReLU (bf16 MXU operands, f32 accumulation).
    h1 = jnp.dot(x, w1_ref[...], preferred_element_type=jnp.float32) + b1_ref[...]
    h1 = _leaky_relu(h1)

    # Layer 2: Linear + LeakyReLU.
    h2 = jnp.dot(h1.astype(jnp.bfloat16), w2_ref[...],
                 preferred_element_type=jnp.float32) + b2_ref[...]
    h2 = _leaky_relu(h2)

    # Layer 3 (256 -> 1), emitted lane-dense as a (1, bm) row:
    #   logits[0, j] = sum_k w3[0, k] * h2[j, k] + b3
    # computed as w3 @ h2.T (same pattern as q @ k.T in attention kernels),
    # which keeps the batch dimension on lanes for an unmasked full-lane store.
    logits = jnp.dot(w3_ref[...], h2.T,
                     preferred_element_type=jnp.float32) + b3_ref[...]
    out_ref[...] = jax.nn.sigmoid(logits).astype(out_ref.dtype)


def discriminator_forward(x, params, *, bm=256):
    """x: any shape whose trailing elements flatten to 784 per row (e.g. (B,1,28,28))."""
    w1, b1, w2, b2, w3, b3 = params
    x2d = x.reshape(-1, IN_DIM).astype(jnp.float32)
    B = x2d.shape[0]

    assert bm % 128 == 0, "batch tile must be a multiple of 128 (lane-dense output)"
    n_tiles = pl.cdiv(B, bm)
    B_pad = n_tiles * bm
    if B_pad != B:
        x2d = jnp.pad(x2d, ((0, B_pad - B), (0, 0)))

    # bf16 operands for the two big MXU matmuls; biases / last layer stay f32.
    w1c = w1.astype(jnp.bfloat16)
    w2c = w2.astype(jnp.bfloat16)

    out_row = pl.pallas_call(
        discriminator_kernel,
        out_shape=jax.ShapeDtypeStruct((1, B_pad), jnp.float32),
        grid_spec=pltpu.PrefetchScalarGridSpec(
            num_scalar_prefetch=0,
            grid=(n_tiles,),
            in_specs=[
                pl.BlockSpec((bm, IN_DIM), lambda i: (i, 0)),   # x tile
                pl.BlockSpec((IN_DIM, H1), lambda i: (0, 0)),   # w1 (resident)
                pl.BlockSpec((1, H1),      lambda i: (0, 0)),   # b1
                pl.BlockSpec((H1, H2),     lambda i: (0, 0)),   # w2
                pl.BlockSpec((1, H2),      lambda i: (0, 0)),   # b2
                pl.BlockSpec((1, H2),      lambda i: (0, 0)),   # w3 (row vector)
                pl.BlockSpec((1, 1),       lambda i: (0, 0)),   # b3
            ],
            out_specs=pl.BlockSpec((1, bm), lambda i: (0, i)),
        ),
        compiler_params=pltpu.CompilerParams(
            dimension_semantics=("parallel",),
        ),
    )(x2d, w1c, b1, w2c, b2, w3, b3)

    return out_row[0, :B].reshape(B, 1)


def init_params(key):
    """Deterministic synthetic parameters (PyTorch-Linear-like uniform init), f32."""
    ks = jax.random.split(key, 6)

    def lin(kw, kb, fan_in, fan_out):
        bound = 1.0 / jnp.sqrt(fan_in)
        w = jax.random.uniform(kw, (fan_in, fan_out), jnp.float32, -bound, bound)
        b = jax.random.uniform(kb, (1, fan_out), jnp.float32, -bound, bound)
        return w, b

    w1, b1 = lin(ks[0], ks[1], IN_DIM, H1)
    w2, b2 = lin(ks[2], ks[3], H1, H2)
    w3_col, b3 = lin(ks[4], ks[5], H2, 1)
    w3 = w3_col.T  # store as (1, 256) row vector
    return (w1, b1, w2, b2, w3, b3)


def reference_forward(x, params):
    """Plain-JAX reference mirroring the PyTorch forward (with the same bf16 matmul operands)."""
    w1, b1, w2, b2, w3, b3 = params
    x2d = x.reshape(-1, IN_DIM).astype(jnp.float32)
    h1 = jnp.dot(x2d.astype(jnp.bfloat16), w1.astype(jnp.bfloat16),
                 preferred_element_type=jnp.float32) + b1
    h1 = jnp.where(h1 > 0, h1, 0.2 * h1)
    h2 = jnp.dot(h1.astype(jnp.bfloat16), w2.astype(jnp.bfloat16),
                 preferred_element_type=jnp.float32) + b2
    h2 = jnp.where(h2 > 0, h2, 0.2 * h2)
    logits = h2 @ w3.T + b3
    return jax.nn.sigmoid(logits)


if __name__ == "__main__":
    key = jax.random.PRNGKey(0)
    k_params, k_x = jax.random.split(key)

    params = init_params(k_params)
    # MNIST-like batch, NCHW as in PyTorch; 300 is deliberately NOT a multiple
    # of the 256 batch tile so the padding path is exercised.
    B = 300
    x = jax.random.normal(k_x, (B, 1, 28, 28), dtype=jnp.float32)

    out = discriminator_forward(x, params)
    out = jax.block_until_ready(out)

    ref = reference_forward(x, params)
    assert out.shape == (B, 1)
    assert bool(jnp.all(jnp.isfinite(out)))
    # bf16 MXU operands => compare against the bf16-matched reference with a
    # correspondingly loosened tolerance (outputs are post-sigmoid in (0,1)).
    assert jnp.allclose(out, ref, atol=1e-2, rtol=1e-2), "mismatch vs reference"

    print("KERNEL_OK")
</pallas_src>

<mosaic_0001>
module attributes {stable_mosaic.version = 11 : i64} {
  func.func @discriminator_kernel(%arg0: i32, %arg1: memref<256x784xf32, #tpu.memory_space<vmem>>, %arg2: memref<784x512xbf16, #tpu.memory_space<vmem>>, %arg3: memref<1x512xf32, #tpu.memory_space<vmem>>, %arg4: memref<512x256xbf16, #tpu.memory_space<vmem>>, %arg5: memref<1x256xf32, #tpu.memory_space<vmem>>, %arg6: memref<1x256xf32, #tpu.memory_space<vmem>>, %arg7: memref<1x1xf32, #tpu.memory_space<vmem>>, %arg8: memref<1x256xf32, #tpu.memory_space<vmem>>) attributes {dimension_semantics = [#tpu.dimension_semantics<parallel>], iteration_bounds = array<i64: 2>, scalar_prefetch = 0 : i64, scratch_operands = 0 : i64, tpu.core_type = #tpu.core_type<tc>, window_params = [{transform_indices = @transform_0, window_bounds = array<i64: 256, 784>}, {pipeline_mode = #tpu.pipeline_mode<synchronous>, transform_indices = @transform_1, window_bounds = array<i64: 784, 512>}, {pipeline_mode = #tpu.pipeline_mode<synchronous>, transform_indices = @transform_2, window_bounds = array<i64: 1, 512>}, {pipeline_mode = #tpu.pipeline_mode<synchronous>, transform_indices = @transform_3, window_bounds = array<i64: 512, 256>}, {pipeline_mode = #tpu.pipeline_mode<synchronous>, transform_indices = @transform_4, window_bounds = array<i64: 1, 256>}, {pipeline_mode = #tpu.pipeline_mode<synchronous>, transform_indices = @transform_5, window_bounds = array<i64: 1, 256>}, {pipeline_mode = #tpu.pipeline_mode<synchronous>, transform_indices = @transform_6, window_bounds = array<i64: 1, 1>}, {transform_indices = @transform_7, window_bounds = array<i64: 1, 256>}]} {
    %c0 = arith.constant 0 : index
    %c0_0 = arith.constant 0 : index
    %0 = vector.load %arg1[%c0, %c0_0] : memref<256x784xf32, #tpu.memory_space<vmem>>, vector<256x784xf32>
    %1 = arith.truncf %0 : vector<256x784xf32> to vector<256x784xbf16>
    %c0_1 = arith.constant 0 : index
    %c0_2 = arith.constant 0 : index
    %2 = vector.load %arg2[%c0_1, %c0_2] : memref<784x512xbf16, #tpu.memory_space<vmem>>, vector<784x512xbf16>
    %cst = arith.constant dense<0.000000e+00> : vector<256x512xf32>
    %3 = tpu.matmul %1, %2, %cst {dimension_numbers = #tpu.dot_dimension_numbers<[1], [0], [0], [1], [0, 0, 1, 1], [], []>} : vector<256x784xbf16>, vector<784x512xbf16>, vector<256x512xf32> -> vector<256x512xf32>
    %c0_3 = arith.constant 0 : index
    %c0_4 = arith.constant 0 : index
    %4 = vector.load %arg3[%c0_3, %c0_4] : memref<1x512xf32, #tpu.memory_space<vmem>>, vector<1x512xf32>
    %5 = vector.broadcast %4 : vector<1x512xf32> to vector<256x512xf32>
    %6 = arith.addf %3, %5 : vector<256x512xf32>
    %cst_5 = arith.constant 0.000000e+00 : f32
    %7 = vector.broadcast %cst_5 : f32 to vector<256x512xf32>
    %8 = arith.cmpf ogt, %6, %7 : vector<256x512xf32>
    %cst_6 = arith.constant 2.000000e-01 : f32
    %9 = vector.broadcast %cst_6 : f32 to vector<256x512xf32>
    %10 = arith.mulf %9, %6 : vector<256x512xf32>
    %11 = arith.select %8, %6, %10 : vector<256x512xi1>, vector<256x512xf32>
    %12 = arith.truncf %11 : vector<256x512xf32> to vector<256x512xbf16>
    %c0_7 = arith.constant 0 : index
    %c0_8 = arith.constant 0 : index
    %13 = vector.load %arg4[%c0_7, %c0_8] : memref<512x256xbf16, #tpu.memory_space<vmem>>, vector<512x256xbf16>
    %cst_9 = arith.constant dense<0.000000e+00> : vector<256x256xf32>
    %14 = tpu.matmul %12, %13, %cst_9 {dimension_numbers = #tpu.dot_dimension_numbers<[1], [0], [0], [1], [0, 0, 1, 1], [], []>} : vector<256x512xbf16>, vector<512x256xbf16>, vector<256x256xf32> -> vector<256x256xf32>
    %c0_10 = arith.constant 0 : index
    %c0_11 = arith.constant 0 : index
    %15 = vector.load %arg5[%c0_10, %c0_11] : memref<1x256xf32, #tpu.memory_space<vmem>>, vector<1x256xf32>
    %16 = vector.broadcast %15 : vector<1x256xf32> to vector<256x256xf32>
    %17 = arith.addf %14, %16 : vector<256x256xf32>
    %cst_12 = arith.constant 0.000000e+00 : f32
    %18 = vector.broadcast %cst_12 : f32 to vector<256x256xf32>
    %19 = arith.cmpf ogt, %17, %18 : vector<256x256xf32>
    %cst_13 = arith.constant 2.000000e-01 : f32
    %20 = vector.broadcast %cst_13 : f32 to vector<256x256xf32>
    %21 = arith.mulf %20, %17 : vector<256x256xf32>
    %22 = arith.select %19, %17, %21 : vector<256x256xi1>, vector<256x256xf32>
    %c0_14 = arith.constant 0 : index
    %c0_15 = arith.constant 0 : index
    %23 = vector.load %arg6[%c0_14, %c0_15] : memref<1x256xf32, #tpu.memory_space<vmem>>, vector<1x256xf32>
    %24 = tpu.transpose %22, [1, 0] : vector<256x256xf32> -> vector<256x256xf32>
    %cst_16 = arith.constant dense<0.000000e+00> : vector<1x256xf32>
    %25 = tpu.matmul %23, %24, %cst_16 {dimension_numbers = #tpu.dot_dimension_numbers<[1], [0], [0], [1], [0, 0, 1, 1], [], []>} : vector<1x256xf32>, vector<256x256xf32>, vector<1x256xf32> -> vector<1x256xf32>
    %c0_17 = arith.constant 0 : index
    %c0_18 = arith.constant 0 : index
    %26 = vector.load %arg7[%c0_17, %c0_18] : memref<1x1xf32, #tpu.memory_space<vmem>>, vector<1x1xf32>
    %27 = vector.broadcast %26 : vector<1x1xf32> to vector<1x256xf32>
    %28 = arith.addf %25, %27 : vector<1x256xf32>
    %29 = arith.negf %28 : vector<1x256xf32>
    %30 = math.exp %29 : vector<1x256xf32>
    %cst_19 = arith.constant 1.000000e+00 : f32
    %31 = vector.broadcast %cst_19 : f32 to vector<1x256xf32>
    %32 = arith.addf %31, %30 : vector<1x256xf32>
    %33 = arith.divf %31, %32 : vector<1x256xf32>
    %c0_20 = arith.constant 0 : index
    %c0_21 = arith.constant 0 : index
    %34 = vector.load %arg8[%c0_20, %c0_21] : memref<1x256xf32, #tpu.memory_space<vmem>>, vector<1x256xf32>
    tpu.vector_store %arg8[%c0_20, %c0_21], %33 {strides = array<i32>} : memref<1x256xf32, #tpu.memory_space<vmem>>, vector<1x256xf32>,
    return
  }
  func.func @transform_0(%arg0: i32) -> (i32, i32) {
    %c0_i32 = arith.constant 0 : i32
    %c0_i32_0 = arith.constant 0 : i32
    return %arg0, %c0_i32 : i32, i32
  }
  func.func @transform_1(%arg0: i32) -> (i32, i32) {
    %c0_i32 = arith.constant 0 : i32
    %c0_i32_0 = arith.constant 0 : i32
    %c0_i32_1 = arith.constant 0 : i32
    return %c0_i32, %c0_i32_0 : i32, i32
  }
  func.func @transform_2(%arg0: i32) -> (i32, i32) {
    %c0_i32 = arith.constant 0 : i32
    %c0_i32_0 = arith.constant 0 : i32
    %c0_i32_1 = arith.constant 0 : i32
    return %c0_i32, %c0_i32_0 : i32, i32
  }
  func.func @transform_3(%arg0: i32) -> (i32, i32) {
    %c0_i32 = arith.constant 0 : i32
    %c0_i32_0 = arith.constant 0 : i32
    %c0_i32_1 = arith.constant 0 : i32
    return %c0_i32, %c0_i32_0 : i32, i32
  }
  func.func @transform_4(%arg0: i32) -> (i32, i32) {
    %c0_i32 = arith.constant 0 : i32
    %c0_i32_0 = arith.constant 0 : i32
    %c0_i32_1 = arith.constant 0 : i32
    return %c0_i32, %c0_i32_0 : i32, i32
  }
  func.func @transform_5(%arg0: i32) -> (i32, i32) {
    %c0_i32 = arith.constant 0 : i32
    %c0_i32_0 = arith.constant 0 : i32
    %c0_i32_1 = arith.constant 0 : i32
    return %c0_i32, %c0_i32_0 : i32, i32
  }
  func.func @transform_6(%arg0: i32) -> (i32, i32) {
    %c0_i32 = arith.constant 0 : i32
    %c0_i32_0 = arith.constant 0 : i32
    %c0_i32_1 = arith.constant 0 : i32
    return %c0_i32, %c0_i32_0 : i32, i32
  }
  func.func @transform_7(%arg0: i32) -> (i32, i32) {
    %c0_i32 = arith.constant 0 : i32
    %c0_i32_0 = arith.constant 0 : i32
    return %c0_i32, %arg0 : i32, i32
  }
}

</mosaic_0001>

<bundles_post_ra>
// kernel: tpu_custom_call.1
= control target key start
LH: loop header
LB: loop body
LE: loop exit
PB: predicated region body
PF: predicated region fallthrough
CT: control target
= control target key end

     0   :  { %s8864_s0 = inlined_call_operand.vmem [shape: f32[512,784], index: 0, kind: input, shape index: {}]   ;;  %s8865_s1 = inlined_call_operand.vmem [shape: bf16[784,512], index: 1, kind: input, shape index: {}]   ;;  %s8866_s2 = inlined_call_operand.vmem [shape: f32[1,512], index: 2, kind: input, shape index: {}]   ;;  %s8867_s3 = inlined_call_operand.vmem [shape: bf16[512,256], index: 3, kind: input, shape index: {}]   ;;  %s8868_s4 = inlined_call_operand.vmem [shape: f32[1,256], index: 4, kind: input, shape index: {}]   ;;  %s8869_s5 = inlined_call_operand.vmem [shape: f32[1,256], index: 5, kind: input, shape index: {}]   ;;  %s8870_s6 = inlined_call_operand.<no memory space> [shape: f32[1,1], index: 6, kind: input, shape index: {}]   ;;  %s8871_s7 = inlined_call_operand.hbm [shape: f32[1,512], index: 7, kind: output, shape index: {}]  }
   0x1   :  { %v12_v0 = vstv %s8870_s6 }
   0x2   :  { %13 = vst [vmem:[#allocation2] sm:$0x1] %v12_v0 }
   0x3   :  { %14 = vsyncpa [#allocation4], 0 }
   0x4   :  { %16 = vsyncpa [#allocation4 + $0x1], 0  ;;  %s5894_s26 = smov 0   ;;  %s5896_s27 = smov 0  }
   0x5   :  { %s5898_s28 = smov 0   ;;  %s5900_s29 = smov 0  }
   0x6 LB: > { %s5036_s6 = sadd.s32 4294967295, %s5846_s29   ;;  %s5037_s30 = sadd.s32 4294967294, %s5846_s29   ;;  %s5846_s29 = sphi %s5900_s29, %s9434_s29   ;;  %s5842_s28 = sphi %s5898_s28, %s9433_s28   ;;  %s5838_s27 = sphi %s5896_s27, %s9432_s27   ;;  %s5834_s26 = sphi %s5894_s26, %s9431_s26  }
   0x7   : > { %s5917_s8 = sadd.s32 1, %s5846_s29   ;;  %s181_s9 = sadd.s32 1, %s5842_s28 }
   0x8   : > { %s178_s10 = ssub.s32 %s5846_s29, %s5917_s8  ;;  %p191_p0 = scmp.ne.s32.totalorder %s5842_s28, %s5838_s27 }
   0x9   : > { %p179_p1 = scmp.eq.s32.totalorder %s178_s10, 0  ;;  %p192_p2 = scmp.eq.s32.totalorder %s5036_s6, 1 }
   0xa   : > { %p197_p3 = scmp.ne.s32.totalorder %s5838_s27, %s5834_s26  ;;  %p198_p4 = scmp.eq.s32.totalorder %s5037_s30, 1 }
   0xb   : > { %s5929_s11 = scalar_select %p179_p1, %s5842_s28, %s181_s9  }
   0xc   : > { %p5931_p5 = por %p192_p2, %p191_p0  ;;  %p5935_p6 = por %p198_p4, %p197_p3 }
   0xd   : > { %p5040_p7 = scmp.ge.s32.totalorder %s5846_s29, 1  ;;  %p244_p8 = scmp.lt.s32.totalorder %s5846_s29, 3 }
   0xf   : > { %p245_p9 = pnand %p5040_p7, %p244_p8 }
  0x11   : > { %248 = sbr.rel (%p245_p9) target bundleno = 1317 (0x525), region = 48 }
  0x16   : > { %v5387_v1 = vld [vmem:[%s8865_s1 + $0xe4] ss:$16 sps:$4 sm:$0xff]   ;;  %v5391_v3 = vld [vmem:[%s8865_s1 + $0xe0] ss:$16 sps:$4 sm:$0xff]   ;;  %s6030_s9 = sshll.u32 %s5036_s6, 5  ;;  %vm1820_vm0 = vcmask 130048  }
  0x17   : > { %v5389_v2 = vld [vmem:[%s8865_s1 + $0x2e4] ss:$16 sps:$4 sm:$0xff]   ;;  %1869 = vmatprep.subr.bf16.mxu0 %v5387_v1  ;;  %v5392_v4 = vld [vmem:[%s8865_s1 + $0x2e0] ss:$16 sps:$4 sm:$0xff]   ;;  %p278_p10 = scmp.lt.s32.totalorder %s6030_s9, 63  ;;  %s274_s23 = sand.u32 1, %s5838_s27  }
  0x18   : > { %2062 = vmatprep.subr.bf16.mxu1 %v5389_v2  ;;  %v5393_v5 = vld [vmem:[%s8865_s1 + $0xc4] ss:$16 sps:$4 sm:$0xff]   ;;  %1870 = vmatpush1.bf16.msra.mxu0 %v5391_v3  ;;  %v5397_v7 = vld [vmem:[%s8865_s1 + $0xc0] ss:$16 sps:$4 sm:$0xff]   ;;  %s5041_s24 = sshll.u32 %s274_s23, 1  ;;  %s4976_s15 = scalar_lea.hbm %s8871_s7, %s6030_s9 }
  0x19   : > { %2063 = vmatpush1.bf16.msra.mxu1 %v5392_v4  ;;  %v5395_v6 = vld [vmem:[%s8865_s1 + $0x2c4] ss:$16 sps:$4 sm:$0xff]   ;;  %1871 = vmatprep.subr.bf16.mxu0 %v5393_v5  ;;  %v5398_v8 = vld [vmem:[%s8865_s1 + $0x2c0] ss:$16 sps:$4 sm:$0xff]   ;;  %s279_s30 = scalar_select %p278_p10, %s6030_s9, 63 }
  0x1a   : > { %2064 = vmatprep.subr.bf16.mxu1 %v5395_v6  ;;  %v5399_v9 = vld [vmem:[%s8865_s1 + $0xa4] ss:$16 sps:$4 sm:$0xff]   ;;  %v5403_v11 = vld [vmem:[%s8865_s1 + $0xa0] ss:$16 sps:$4 sm:$0xff]   ;;  %s276_s25 = scalar_lea.vmem [#allocation3], %s5041_s24  ;;  %s4964_s16 = scalar_lea.sflag [#allocation4], %s274_s23 }
  0x1b   : > { %v5401_v10 = vld [vmem:[%s8865_s1 + $0x2a4] ss:$16 sps:$4 sm:$0xff]   ;;  %v5404_v12 = vld [vmem:[%s8865_s1 + $0x2a0] ss:$16 sps:$4 sm:$0xff]   ;;  %s5344_s6 = smul.u32 56, %s279_s30  ;;  %s4978_s10 = sshll.u32 %s276_s25, 4  ;;  %s4979_s10 = int_to_ptr.vmem [resolvable:$true] %s4978_s10 }
  0x1c   : > { %1872 = vmatpush1.bf16.msra.mxu0 %v5397_v7  ;;  %v5405_v13 = vld [vmem:[%s8865_s1 + $0x84] ss:$16 sps:$4 sm:$0xff]   ;;  %v5409_v15 = vld [vmem:[%s8865_s1 + $0x80] ss:$16 sps:$4 sm:$0xff]   ;;  %s5786_s18 = scalar_lea.vmem %s4979_s10, 32  ;;  %s5850_s19 = smov [#allocation3]  }
  0x1d   : > { %2065 = vmatpush1.bf16.msra.mxu1 %v5398_v8  ;;  %1873 = vmatprep.subr.bf16.mxu0 %v5399_v9  ;;  %v5407_v14 = vld [vmem:[%s8865_s1 + $0x284] ss:$16 sps:$4 sm:$0xff]   ;;  %v5410_v16 = vld [vmem:[%s8865_s1 + $0x280] ss:$16 sps:$4 sm:$0xff]   ;;  %s6082_s17 = scalar_lea.vmem %s8864_s0, %s5344_s6  ;;  %p5787_p11 = scmp.ne.s32.totalorder %s4979_s10, %s5786_s18 }
  0x1e   : > { %2066 = vmatprep.subr.bf16.mxu1 %v5401_v10  ;;  %v5411_v17 = vld [vmem:[%s8865_s1 + $0x64] ss:$16 sps:$4 sm:$0xff]   ;;  %v5415_v19 = vld [vmem:[%s8865_s1 + $0x60] ss:$16 sps:$4 sm:$0xff]   ;;  %v287_v47 = vld [vmem:[%s6082_s17 + $0x8] sm:$0xff]  ;;  %s5790_s20 = sshll.u32 %s5850_s19, 4  ;;  %s5791_s20 = int_to_ptr.vmem [resolvable:$false] %s5790_s20 }
  0x1f   : > { %v5413_v18 = vld [vmem:[%s8865_s1 + $0x264] ss:$16 sps:$4 sm:$0xff]   ;;  %v5416_v20 = vld [vmem:[%s8865_s1 + $0x260] ss:$16 sps:$4 sm:$0xff]   ;;  %v289_v49 = vld [vmem:[%s6082_s17 + $0x18] sm:$0xff]  ;;  %p5788_p12 = pnand %p5787_p11, %p5931_p5  ;;  %s5792_s21 = scalar_lea.vmem %s5791_s20, 64 }
  0x20   : > { %1874 = vmatpush1.bf16.msra.mxu0 %v5403_v11  ;;  %v5417_v21 = vld [vmem:[%s8865_s1 + $0x44] ss:$16 sps:$4 sm:$0xff]   ;;  %v5421_v23 = vld [vmem:[%s8865_s1 + $0x40] ss:$16 sps:$4 sm:$0xff]   ;;  %v293_v8 = vld [vmem:[%s6082_s17 + $0x38] sm:$0xff]  ;;  %p5793_p0 = scmp.lt.s32.totalorder %s4979_s10, %s5791_s20  ;;  %p5794_p1 = scmp.lt.s32.totalorder %s5792_s21, %s5786_s18 }
  0x21   : > { %2067 = vmatpush1.bf16.msra.mxu1 %v5404_v12  ;;  %1875 = vmatprep.subr.bf16.mxu0 %v5405_v13  ;;  %v5419_v22 = vld [vmem:[%s8865_s1 + $0x244] ss:$16 sps:$4 sm:$0xff]   ;;  %v5422_v24 = vld [vmem:[%s8865_s1 + $0x240] ss:$16 sps:$4 sm:$0xff]   ;;  %v295_v10 = vld [vmem:[%s6082_s17 + $0x48] sm:$0xff]  ;;  %p5789_p13 = pneg %p5788_p12 }
  0x22   : > { %2068 = vmatprep.subr.bf16.mxu1 %v5407_v14  ;;  %v5423_v25 = vld [vmem:[%s8865_s1 + $0x24] ss:$16 sps:$4 sm:$0xff]   ;;  %v5427_v27 = vld [vmem:[%s8865_s1 + $0x20] ss:$16 sps:$4 sm:$0xff]   ;;  %v301_v13 = vld [vmem:[%s6082_s17 + $0x78] sm:$0xff]  ;;  %p5795_p2 = por %p5794_p1, %p5793_p0 }
  0x23   : > { %v5425_v26 = vld [vmem:[%s8865_s1 + $0x224] ss:$16 sps:$4 sm:$0xff]   ;;  %v5428_v28 = vld [vmem:[%s8865_s1 + $0x220] ss:$16 sps:$4 sm:$0xff]  }
  0x24   : > { %1876 = vmatpush1.bf16.msra.mxu0 %v5409_v15  ;;  %v5429_v29 = vld [vmem:[%s8865_s1 + $0x4] ss:$16 sps:$4 sm:$0xff]   ;;  %v5433_v31 = vld [vmem:[%s8865_s1] ss:$16 sps:$4 sm:$0xff]   ;;  %v303_v15 = vld [vmem:[%s6082_s17 + $0x88] sm:$0xff]  ;;  %p5796_p3 = pnand %p5795_p2, %p5789_p13 }
  0x25   : > { %2069 = vmatpush1.bf16.msra.mxu1 %v5410_v16  ;;  %1877 = vmatprep.subr.bf16.mxu0 %v5411_v17  ;;  %v5431_v30 = vld [vmem:[%s8865_s1 + $0x204] ss:$16 sps:$4 sm:$0xff]   ;;  %v5434_v32 = vld [vmem:[%s8865_s1 + $0x200] ss:$16 sps:$4 sm:$0xff]   ;;  %v8872_v17 = vmov 0  }
  0x26   : > { %2070 = vmatprep.subr.bf16.mxu1 %v5413_v18  ;;  %v5435_v33 = vld [vmem:[%s8865_s1 + $0x1e4] ss:$16 sps:$4 sm:$0xff]   ;;  %v5439_v35 = vld [vmem:[%s8865_s1 + $0x1e0] ss:$16 sps:$4 sm:$0xff]   ;;  %5386 = vset.pattern.permute.xlu0 %v8872_v17  ;;  %v475_v17 = vld [vmem:[%s6082_s17 + $0x5e8] sm:$0xff] }
  0x27   : > { %v5437_v34 = vld [vmem:[%s8865_s1 + $0x3e4] ss:$16 sps:$4 sm:$0xff]   ;;  %v5440_v36 = vld [vmem:[%s8865_s1 + $0x3e0] ss:$16 sps:$4 sm:$0xff]  }
  0x28   : > { %1878 = vmatpush1.bf16.msra.mxu0 %v5415_v19  ;;  %v5441_v37 = vld [vmem:[%s8865_s1 + $0x1c4] ss:$16 sps:$4 sm:$0xff]   ;;  %v5445_v39 = vld [vmem:[%s8865_s1 + $0x1c0] ss:$16 sps:$4 sm:$0xff]  }
  0x29   : > { %2071 = vmatpush1.bf16.msra.mxu1 %v5416_v20  ;;  %1879 = vmatprep.subr.bf16.mxu0 %v5417_v21  ;;  %v5443_v38 = vld [vmem:[%s8865_s1 + $0x3c4] ss:$16 sps:$4 sm:$0xff]   ;;  %v5446_v40 = vld [vmem:[%s8865_s1 + $0x3c0] ss:$16 sps:$4 sm:$0xff]  }
  0x2a   : > { %2072 = vmatprep.subr.bf16.mxu1 %v5419_v22  ;;  %v5447_v41 = vld [vmem:[%s8865_s1 + $0x1a4] ss:$16 sps:$4 sm:$0xff]   ;;  %v5451_v43 = vld [vmem:[%s8865_s1 + $0x1a0] ss:$16 sps:$4 sm:$0xff]  }
  0x2b   : > { %v5449_v42 = vld [vmem:[%s8865_s1 + $0x3a4] ss:$16 sps:$4 sm:$0xff]   ;;  %v5452_v44 = vld [vmem:[%s8865_s1 + $0x3a0] ss:$16 sps:$4 sm:$0xff]  }
  0x2c   : > { %1880 = vmatpush1.bf16.msra.mxu0 %v5421_v23  ;;  %v5453_v45 = vld [vmem:[%s8865_s1 + $0x184] ss:$16 sps:$4 sm:$0xff]   ;;  %v5457_v51 = vld [vmem:[%s8865_s1 + $0x180] ss:$16 sps:$4 sm:$0xff]  }
  0x2d   : > { %2073 = vmatpush1.bf16.msra.mxu1 %v5422_v24  ;;  %1881 = vmatprep.subr.bf16.mxu0 %v5423_v25  ;;  %v5455_v46 = vld [vmem:[%s8865_s1 + $0x384] ss:$16 sps:$4 sm:$0xff]   ;;  %v5458_v52 = vld [vmem:[%s8865_s1 + $0x380] ss:$16 sps:$4 sm:$0xff]   ;;  %v307_v25 = vld [vmem:[%s6082_s17 + $0xa8] sm:$0xff] }
  0x2e   : > { %2074 = vmatprep.subr.bf16.mxu1 %v5425_v26  ;;  %v294_v48 = vld [vmem:[%s6082_s17 + $0x40] sm:$0xff]  ;;  %v296_v50 = vld [vmem:[%s6082_s17 + $0x50] sm:$0xff] }
  0x2f   : > { %v5459_v53 = vld [vmem:[%s8865_s1 + $0x164] ss:$16 sps:$4 sm:$0xff]   ;;  %v6103_v54 = vpack.c.bf16 %v294_v48, %v287_v47  ;;  %v6105_v55 = vpack.c.bf16 %v296_v50, %v289_v49  ;;  %v5463_v57 = vld [vmem:[%s8865_s1 + $0x160] ss:$16 sps:$4 sm:$0xff]   ;;  %v331_v47 = vld [vmem:[%s6082_s17 + $0x168] sm:$0xff] }
  0x30   : > { %1882 = vmatpush1.bf16.msra.mxu0 %v5427_v27  ;;  %v5461_v56 = vld [vmem:[%s8865_s1 + $0x364] ss:$16 sps:$4 sm:$0xff]   ;;  %v5464_v58 = vld [vmem:[%s8865_s1 + $0x360] ss:$16 sps:$4 sm:$0xff]  }
  0x31   : > { %2075 = vmatpush1.bf16.msra.mxu1 %v5428_v28  ;;  %1883 = vmatprep.subr.bf16.mxu0 %v5429_v29  ;;  %v5465_v59 = vld [vmem:[%s8865_s1 + $0x144] ss:$16 sps:$4 sm:$0xff]   ;;  %v5469_v61 = vld [vmem:[%s8865_s1 + $0x140] ss:$16 sps:$4 sm:$0xff]   ;;  %v309_v28 = vld [vmem:[%s6082_s17 + $0xb8] sm:$0xff] }
  0x32   : > { %2076 = vmatprep.subr.bf16.mxu1 %v5431_v30  ;;  %1901 = vmatprep.mubr.bf16.mxu0 %v6103_v54  ;;  %v5467_v60 = vld [vmem:[%s8865_s1 + $0x344] ss:$16 sps:$4 sm:$0xff]   ;;  %v5470_v62 = vld [vmem:[%s8865_s1 + $0x340] ss:$16 sps:$4 sm:$0xff]   ;;  %v315_v30 = vld [vmem:[%s6082_s17 + $0xe8] sm:$0xff] }
  0x33   : > { %2094 = vmatprep.mubr.bf16.mxu1 %v6105_v55  ;;  %v5471_v63 = vld [vmem:[%s8865_s1 + $0x124] ss:$16 sps:$4 sm:$0xff]   ;;  %v5475_v1 = vld [vmem:[%s8865_s1 + $0x120] ss:$16 sps:$4 sm:$0xff]  }
  0x34   : > { %1884 = vmatpush1.bf16.msra.mxu0 %v5433_v31  ;;  %v5473_v0 = vld [vmem:[%s8865_s1 + $0x324] ss:$16 sps:$4 sm:$0xff]   ;;  %v5476_v2 = vld [vmem:[%s8865_s1 + $0x320] ss:$16 sps:$4 sm:$0xff]  }
  0x35   : > { %2077 = vmatpush1.bf16.msra.mxu1 %v5434_v32  ;;  %1885 = vmatprep.subr.bf16.mxu0 %v5435_v33  ;;  %v5477_v3 = vld [vmem:[%s8865_s1 + $0x104] ss:$16 sps:$4 sm:$0xff]   ;;  %v5481_v5 = vld [vmem:[%s8865_s1 + $0x100] ss:$16 sps:$4 sm:$0xff]   ;;  %v317_v32 = vld [vmem:[%s6082_s17 + $0xf8] sm:$0xff] }
  0x36   : > { %2078 = vmatprep.subr.bf16.mxu1 %v5437_v34  ;;  %v5479_v4 = vld [vmem:[%s8865_s1 + $0x304] ss:$16 sps:$4 sm:$0xff]   ;;  %v5482_v6 = vld [vmem:[%s8865_s1 + $0x300] ss:$16 sps:$4 sm:$0xff]  }
  0x37   : > { %v286_v7 = vld [vmem:[%s6082_s17] sm:$0xff]  ;;  %v288_v9 = vld [vmem:[%s6082_s17 + $0x10] sm:$0xff] }
  0x38   : > { %1886 = vmatpush2.bf16.msra.mxu0 %v5439_v35  ;;  %v5485_v11 = vld [vmem:[%s8865_s1 + $0x4e4] ss:$16 sps:$4 sm:$0xff]   ;;  %v6169_v18 = vpack.c.bf16 %v293_v8, %v286_v7  ;;  %v6171_v19 = vpack.c.bf16 %v295_v10, %v288_v9  ;;  %v5483_v20 = vld [vmem:[%s8865_s1 + $0x4e0] ss:$16 sps:$4 sm:$0xff]  }
  0x39   : > { %2079 = vmatpush2.bf16.msra.mxu1 %v5440_v36  ;;  %1887 = vmatprep.subr.bf16.mxu0 %v5441_v37  ;;  %v5488_v12 = vld [vmem:[%s8865_s1 + $0x604] ss:$16 sps:$4 sm:$0xff]   ;;  %v5486_v21 = vld [vmem:[%s8865_s1 + $0x600] ss:$16 sps:$4 sm:$0xff]  }
  0x3a   : > { %2080 = vmatprep.subr.bf16.mxu1 %v5443_v38  ;;  %v308_v14 = vld [vmem:[%s6082_s17 + $0xb0] sm:$0xff]  ;;  %v310_v16 = vld [vmem:[%s6082_s17 + $0xc0] sm:$0xff] }
  0x3b   : > { %v6179_v22 = vpack.c.bf16 %v308_v14, %v301_v13  ;;  %v6181_v23 = vpack.c.bf16 %v310_v16, %v303_v15  ;;  %v300_v24 = vld [vmem:[%s6082_s17 + $0x70] sm:$0xff]  ;;  %v302_v27 = vld [vmem:[%s6082_s17 + $0x80] sm:$0xff]  ;;  %v351_v14 = vld [vmem:[%s6082_s17 + $0x208] sm:$0xff] }
  0x3c   : > { %1888 = vmatpush2.bf16.msra.mxu0 %v5445_v39  ;;  %v5491_v26 = vld [vmem:[%s8865_s1 + $0x4c4] ss:$16 sps:$4 sm:$0xff]   ;;  %v5489_v29 = vld [vmem:[%s8865_s1 + $0x4c0] ss:$16 sps:$4 sm:$0xff]   ;;  %v6204_v35 = vpack.c.bf16 %v307_v25, %v300_v24  ;;  %v6206_v36 = vpack.c.bf16 %v309_v28, %v302_v27  ;;  %v357_v15 = vld [vmem:[%s6082_s17 + $0x238] sm:$0xff] }
  0x3d   : > { %2081 = vmatpush2.bf16.msra.mxu1 %v5446_v40  ;;  %1889 = vmatprep.subr.bf16.mxu0 %v5447_v41  ;;  %v322_v31 = vld [vmem:[%s6082_s17 + $0x120] sm:$0xff]  ;;  %v324_v33 = vld [vmem:[%s6082_s17 + $0x130] sm:$0xff] }
  0x3e   : > { %2082 = vmatprep.subr.bf16.mxu1 %v5449_v42  ;;  %v5494_v34 = vld [vmem:[%s8865_s1 + $0x4a4] ss:$16 sps:$4 sm:$0xff]   ;;  %v6208_v37 = vpack.c.bf16 %v322_v31, %v315_v30  ;;  %v6210_v38 = vpack.c.bf16 %v324_v33, %v317_v32  ;;  %v5492_v39 = vld [vmem:[%s8865_s1 + $0x4a0] ss:$16 sps:$4 sm:$0xff]   ;;  %v321_v42 = vld [vmem:[%s6082_s17 + $0x118] sm:$0xff] }
  0x3f   : > { %v314_v40 = vld [vmem:[%s6082_s17 + $0xe0] sm:$0xff]  ;;  %v344_v13 = vld [vmem:[%s6082_s17 + $0x1d0] sm:$0xff]  ;;  %v363_v33 = vld [vmem:[%s6082_s17 + $0x268] sm:$0xff] }
  0x40   : > { %1890 = vmatpush2.bf16.msra.mxu0 %v5451_v43  ;;  %v5497_v41 = vld [vmem:[%s8865_s1 + $0x484] ss:$16 sps:$4 sm:$0xff]   ;;  %v5495_v49 = vld [vmem:[%s8865_s1 + $0x480] ss:$16 sps:$4 sm:$0xff]   ;;  %v6302_v27 = vpack.c.bf16 %v351_v14, %v344_v13 }
  0x41   : > { %2083 = vmatpush2.bf16.msra.mxu1 %v5452_v44  ;;  %1891 = vmatprep.subr.bf16.mxu0 %v5453_v45  ;;  %v316_v43 = vld [vmem:[%s6082_s17 + $0xf0] sm:$0xff]  ;;  %v323_v44 = vld [vmem:[%s6082_s17 + $0x128] sm:$0xff]  ;;  %v329_v45 = vld [vmem:[%s6082_s17 + $0x158] sm:$0xff] }
  0x42   : > { %2084 = vmatprep.subr.bf16.mxu1 %v5455_v46  ;;  %v336_v46 = vld [vmem:[%s6082_s17 + $0x190] sm:$0xff]  ;;  %v338_v48 = vld [vmem:[%s6082_s17 + $0x1a0] sm:$0xff] }
  0x43   : > { %v5500_v50 = vld [vmem:[%s8865_s1 + $0x464] ss:$16 sps:$4 sm:$0xff]   ;;  %v5504_v9 = vld [vmem:[%s8865_s1 + $0x420] ss:$16 sps:$4 sm:$0xff]  }
  0x44   : > { %1892 = vmatpush2.bf16.msra.mxu0 %v5457_v51  ;;  %v6236_v51 = vpack.c.bf16 %v321_v42, %v314_v40  ;;  %v342_v10 = vld [vmem:[%s6082_s17 + $0x1c0] sm:$0xff]  ;;  %v364_v16 = vld [vmem:[%s6082_s17 + $0x270] sm:$0xff]  ;;  %v371_v40 = vld [vmem:[%s6082_s17 + $0x2a8] sm:$0xff] }
  0x45   : > { %2085 = vmatpush2.bf16.msra.mxu1 %v5458_v52  ;;  %1893 = vmatprep.subr.bf16.mxu0 %v5459_v53  ;;  %v6238_v52 = vpack.c.bf16 %v323_v44, %v316_v43  ;;  %v6240_v53 = vpack.c.bf16 %v336_v46, %v329_v45  ;;  %v5507_v24 = vld [vmem:[%s8865_s1 + $0x400] ss:$16 sps:$4 sm:$0xff]   ;;  %v5512_v25 = vld [vmem:[%s8865_s1 + $0x5e4] ss:$16 sps:$4 sm:$0xff]   ;;  %v6304_v28 = vpack.c.bf16 %v364_v16, %v357_v15  ;;  %v373_v42 = vld [vmem:[%s6082_s17 + $0x2b8] sm:$0xff] }
  0x46   : > { %2086 = vmatprep.subr.bf16.mxu1 %v5461_v56  ;;  %v6242_v56 = vpack.c.bf16 %v338_v48, %v331_v47  ;;  %v5510_v30 = vld [vmem:[%s8865_s1 + $0x5e0] ss:$16 sps:$4 sm:$0xff]   ;;  %v5515_v32 = vld [vmem:[%s8865_s1 + $0x5c4] ss:$16 sps:$4 sm:$0xff]   ;;  %v391_v15 = vld [vmem:[%s6082_s17 + $0x348] sm:$0xff] }
  0x47   : > { %v356_v31 = vld [vmem:[%s6082_s17 + $0x230] sm:$0xff]  ;;  %v386_v16 = vld [vmem:[%s6082_s17 + $0x320] sm:$0xff] }
  0x48   : > { %1894 = vmatpush2.bf16.msra.mxu0 %v5463_v57  ;;  %v5498_v57 = vld [vmem:[%s8865_s1 + $0x460] ss:$16 sps:$4 sm:$0xff]   ;;  %v5518_v45 = vld [vmem:[%s8865_s1 + $0x5a4] ss:$16 sps:$4 sm:$0xff]   ;;  %v6332_v46 = vpack.c.bf16 %v363_v33, %v356_v31 }
  0x49   : > { %2087 = vmatpush2.bf16.msra.mxu1 %v5464_v58  ;;  %1895 = vmatprep.subr.bf16.mxu0 %v5465_v59  ;;  %v328_v58 = vld [vmem:[%s6082_s17 + $0x150] sm:$0xff] }
  0x4a   : > { %2088 = vmatprep.subr.bf16.mxu1 %v5467_v60  ;;  %v5503_v59 = vld [vmem:[%s8865_s1 + $0x444] ss:$16 sps:$4 sm:$0xff]   ;;  %v335_v60 = vld [vmem:[%s6082_s17 + $0x188] sm:$0xff]  ;;  %v5513_v44 = vld [vmem:[%s8865_s1 + $0x5c0] ss:$16 sps:$4 sm:$0xff]  }
  0x4b   : > { %v380_v43 = vld [vmem:[%s6082_s17 + $0x2f0] sm:$0xff] }
  0x4c   : > { %1896 = vmatpush2.bf16.msra.mxu0 %v5469_v61  ;;  %v330_v61 = vld [vmem:[%s6082_s17 + $0x160] sm:$0xff]  ;;  %v384_v14 = vld [vmem:[%s6082_s17 + $0x310] sm:$0xff] }
  0x4d   : > { %2089 = vmatpush2.bf16.msra.mxu1 %v5470_v62  ;;  %1897 = vmatprep.subr.bf16.mxu0 %v5471_v63  ;;  %v337_v62 = vld [vmem:[%s6082_s17 + $0x198] sm:$0xff]  ;;  %v343_v63 = vld [vmem:[%s6082_s17 + $0x1c8] sm:$0xff]  ;;  %v5522_v13 = vld [vmem:[%s8865_s1 + $0x560] ss:$16 sps:$4 sm:$0xff]  }
  0x4e   : > { %2090 = vmatprep.subr.bf16.mxu1 %v5473_v0  ;;  %v350_v0 = vld [vmem:[%s6082_s17 + $0x200] sm:$0xff]  ;;  %v408_v31 = vld [vmem:[%s6082_s17 + $0x3d0] sm:$0xff] }
  0x4f   : > { %v6272_v7 = vpack.c.bf16 %v350_v0, %v343_v63  ;;  %v392_v63 = vld [vmem:[%s6082_s17 + $0x350] sm:$0xff]  ;;  %v387_v0 = vld [vmem:[%s6082_s17 + $0x328] sm:$0xff] }
  0x50   : > { %1898 = vmatpush2.bf16.msra.mxu0 %v5475_v1  ;;  %v345_v1 = vld [vmem:[%s6082_s17 + $0x1d8] sm:$0xff]  ;;  %v5530_v33 = vld [vmem:[%s8865_s1 + $0x524] ss:$16 sps:$4 sm:$0xff]  }
  0x51   : > { %2091 = vmatpush2.bf16.msra.mxu1 %v5476_v2  ;;  %1899 = vmatprep.subr.bf16.mxu0 %v5477_v3  ;;  %v352_v2 = vld [vmem:[%s6082_s17 + $0x210] sm:$0xff] }
  0x52   : > { %2092 = vmatprep.subr.bf16.mxu1 %v5479_v4  ;;  %v5501_v3 = vld [vmem:[%s8865_s1 + $0x440] ss:$16 sps:$4 sm:$0xff]   ;;  %v5506_v4 = vld [vmem:[%s8865_s1 + $0x424] ss:$16 sps:$4 sm:$0xff]   ;;  %v6274_v8 = vpack.c.bf16 %v352_v2, %v345_v1 }
  0x53   : > { %v394_v1 = vld [vmem:[%s6082_s17 + $0x360] sm:$0xff] }
  0x54   : > { %1900 = vmatpush2.bf16.msra.mxu0 %v5481_v5  ;;  %v6268_v5 = vpack.c.bf16 %v335_v60, %v328_v58  ;;  %v5521_v58 = vld [vmem:[%s8865_s1 + $0x584] ss:$16 sps:$4 sm:$0xff]   ;;  %v5519_v2 = vld [vmem:[%s8865_s1 + $0x580] ss:$16 sps:$4 sm:$0xff]  }
  0x55   : > { %2093 = vmatpush2.bf16.msra.mxu1 %v5482_v6  ;;  %2255 = vmatprep.subr.bf16.mxu0 %v5485_v11  ;;  %v6270_v6 = vpack.c.bf16 %v337_v62, %v330_v61  ;;  %v5509_v11 = vld [vmem:[%s8865_s1 + $0x404] ss:$16 sps:$4 sm:$0xff]   ;;  %v379_v61 = vld [vmem:[%s6082_s17 + $0x2e8] sm:$0xff]  ;;  %v385_v62 = vld [vmem:[%s6082_s17 + $0x318] sm:$0xff] }
  0x56   : > { %2462 = vmatprep.subr.bf16.mxu1 %v5488_v12  ;;  %v349_v12 = vld [vmem:[%s6082_s17 + $0x1f8] sm:$0xff]  ;;  %v372_v60 = vld [vmem:[%s6082_s17 + $0x2b0] sm:$0xff] }
  0x57   : > { %1902 = vmatmul.mubr.bf16.vlgmr.msra.gmra.mxu0 %v6169_v18 }
  0x58   : > { %2095 = vmatmul.mubr.bf16.vlgmr.msra.gmra.mxu1 %v6171_v19  ;;  %2256 = vmatpush1.bf16.msra.mxu0 %v5483_v20  ;;  %v359_v20 = vld [vmem:[%s6082_s17 + $0x248] sm:$0xff] }
  0x59   : > { %2463 = vmatpush1.bf16.msra.mxu1 %v5486_v21  ;;  %1911 = vmatprep.mubr.bf16.mxu0 %v6179_v22  ;;  %v366_v21 = vld [vmem:[%s6082_s17 + $0x280] sm:$0xff] }
  0x5a   : > { %2104 = vmatprep.mubr.bf16.mxu1 %v6181_v23  ;;  %2257 = vmatprep.subr.bf16.mxu0 %v5491_v26  ;;  %v6300_v26 = vpack.c.bf16 %v349_v12, %v342_v10  ;;  %v6368_v10 = vpack.c.bf16 %v392_v63, %v385_v62  ;;  %v5539_v12 = vld [vmem:[%s8865_s1 + $0x2ec] ss:$16 sps:$4 sm:$0xff]   ;;  %v5531_v62 = vld [vmem:[%s8865_s1 + $0x500] ss:$16 sps:$4 sm:$0xff]  }
  0x5b   : > { %2834 = vmatprep.subr.bf16.mxu1 %v5539_v12  ;;  %v5536_v63 = vld [vmem:[%s8865_s1 + $0xec] ss:$16 sps:$4 sm:$0xff]   ;;  %v412_v12 = vld [vmem:[%s6082_s17 + $0x3f0] sm:$0xff] }
  0x5c   : > { %2258 = vmatpush1.bf16.msra.mxu0 %v5489_v29  ;;  %v6306_v29 = vpack.c.bf16 %v366_v21, %v359_v20  ;;  %v5527_v20 = vld [vmem:[%s8865_s1 + $0x544] ss:$16 sps:$4 sm:$0xff]   ;;  %v393_v21 = vld [vmem:[%s6082_s17 + $0x358] sm:$0xff] }
  0x5d   : > { %2259 = vmatprep.subr.bf16.mxu0 %v5494_v34  ;;  %v358_v34 = vld [vmem:[%s6082_s17 + $0x240] sm:$0xff] }
  0x5f   : > { %1912 = vmatmul.mubr.bf16.gmra.mxu0 %v6204_v35 }
  0x60   : > { %2105 = vmatmul.mubr.bf16.gmra.mxu1 %v6206_v36  ;;  %1921 = vmatprep.mubr.bf16.mxu0 %v6208_v37 }
  0x61   : > { %2114 = vmatprep.mubr.bf16.mxu1 %v6210_v38  ;;  %2260 = vmatpush1.bf16.msra.mxu0 %v5492_v39  ;;  %v365_v39 = vld [vmem:[%s6082_s17 + $0x278] sm:$0xff] }
  0x62   : > { %2261 = vmatprep.subr.bf16.mxu0 %v5497_v41  ;;  %v378_v41 = vld [vmem:[%s6082_s17 + $0x2e0] sm:$0xff]  ;;  %v6334_v47 = vpack.c.bf16 %v365_v39, %v358_v34  ;;  %v6399_v34 = vpack.c.bf16 %v391_v15, %v384_v14  ;;  %v6401_v39 = vpack.c.bf16 %v393_v21, %v386_v16  ;;  %v421_v15 = vld [vmem:[%s6082_s17 + $0x438] sm:$0xff]  ;;  %v427_v16 = vld [vmem:[%s6082_s17 + $0x468] sm:$0xff] }
  0x63   : > { %v6336_v48 = vpack.c.bf16 %v378_v41, %v371_v40  ;;  %v414_v14 = vld [vmem:[%s6082_s17 + $0x400] sm:$0xff]  ;;  %v429_v21 = vld [vmem:[%s6082_s17 + $0x478] sm:$0xff] }
  0x65   : > { %2262 = vmatpush1.bf16.msra.mxu0 %v5495_v49  ;;  %v6338_v49 = vpack.c.bf16 %v380_v43, %v373_v42  ;;  %v5528_v42 = vld [vmem:[%s8865_s1 + $0x520] ss:$16 sps:$4 sm:$0xff]  }
  0x66   : > { %2263 = vmatprep.subr.bf16.mxu0 %v5500_v50  ;;  %v5516_v50 = vld [vmem:[%s8865_s1 + $0x5a0] ss:$16 sps:$4 sm:$0xff]  }
  0x67   : > { %1922 = vmatmul.mubr.bf16.gmra.mxu0 %v6236_v51  ;;  %v398_v43 = vld [vmem:[%s6082_s17 + $0x380] sm:$0xff] }
  0x68   : > { %2115 = vmatmul.mubr.bf16.gmra.mxu1 %v6238_v52  ;;  %1931 = vmatprep.mubr.bf16.mxu0 %v6240_v53 }
  0x69   : > { %2124 = vmatprep.mubr.bf16.mxu1 %v6242_v56  ;;  %2264 = vmatpush1.bf16.msra.mxu0 %v5498_v57  ;;  %v370_v57 = vld [vmem:[%s6082_s17 + $0x2a0] sm:$0xff] }
  0x6a   : > { %2265 = vmatprep.subr.bf16.mxu0 %v5503_v59  ;;  %v377_v59 = vld [vmem:[%s6082_s17 + $0x2d8] sm:$0xff] }
  0x6d   : > { %2266 = vmatpush1.bf16.msra.mxu0 %v5501_v3  ;;  %v5524_v3 = vld [vmem:[%s8865_s1 + $0x564] ss:$16 sps:$4 sm:$0xff]  }
  0x6e   : > { %2267 = vmatprep.subr.bf16.mxu0 %v5506_v4  ;;  %v6364_v4 = vpack.c.bf16 %v377_v59, %v370_v57  ;;  %v5533_v57 = vld [vmem:[%s8865_s1 + $0x504] ss:$16 sps:$4 sm:$0xff]  }
  0x6f   : > { %1932 = vmatmul.mubr.bf16.gmra.mxu0 %v6268_v5  ;;  %v420_v59 = vld [vmem:[%s6082_s17 + $0x430] sm:$0xff] }
  0x70   : > { %2125 = vmatmul.mubr.bf16.gmra.mxu1 %v6270_v6  ;;  %1941 = vmatprep.mubr.bf16.mxu0 %v6272_v7 }
  0x71   : > { %2134 = vmatprep.mubr.bf16.mxu1 %v6274_v8  ;;  %2268 = vmatpush1.bf16.msra.mxu0 %v5504_v9  ;;  %v6366_v9 = vpack.c.bf16 %v379_v61, %v372_v60  ;;  %v415_v60 = vld [vmem:[%s6082_s17 + $0x408] sm:$0xff]  ;;  %v422_v61 = vld [vmem:[%s6082_s17 + $0x440] sm:$0xff] }
  0x72   : > { %2269 = vmatprep.subr.bf16.mxu0 %v5509_v11  ;;  %v6370_v11 = vpack.c.bf16 %v394_v1, %v387_v0 }
  0x75   : > { %2270 = vmatpush1.bf16.msra.mxu0 %v5507_v24  ;;  %v399_v24 = vld [vmem:[%s6082_s17 + $0x388] sm:$0xff] }
  0x76   : > { %2271 = vmatprep.subr.bf16.mxu0 %v5512_v25  ;;  %v406_v25 = vld [vmem:[%s6082_s17 + $0x3c0] sm:$0xff] }
  0x77   : > { %1942 = vmatmul.mubr.bf16.gmra.mxu0 %v6300_v26  ;;  %v6403_v40 = vpack.c.bf16 %v406_v25, %v399_v24  ;;  %v436_v24 = vld [vmem:[%s6082_s17 + $0x4b0] sm:$0xff] }
  0x78   : > { %2135 = vmatmul.mubr.bf16.gmra.mxu1 %v6302_v27  ;;  %1951 = vmatprep.mubr.bf16.mxu0 %v6304_v28 }
  0x79   : > { %2144 = vmatprep.mubr.bf16.mxu1 %v6306_v29  ;;  %2272 = vmatpush2.bf16.msra.mxu0 %v5510_v30  ;;  %v401_v30 = vld [vmem:[%s6082_s17 + $0x398] sm:$0xff] }
  0x7a   : > { %2273 = vmatprep.subr.bf16.mxu0 %v5515_v32  ;;  %v5525_v32 = vld [vmem:[%s8865_s1 + $0x540] ss:$16 sps:$4 sm:$0xff]   ;;  %v6405_v41 = vpack.c.bf16 %v408_v31, %v401_v30  ;;  %v6453_v30 = vpack.c.bf16 %v421_v15, %v414_v14  ;;  %v449_v14 = vld [vmem:[%s6082_s17 + $0x518] sm:$0xff]  ;;  %v455_v15 = vld [vmem:[%s6082_s17 + $0x548] sm:$0xff] }
  0x7c   : > { %9008 = vst [vmem:[#allocation7_spill] sm:$0xff] %v6453_v30 }
  0x7d   : > { %2274 = vmatpush2.bf16.msra.mxu0 %v5513_v44  ;;  %v405_v44 = vld [vmem:[%s6082_s17 + $0x3b8] sm:$0xff] }
  0x7e   : > { %2275 = vmatprep.subr.bf16.mxu0 %v5518_v45  ;;  %v400_v45 = vld [vmem:[%s6082_s17 + $0x390] sm:$0xff]  ;;  %v6431_v0 = vpack.c.bf16 %v405_v44, %v398_v43  ;;  %v435_v44 = vld [vmem:[%s6082_s17 + $0x4a8] sm:$0xff] }
  0x7f   : > { %1952 = vmatmul.mubr.bf16.gmra.mxu0 %v6332_v46  ;;  %v428_v43 = vld [vmem:[%s6082_s17 + $0x470] sm:$0xff] }
  0x80   : > { %2145 = vmatmul.mubr.bf16.gmra.mxu1 %v6334_v47  ;;  %1961 = vmatprep.mubr.bf16.mxu0 %v6336_v48 }
  0x81   : > { %2154 = vmatprep.mubr.bf16.mxu1 %v6338_v49  ;;  %2276 = vmatpush2.bf16.msra.mxu0 %v5516_v50  ;;  %v407_v50 = vld [vmem:[%s6082_s17 + $0x3c8] sm:$0xff] }
  0x82   : > { %2277 = vmatprep.subr.bf16.mxu0 %v5521_v58  ;;  %v413_v58 = vld [vmem:[%s6082_s17 + $0x3f8] sm:$0xff]  ;;  %v6433_v1 = vpack.c.bf16 %v407_v50, %v400_v45  ;;  %v448_v50 = vld [vmem:[%s6082_s17 + $0x510] sm:$0xff] }
  0x83   : > { %v441_v45 = vld [vmem:[%s6082_s17 + $0x4d8] sm:$0xff] }
  0x85   : > { %2278 = vmatpush2.bf16.msra.mxu0 %v5519_v2  ;;  %v6435_v2 = vpack.c.bf16 %v420_v59, %v413_v58  ;;  %v450_v58 = vld [vmem:[%s6082_s17 + $0x520] sm:$0xff] }
  0x86   : > { %2279 = vmatprep.subr.bf16.mxu0 %v5524_v3  ;;  %v6437_v3 = vpack.c.bf16 %v422_v61, %v415_v60  ;;  %v6473_v60 = vpack.c.bf16 %v435_v44, %v428_v43  ;;  %v6475_v61 = vpack.c.bf16 %v448_v50, %v441_v45  ;;  %v454_v44 = vld [vmem:[%s6082_s17 + $0x540] sm:$0xff]  ;;  %v461_v45 = vld [vmem:[%s6082_s17 + $0x578] sm:$0xff]  ;;  %v456_v50 = vld [vmem:[%s6082_s17 + $0x550] sm:$0xff] }
  0x87   : > { %1962 = vmatmul.mubr.bf16.gmra.mxu0 %v6364_v4 }
  0x88   : > { %2155 = vmatmul.mubr.bf16.gmra.mxu1 %v6366_v9  ;;  %1971 = vmatprep.mubr.bf16.mxu0 %v6368_v10  ;;  %9012 = vst [vmem:[#allocation11_spill] sm:$0xff] %v6473_v60  ;;  %9013 = vst [vmem:[#allocation12_spill] sm:$0xff] %v6475_v61 }
  0x89   : > { %2164 = vmatprep.mubr.bf16.mxu1 %v6370_v11  ;;  %2280 = vmatpush2.bf16.msra.mxu0 %v5522_v13  ;;  %v419_v13 = vld [vmem:[%s6082_s17 + $0x428] sm:$0xff] }
  0x8a   : > { %2281 = vmatprep.subr.bf16.mxu0 %v5527_v20  ;;  %v434_v20 = vld [vmem:[%s6082_s17 + $0x4a0] sm:$0xff]  ;;  %v6451_v25 = vpack.c.bf16 %v419_v13, %v412_v12  ;;  %v447_v12 = vld [vmem:[%s6082_s17 + $0x508] sm:$0xff] }
  0x8b   : > { %v6455_v31 = vpack.c.bf16 %v434_v20, %v427_v16  ;;  %v442_v13 = vld [vmem:[%s6082_s17 + $0x4e0] sm:$0xff]  ;;  %v457_v20 = vld [vmem:[%s6082_s17 + $0x558] sm:$0xff] }
  0x8c   : > { %9007 = vst [vmem:[#allocation6_spill] sm:$0xff] %v6451_v25  ;;  %v462_v16 = vld [vmem:[%s6082_s17 + $0x580] sm:$0xff] }
  0x8d   : > { %2282 = vmatpush2.bf16.msra.mxu0 %v5525_v32  ;;  %9009 = vst [vmem:[#allocation8_spill] sm:$0xff] %v6455_v31  ;;  %v6457_v32 = vpack.c.bf16 %v436_v24, %v429_v21  ;;  %v464_v21 = vld [vmem:[%s6082_s17 + $0x590] sm:$0xff] }
  0x8e   : > { %2283 = vmatprep.subr.bf16.mxu0 %v5530_v33  ;;  %v426_v33 = vld [vmem:[%s6082_s17 + $0x460] sm:$0xff]  ;;  %v6497_v43 = vpack.c.bf16 %v464_v21, %v457_v20  ;;  %v468_v21 = vld [vmem:[%s6082_s17 + $0x5b0] sm:$0xff] }
  0x8f   : > { %1972 = vmatmul.mubr.bf16.gmra.mxu0 %v6399_v34  ;;  %9010 = vst [vmem:[#allocation9_spill] sm:$0xff] %v6457_v32 }
  0x90   : > { %2165 = vmatmul.mubr.bf16.gmra.mxu1 %v6401_v39  ;;  %1981 = vmatprep.mubr.bf16.mxu0 %v6403_v40  ;;  %9018 = vst [vmem:[#allocation17_spill] sm:$0xff] %v6497_v43 }
  0x91   : > { %2174 = vmatprep.mubr.bf16.mxu1 %v6405_v41  ;;  %2284 = vmatpush2.bf16.msra.mxu0 %v5528_v42  ;;  %v433_v42 = vld [vmem:[%s6082_s17 + $0x498] sm:$0xff] }
  0x92   : > { %2285 = vmatprep.subr.bf16.mxu0 %v5533_v57  ;;  %v443_v57 = vld [vmem:[%s6082_s17 + $0x4e8] sm:$0xff]  ;;  %v6471_v59 = vpack.c.bf16 %v433_v42, %v426_v33  ;;  %v6493_v33 = vpack.c.bf16 %v449_v14, %v442_v13  ;;  %v6495_v42 = vpack.c.bf16 %v462_v16, %v455_v15  ;;  %v478_v13 = vld [vmem:[%s6082_s17 + $0x600] sm:$0xff]  ;;  %v6511_v14 = vpack.c.bf16 %v461_v45, %v454_v44  ;;  %v477_v45 = vld [vmem:[%s6082_s17 + $0x5f8] sm:$0xff] }
  0x93   : > { %v470_v44 = vld [vmem:[%s6082_s17 + $0x5c0] sm:$0xff] }
  0x94   : > { %9011 = vst [vmem:[#allocation10_spill] sm:$0xff] %v6471_v59  ;;  %9016 = vst [vmem:[#allocation15_spill] sm:$0xff] %v6493_v33 }
  0x95   : > { %2286 = vmatpush2.bf16.msra.mxu0 %v5531_v62  ;;  %v6477_v62 = vpack.c.bf16 %v450_v58, %v443_v57  ;;  %9017 = vst [vmem:[#allocation16_spill] sm:$0xff] %v6495_v42  ;;  %v463_v57 = vld [vmem:[%s6082_s17 + $0x588] sm:$0xff]  ;;  %v469_v58 = vld [vmem:[%s6082_s17 + $0x5b8] sm:$0xff]  ;;  %9019 = vst [vmem:[#allocation18_spill] sm:$0xff] %v6511_v14 }
  0x96   : > { %2641 = vmatprep.subr.bf16.mxu0 %v5536_v63  ;;  %v440_v63 = vld [vmem:[%s6082_s17 + $0x4d0] sm:$0xff]  ;;  %v6513_v15 = vpack.c.bf16 %v463_v57, %v456_v50  ;;  %v483_v50 = vld [vmem:[%s6082_s17 + $0x628] sm:$0xff]  ;;  %v490_v57 = vld [vmem:[%s6082_s17 + $0x660] sm:$0xff] }
  0x97   : > { %1982 = vmatmul.mubr.bf16.gmra.mxu0 %v6431_v0  ;;  %9014 = vst [vmem:[#allocation13_spill] sm:$0xff] %v6477_v62  ;;  %v6491_v24 = vpack.c.bf16 %v447_v12, %v440_v63  ;;  %v476_v63 = vld [vmem:[%s6082_s17 + $0x5f0] sm:$0xff]  ;;  %v471_v12 = vld [vmem:[%s6082_s17 + $0x5c8] sm:$0xff] }
  0x98   : > { %2175 = vmatmul.mubr.bf16.gmra.mxu1 %v6433_v1  ;;  %1991 = vmatprep.mubr.bf16.mxu0 %v6435_v2  ;;  %9020 = vst [vmem:[#allocation19_spill] sm:$0xff] %v6513_v15  ;;  %v6515_v16 = vpack.c.bf16 %v476_v63, %v469_v58  ;;  %v6517_v20 = vpack.c.bf16 %v478_v13, %v471_v12  ;;  %v485_v58 = vld [vmem:[%s6082_s17 + $0x638] sm:$0xff]  ;;  %v492_v63 = vld [vmem:[%s6082_s17 + $0x670] sm:$0xff] }
  0x99   : > { %2184 = vmatprep.mubr.bf16.mxu1 %v6437_v3  ;;  %9015 = vst [vmem:[#allocation14_spill] sm:$0xff] %v6491_v24  ;;  %v6531_v12 = vpack.c.bf16 %v475_v17, %v468_v21  ;;  %v6533_v13 = vpack.c.bf16 %v477_v45, %v470_v44  ;;  %v497_v17 = vld [vmem:[%s6082_s17 + $0x698] sm:$0xff]  ;;  %v504_v21 = vld [vmem:[%s6082_s17 + $0x6d0] sm:$0xff]  ;;  %v499_v44 = vld [vmem:[%s6082_s17 + $0x6a8] sm:$0xff] }
  0x9a   : > { %9021 = vst [vmem:[#allocation20_spill] sm:$0xff] %v6515_v16  ;;  %9022 = vst [vmem:[#allocation21_spill] sm:$0xff] %v6517_v20  ;;  %v506_v45 = vld [vmem:[%s6082_s17 + $0x6e0] sm:$0xff] }
  0x9b   : > { %9023 = vst [vmem:[#allocation22_spill] sm:$0xff] %v6531_v12  ;;  %9024 = vst [vmem:[#allocation23_spill] sm:$0xff] %v6533_v13 }
  0x9f   : > { %1992 = vmatmul.mubr.bf16.gmra.mxu0 %v6451_v25 }
  0xa0   : > { %2185 = vmatmul.mubr.bf16.gmra.mxu1 %v6453_v30  ;;  %2001 = vmatprep.mubr.bf16.mxu0 %v6455_v31 }
  0xa1   : > { %2194 = vmatprep.mubr.bf16.mxu1 %v6457_v32 }
  0xa7   : > { %2002 = vmatmul.mubr.bf16.gmra.mxu0 %v6471_v59 }
  0xa8   : > { %2195 = vmatmul.mubr.bf16.gmra.mxu1 %v6473_v60  ;;  %2011 = vmatprep.mubr.bf16.mxu0 %v6475_v61 }
  0xa9   : > { %2204 = vmatprep.mubr.bf16.mxu1 %v6477_v62  ;;  %v5564_v62 = vld [vmem:[%s8865_s1 + $0x48] ss:$16 sps:$4 sm:$0xff]  }
  0xaf   : > { %2012 = vmatmul.mubr.bf16.gmra.mxu0 %v6491_v24  ;;  %v505_v24 = vld [vmem:[%s6082_s17 + $0x6d8] sm:$0xff] }
  0xb0   : > { %2205 = vmatmul.mubr.bf16.gmra.mxu1 %v6493_v33  ;;  %2021 = vmatprep.mubr.bf16.mxu0 %v6495_v42  ;;  %v491_v42 = vld [vmem:[%s6082_s17 + $0x668] sm:$0xff]  ;;  %v498_v33 = vld [vmem:[%s6082_s17 + $0x6a0] sm:$0xff] }
  0xb1   : > { %2214 = vmatprep.mubr.bf16.mxu1 %v6497_v43  ;;  %v484_v43 = vld [vmem:[%s6082_s17 + $0x630] sm:$0xff] }
  0xb7   : > { %2022 = vmatmul.mubr.bf16.gmra.mxu0 %v6511_v14  ;;  %v6537_v14 = vpack.c.bf16 %v492_v63, %v485_v58  ;;  %v6555_v58 = vpack.c.bf16 %v504_v21, %v497_v17  ;;  %v6557_v63 = vpack.c.bf16 %v506_v45, %v499_v44  ;;  %v290_v21 = vld [vmem:[%s6082_s17 + $0x20] sm:$0xff]  ;;  %v297_v44 = vld [vmem:[%s6082_s17 + $0x58] sm:$0xff]  ;;  %v292_v45 = vld [vmem:[%s6082_s17 + $0x30] sm:$0xff] }
  0xb8   : > { %2215 = vmatmul.mubr.bf16.gmra.mxu1 %v6513_v15  ;;  %2031 = vmatprep.mubr.bf16.mxu0 %v6515_v16  ;;  %v6535_v15 = vpack.c.bf16 %v490_v57, %v483_v50  ;;  %v482_v16 = vld [vmem:[%s6082_s17 + $0x620] sm:$0xff]  ;;  %v6553_v57 = vpack.c.bf16 %v491_v42, %v484_v43  ;;  %v6571_v43 = vpack.c.bf16 %v505_v24, %v498_v33  ;;  %v5534_v24 = vld [vmem:[%s8865_s1 + $0xe8] ss:$16 sps:$4 sm:$0xff]  }
  0xb9   : > { %2224 = vmatprep.mubr.bf16.mxu1 %v6517_v20  ;;  %9026 = vst [vmem:[#allocation25_spill] sm:$0xff] %v6537_v14  ;;  %v489_v20 = vld [vmem:[%s6082_s17 + $0x658] sm:$0xff]  ;;  %9029 = vst [vmem:[#allocation28_spill] sm:$0xff] %v6555_v58 }
  0xba   : > { %9025 = vst [vmem:[#allocation24_spill] sm:$0xff] %v6535_v15  ;;  %v6551_v50 = vpack.c.bf16 %v489_v20, %v482_v16  ;;  %9028 = vst [vmem:[#allocation27_spill] sm:$0xff] %v6553_v57  ;;  %v291_v16 = vld [vmem:[%s6082_s17 + $0x28] sm:$0xff]  ;;  %v298_v20 = vld [vmem:[%s6082_s17 + $0x60] sm:$0xff] }
  0xbb   : > { %9030 = vst [vmem:[#allocation29_spill] sm:$0xff] %v6557_v63  ;;  %9032 = vst [vmem:[#allocation31_spill] sm:$0xff] %v6571_v43  ;;  %v6573_v17 = vpack.c.bf16 %v298_v20, %v291_v16  ;;  %v5537_v33 = vld [vmem:[%s8865_s1 + $0x2e8] ss:$16 sps:$4 sm:$0xff]   ;;  %v312_v16 = vld [vmem:[%s6082_s17 + $0xd0] sm:$0xff]  ;;  %v6591_v20 = vpack.c.bf16 %v297_v44, %v290_v21 }
  0xbc   : > { %9027 = vst [vmem:[#allocation26_spill] sm:$0xff] %v6551_v50  ;;  %v5543_v21 = vld [vmem:[%s8865_s1 + $0x2c8] ss:$16 sps:$4 sm:$0xff]  }
  0xbd   : > { %9033 = vst [vmem:[#allocation32_spill] sm:$0xff] %v6573_v17  ;;  %9035 = vst [vmem:[#allocation33_spill] sm:$0xff] %v6591_v20  ;;  %v319_v44 = vld [vmem:[%s6082_s17 + $0x108] sm:$0xff] }
  0xbf   : > { %2032 = vmatmul.mubr.bf16.gmra.mxu0 %v6531_v12  ;;  %v503_v12 = vld [vmem:[%s6082_s17 + $0x6c8] sm:$0xff] }
  0xc0   : > { %2225 = vmatmul.mubr.bf16.gmra.mxu1 %v6533_v13  ;;  %2041 = vmatprep.mubr.bf16.mxu0 %v6535_v15  ;;  %v496_v13 = vld [vmem:[%s6082_s17 + $0x690] sm:$0xff]  ;;  %v313_v15 = vld [vmem:[%s6082_s17 + $0xd8] sm:$0xff] }
  0xc1   : > { %2234 = vmatprep.mubr.bf16.mxu1 %v6537_v14  ;;  %v6569_v42 = vpack.c.bf16 %v503_v12, %v496_v13  ;;  %v9034_v12 = vmov 0   ;;  %v305_v13 = vld [vmem:[%s6082_s17 + $0x98] sm:$0xff]  ;;  %v306_v14 = vld [vmem:[%s6082_s17 + $0xa0] sm:$0xff] }
  0xc3   : > { %9031 = vst [vmem:[#allocation30_spill] sm:$0xff] %v6569_v42 }
  0xc7   : > { %2042 = vmatmul.mubr.bf16.gmra.mxu0 %v6551_v50  ;;  %v299_v50 = vld [vmem:[%s6082_s17 + $0x68] sm:$0xff] }
  0xc8   : > { %2235 = vmatmul.mubr.bf16.gmra.mxu1 %v6553_v57  ;;  %2051 = vmatprep.mubr.bf16.mxu0 %v6555_v58  ;;  %v304_v58 = vld [vmem:[%s6082_s17 + $0x90] sm:$0xff]  ;;  %v311_v57 = vld [vmem:[%s6082_s17 + $0xc8] sm:$0xff] }
  0xc9   : > { %2244 = vmatprep.mubr.bf16.mxu1 %v6557_v63  ;;  %v6601_v63 = vpack.c.bf16 %v312_v16, %v305_v13  ;;  %v5548_v13 = vld [vmem:[%s8865_s1 + $0xac] ss:$16 sps:$4 sm:$0xff]  }
  0xca   : > { %v5551_v16 = vld [vmem:[%s8865_s1 + $0x2ac] ss:$16 sps:$4 sm:$0xff]  }
  0xcb   : > { %9037 = vst [vmem:[#allocation35_spill] sm:$0xff] %v6601_v63 }
  0xcf   : > { %2052 = vmatmul.mubr.bf16.gmra.mxu0 %v6569_v42  ;;  %v5545_v42 = vld [vmem:[%s8865_s1 + $0x2cc] ss:$16 sps:$4 sm:$0xff]  }
  0xd0   : > { %2245 = vmatmul.mubr.bf16.gmra.mxu1 %v6571_v43  ;;  %2287 = vmatprep.mubr.bf16.mxu0 %v6573_v17  ;;  %v6593_v43 = vpack.c.bf16 %v299_v50, %v292_v45  ;;  %v5542_v17 = vld [vmem:[%s8865_s1 + $0xcc] ss:$16 sps:$4 sm:$0xff]   ;;  %v5540_v50 = vld [vmem:[%s8865_s1 + $0xc8] ss:$16 sps:$4 sm:$0xff]   ;;  %v326_v45 = vld [vmem:[%s6082_s17 + $0x140] sm:$0xff] }
  0xd1   : > { %2480 = vmatprep.mubr.bf16.mxu1 %v9034_v12 }
  0xd2   : > { %9036 = vst [vmem:[#allocation34_spill] sm:$0xff] %v6593_v43 }
  0xd7   : > { %2288 = vmatmul.mubr.bf16.vlgmr.msra.gmra.mxu0 %v6591_v20  ;;  %v6628_v20 = vpack.c.bf16 %v313_v15, %v306_v14  ;;  %v5557_v14 = vld [vmem:[%s8865_s1 + $0x28c] ss:$16 sps:$4 sm:$0xff]   ;;  %v318_v15 = vld [vmem:[%s6082_s17 + $0x100] sm:$0xff] }
  0xd8   : > { %5240 = vmatmul.mubr.msk.bf16.vlgmr.msra.gmra.mxu1 %vm1820_vm0, %v6593_v43  ;;  %2642 = vmatpush1.bf16.msra.mxu0 %v5534_v24  ;;  %v6626_v43 = vpack.c.bf16 %v311_v57, %v304_v58  ;;  %v5546_v24 = vld [vmem:[%s8865_s1 + $0xa8] ss:$16 sps:$4 sm:$0xff]   ;;  %v5554_v57 = vld [vmem:[%s8865_s1 + $0x8c] ss:$16 sps:$4 sm:$0xff]  }
  0xd9   : > { %2835 = vmatpush1.bf16.msra.mxu1 %v5537_v33  ;;  %2297 = vmatprep.mubr.bf16.mxu0 %v6601_v63  ;;  %9039 = vst [vmem:[#allocation37_spill] sm:$0xff] %v6628_v20  ;;  %v5549_v33 = vld [vmem:[%s8865_s1 + $0x2a8] ss:$16 sps:$4 sm:$0xff]   ;;  %v6636_v63 = vpack.c.bf16 %v326_v45, %v319_v44 }
  0xda   : > { %2490 = vmatprep.mubr.bf16.mxu1 %v9034_v12  ;;  %2643 = vmatprep.subr.bf16.mxu0 %v5542_v17  ;;  %9038 = vst [vmem:[#allocation36_spill] sm:$0xff] %v6626_v43  ;;  %v325_v58 = vld [vmem:[%s6082_s17 + $0x138] sm:$0xff]  ;;  %v327_v17 = vld [vmem:[%s6082_s17 + $0x148] sm:$0xff] }
  0xdb   : > { %2836 = vmatprep.subr.bf16.mxu1 %v5545_v42  ;;  %9040 = vst [vmem:[#allocation38_spill] sm:$0xff] %v6636_v63  ;;  %v320_v42 = vld [vmem:[%s6082_s17 + $0x110] sm:$0xff]  ;;  %v5552_v44 = vld [vmem:[%s8865_s1 + $0x88] ss:$16 sps:$4 sm:$0xff]  }
  0xdc   : > { %2644 = vmatpush1.bf16.msra.mxu0 %v5540_v50  ;;  %v333_v50 = vld [vmem:[%s6082_s17 + $0x178] sm:$0xff] }
  0xdd   : > { %2837 = vmatpush1.bf16.msra.mxu1 %v5543_v21  ;;  %2645 = vmatprep.subr.bf16.mxu0 %v5548_v13  ;;  %v340_v21 = vld [vmem:[%s6082_s17 + $0x1b0] sm:$0xff]  ;;  %v5555_v45 = vld [vmem:[%s8865_s1 + $0x288] ss:$16 sps:$4 sm:$0xff]   ;;  %v5560_v13 = vld [vmem:[%s8865_s1 + $0x6c] ss:$16 sps:$4 sm:$0xff]  }
  0xde   : > { %2838 = vmatprep.subr.bf16.mxu1 %v5551_v16  ;;  %v5563_v16 = vld [vmem:[%s8865_s1 + $0x26c] ss:$16 sps:$4 sm:$0xff]  }
  0xdf   : > { %2298 = vmatmul.mubr.bf16.gmra.mxu0 %v6626_v43  ;;  %v341_v43 = vld [vmem:[%s6082_s17 + $0x1b8] sm:$0xff] }
  0xe0   : > { %5241 = vmatmul.mubr.msk.bf16.gmra.mxu1 %vm1820_vm0, %v6628_v20  ;;  %2307 = vmatprep.mubr.bf16.mxu0 %v6636_v63  ;;  %v6667_v20 = vpack.c.bf16 %v325_v58, %v318_v15  ;;  %v6669_v63 = vpack.c.bf16 %v327_v17, %v320_v42  ;;  %v5569_v15 = vld [vmem:[%s8865_s1 + $0x24c] ss:$16 sps:$4 sm:$0xff]   ;;  %v332_v58 = vld [vmem:[%s6082_s17 + $0x170] sm:$0xff]  ;;  %v334_v17 = vld [vmem:[%s6082_s17 + $0x180] sm:$0xff] }
  0xe1   : > { %2500 = vmatprep.mubr.bf16.mxu1 %v9034_v12  ;;  %2646 = vmatpush1.bf16.msra.mxu0 %v5546_v24  ;;  %v5558_v24 = vld [vmem:[%s8865_s1 + $0x68] ss:$16 sps:$4 sm:$0xff]  }
  0xe2   : > { %2839 = vmatpush1.bf16.msra.mxu1 %v5549_v33  ;;  %2647 = vmatprep.subr.bf16.mxu0 %v5554_v57  ;;  %9041 = vst [vmem:[#allocation39_spill] sm:$0xff] %v6667_v20  ;;  %9042 = vst [vmem:[#allocation40_spill] sm:$0xff] %v6669_v63  ;;  %v5561_v33 = vld [vmem:[%s8865_s1 + $0x268] ss:$16 sps:$4 sm:$0xff]   ;;  %v6677_v57 = vpack.c.bf16 %v340_v21, %v333_v50  ;;  %v354_v21 = vld [vmem:[%s6082_s17 + $0x220] sm:$0xff] }
  0xe3   : > { %2840 = vmatprep.subr.bf16.mxu1 %v5557_v14  ;;  %v5566_v14 = vld [vmem:[%s8865_s1 + $0x4c] ss:$16 sps:$4 sm:$0xff]  }
  0xe4   : > { %9043 = vst [vmem:[#allocation41_spill] sm:$0xff] %v6677_v57  ;;  %v339_v42 = vld [vmem:[%s6082_s17 + $0x1a8] sm:$0xff] }
  0xe5   : > { %2648 = vmatpush1.bf16.msra.mxu0 %v5552_v44  ;;  %v347_v50 = vld [vmem:[%s6082_s17 + $0x1e8] sm:$0xff] }
  0xe6   : > { %2841 = vmatpush1.bf16.msra.mxu1 %v5555_v45  ;;  %2649 = vmatprep.subr.bf16.mxu0 %v5560_v13  ;;  %v5567_v44 = vld [vmem:[%s8865_s1 + $0x248] ss:$16 sps:$4 sm:$0xff]   ;;  %v5572_v45 = vld [vmem:[%s8865_s1 + $0x2c] ss:$16 sps:$4 sm:$0xff]  }
  0xe7   : > { %2842 = vmatprep.subr.bf16.mxu1 %v5563_v16  ;;  %2308 = vmatmul.mubr.bf16.gmra.mxu0 %v6667_v20  ;;  %v5575_v13 = vld [vmem:[%s8865_s1 + $0x22c] ss:$16 sps:$4 sm:$0xff]   ;;  %v6708_v16 = vpack.c.bf16 %v339_v42, %v332_v58  ;;  %v346_v58 = vld [vmem:[%s6082_s17 + $0x1e0] sm:$0xff] }
  0xe8   : > { %5242 = vmatmul.mubr.msk.bf16.gmra.mxu1 %vm1820_vm0, %v6669_v63  ;;  %2317 = vmatprep.mubr.bf16.mxu0 %v6677_v57  ;;  %v6710_v63 = vpack.c.bf16 %v341_v43, %v334_v17  ;;  %v5578_v43 = vld [vmem:[%s8865_s1 + $0xc] ss:$16 sps:$4 sm:$0xff]  }
  0xe9   : > { %2510 = vmatprep.mubr.bf16.mxu1 %v9034_v12  ;;  %2650 = vmatpush1.bf16.msra.mxu0 %v5558_v24  ;;  %9044 = vst [vmem:[#allocation42_spill] sm:$0xff] %v6708_v16  ;;  %v5570_v24 = vld [vmem:[%s8865_s1 + $0x28] ss:$16 sps:$4 sm:$0xff]  }
  0xea   : > { %2843 = vmatpush1.bf16.msra.mxu1 %v5561_v33  ;;  %2651 = vmatprep.subr.bf16.mxu0 %v5566_v14  ;;  %9045 = vst [vmem:[#allocation43_spill] sm:$0xff] %v6710_v63  ;;  %v5573_v33 = vld [vmem:[%s8865_s1 + $0x228] ss:$16 sps:$4 sm:$0xff]   ;;  %v6718_v14 = vpack.c.bf16 %v354_v21, %v347_v50  ;;  %v368_v21 = vld [vmem:[%s6082_s17 + $0x290] sm:$0xff] }
  0xeb   : > { %2844 = vmatprep.subr.bf16.mxu1 %v5569_v15  ;;  %v5581_v15 = vld [vmem:[%s8865_s1 + $0x20c] ss:$16 sps:$4 sm:$0xff]  }
  0xec   : > { %9046 = vst [vmem:[#allocation44_spill] sm:$0xff] %v6718_v14  ;;  %v353_v42 = vld [vmem:[%s6082_s17 + $0x218] sm:$0xff]  ;;  %v355_v17 = vld [vmem:[%s6082_s17 + $0x228] sm:$0xff] }
  0xed   : > { %2652 = vmatpush1.bf16.msra.mxu0 %v5564_v62  ;;  %v348_v62 = vld [vmem:[%s6082_s17 + $0x1f0] sm:$0xff]  ;;  %v361_v50 = vld [vmem:[%s6082_s17 + $0x258] sm:$0xff] }
  0xee   : > { %2845 = vmatpush1.bf16.msra.mxu1 %v5567_v44  ;;  %2653 = vmatprep.subr.bf16.mxu0 %v5572_v45  ;;  %v5576_v44 = vld [vmem:[%s8865_s1 + $0x8] ss:$16 sps:$4 sm:$0xff]  }
  0xef   : > { %2846 = vmatprep.subr.bf16.mxu1 %v5575_v13  ;;  %2318 = vmatmul.mubr.bf16.gmra.mxu0 %v6708_v16  ;;  %v5579_v45 = vld [vmem:[%s8865_s1 + $0x208] ss:$16 sps:$4 sm:$0xff]   ;;  %v5584_v13 = vld [vmem:[%s8865_s1 + $0x1ec] ss:$16 sps:$4 sm:$0xff]   ;;  %v9059_v16 = vlaneseq }
  0xf0   : > { %5243 = vmatmul.mubr.msk.bf16.gmra.mxu1 %vm1820_vm0, %v6710_v63  ;;  %2327 = vmatprep.mubr.bf16.mxu0 %v6718_v14  ;;  %v6751_v14 = vpack.c.bf16 %v355_v17, %v348_v62  ;;  %v6753_v63 = vpack.c.bf16 %v368_v21, %v361_v50  ;;  %v360_v62 = vld [vmem:[%s6082_s17 + $0x250] sm:$0xff]  ;;  %v367_v17 = vld [vmem:[%s6082_s17 + $0x288] sm:$0xff]  ;;  %v362_v50 = vld [vmem:[%s6082_s17 + $0x260] sm:$0xff] }
  0xf1   : > { %2520 = vmatprep.mubr.bf16.mxu1 %v9034_v12  ;;  %2654 = vmatpush1.bf16.msra.mxu0 %v5570_v24  ;;  %v5587_v24 = vld [vmem:[%s8865_s1 + $0x3ec] ss:$16 sps:$4 sm:$0xff]   ;;  %v6879_v57 = vshrl.u32 %v9059_v16, 7  ;;  %v5624_v16 = vld [vmem:[%s8865_s1 + $0x108] ss:$16 sps:$4 sm:$0xff]  }
  0xf2   : > { %2847 = vmatpush1.bf16.msra.mxu1 %v5573_v33  ;;  %2655 = vmatprep.subr.bf16.mxu0 %v5578_v43  ;;  %v6749_v33 = vpack.c.bf16 %v353_v42, %v346_v58  ;;  %9048 = vst [vmem:[#allocation46_spill] sm:$0xff] %v6751_v14  ;;  %9049 = vst [vmem:[#allocation47_spill] sm:$0xff] %v6753_v63  ;;  %v5582_v43 = vld [vmem:[%s8865_s1 + $0x1e8] ss:$16 sps:$4 sm:$0xff]   ;;  %v5590_v58 = vld [vmem:[%s8865_s1 + $0x1cc] ss:$16 sps:$4 sm:$0xff]  }
  0xf3   : > { %2848 = vmatprep.subr.bf16.mxu1 %v5581_v15  ;;  %v5585_v15 = vld [vmem:[%s8865_s1 + $0x3e8] ss:$16 sps:$4 sm:$0xff]   ;;  %v5593_v42 = vld [vmem:[%s8865_s1 + $0x3cc] ss:$16 sps:$4 sm:$0xff]   ;;  %9060 = vst [vmem:[#allocation57_spill] sm:$0xff] %v6879_v57 }
  0xf4   : > { %9047 = vst [vmem:[#allocation45_spill] sm:$0xff] %v6749_v33  ;;  %v369_v21 = vld [vmem:[%s6082_s17 + $0x298] sm:$0xff] }
  0xf5   : > { %2656 = vmatpush1.bf16.msra.mxu0 %v5576_v44  ;;  %v375_v44 = vld [vmem:[%s6082_s17 + $0x2c8] sm:$0xff] }
  0xf6   : > { %2849 = vmatpush1.bf16.msra.mxu1 %v5579_v45  ;;  %2657 = vmatprep.subr.bf16.mxu0 %v5584_v13  ;;  %v382_v45 = vld [vmem:[%s6082_s17 + $0x300] sm:$0xff]  ;;  %v5588_v13 = vld [vmem:[%s8865_s1 + $0x1c8] ss:$16 sps:$4 sm:$0xff]  }
  0xf7   : > { %2850 = vmatprep.subr.bf16.mxu1 %v5587_v24  ;;  %2328 = vmatmul.mubr.bf16.gmra.mxu0 %v6749_v33  ;;  %v5591_v24 = vld [vmem:[%s8865_s1 + $0x3c8] ss:$16 sps:$4 sm:$0xff]   ;;  %v6794_v33 = vpack.c.bf16 %v382_v45, %v375_v44 }
  0xf8   : > { %5244 = vmatmul.mubr.msk.bf16.gmra.mxu1 %vm1820_vm0, %v6751_v14  ;;  %2337 = vmatprep.mubr.bf16.mxu0 %v6753_v63  ;;  %v5596_v63 = vld [vmem:[%s8865_s1 + $0x1ac] ss:$16 sps:$4 sm:$0xff]   ;;  %v6792_v14 = vpack.c.bf16 %v369_v21, %v362_v50  ;;  %v374_v50 = vld [vmem:[%s6082_s17 + $0x2c0] sm:$0xff] }
  0xf9   : > { %2530 = vmatprep.mubr.bf16.mxu1 %v9034_v12  ;;  %2658 = vmatpush2.bf16.msra.mxu0 %v5582_v43  ;;  %v5599_v43 = vld [vmem:[%s8865_s1 + $0x3ac] ss:$16 sps:$4 sm:$0xff]   ;;  %9052 = vst [vmem:[#allocation50_spill] sm:$0xff] %v6794_v33 }
  0xfa   : > { %2851 = vmatpush2.bf16.msra.mxu1 %v5585_v15  ;;  %2659 = vmatprep.subr.bf16.mxu0 %v5590_v58  ;;  %v6790_v15 = vpack.c.bf16 %v367_v17, %v360_v62  ;;  %9051 = vst [vmem:[#allocation49_spill] sm:$0xff] %v6792_v14  ;;  %v5594_v58 = vld [vmem:[%s8865_s1 + $0x1a8] ss:$16 sps:$4 sm:$0xff]   ;;  %v5602_v62 = vld [vmem:[%s8865_s1 + $0x18c] ss:$16 sps:$4 sm:$0xff]  }
  0xfb   : > { %2852 = vmatprep.subr.bf16.mxu1 %v5593_v42  ;;  %v5597_v42 = vld [vmem:[%s8865_s1 + $0x3a8] ss:$16 sps:$4 sm:$0xff]   ;;  %v5605_v17 = vld [vmem:[%s8865_s1 + $0x38c] ss:$16 sps:$4 sm:$0xff]  }
  0xfc   : > { %9050 = vst [vmem:[#allocation48_spill] sm:$0xff] %v6790_v15  ;;  %v381_v21 = vld [vmem:[%s6082_s17 + $0x2f8] sm:$0xff]  ;;  %v383_v44 = vld [vmem:[%s6082_s17 + $0x308] sm:$0xff] }
  0xfd   : > { %2660 = vmatpush2.bf16.msra.mxu0 %v5588_v13  ;;  %v389_v45 = vld [vmem:[%s6082_s17 + $0x338] sm:$0xff]  ;;  %v396_v13 = vld [vmem:[%s6082_s17 + $0x370] sm:$0xff] }
  0xfe   : > { %2853 = vmatpush2.bf16.msra.mxu1 %v5591_v24  ;;  %2661 = vmatprep.subr.bf16.mxu0 %v5596_v63  ;;  %v376_v63 = vld [vmem:[%s6082_s17 + $0x2d0] sm:$0xff]  ;;  %v5600_v24 = vld [vmem:[%s8865_s1 + $0x188] ss:$16 sps:$4 sm:$0xff]  }
  0xff   : > { %2854 = vmatprep.subr.bf16.mxu1 %v5599_v43  ;;  %2338 = vmatmul.mubr.bf16.gmra.mxu0 %v6790_v15  ;;  %v5603_v43 = vld [vmem:[%s8865_s1 + $0x388] ss:$16 sps:$4 sm:$0xff]   ;;  %v6835_v15 = vpack.c.bf16 %v396_v13, %v389_v45 }
 0x100   : > { %5245 = vmatmul.mubr.msk.bf16.gmra.mxu1 %vm1820_vm0, %v6792_v14  ;;  %2347 = vmatprep.mubr.bf16.mxu0 %v6794_v33  ;;  %v5608_v33 = vld [vmem:[%s8865_s1 + $0x16c] ss:$16 sps:$4 sm:$0xff]   ;;  %v6833_v14 = vpack.c.bf16 %v383_v44, %v376_v63  ;;  %v388_v63 = vld [vmem:[%s6082_s17 + $0x330] sm:$0xff] }
 0x101   : > { %2540 = vmatprep.mubr.bf16.mxu1 %v9034_v12  ;;  %2662 = vmatpush2.bf16.msra.mxu0 %v5594_v58  ;;  %v5611_v58 = vld [vmem:[%s8865_s1 + $0x36c] ss:$16 sps:$4 sm:$0xff]   ;;  %9055 = vst [vmem:[#allocation53_spill] sm:$0xff] %v6835_v15 }
 0x102   : > { %2855 = vmatpush2.bf16.msra.mxu1 %v5597_v42  ;;  %2663 = vmatprep.subr.bf16.mxu0 %v5602_v62  ;;  %v6831_v42 = vpack.c.bf16 %v381_v21, %v374_v50  ;;  %9054 = vst [vmem:[#allocation52_spill] sm:$0xff] %v6833_v14  ;;  %v5606_v62 = vld [vmem:[%s8865_s1 + $0x168] ss:$16 sps:$4 sm:$0xff]   ;;  %v5614_v50 = vld [vmem:[%s8865_s1 + $0x14c] ss:$16 sps:$4 sm:$0xff]  }
 0x103   : > { %2856 = vmatprep.subr.bf16.mxu1 %v5605_v17  ;;  %v5609_v17 = vld [vmem:[%s8865_s1 + $0x368] ss:$16 sps:$4 sm:$0xff]   ;;  %v5617_v21 = vld [vmem:[%s8865_s1 + $0x34c] ss:$16 sps:$4 sm:$0xff]  }
 0x104   : > { %9053 = vst [vmem:[#allocation51_spill] sm:$0xff] %v6831_v42  ;;  %v395_v44 = vld [vmem:[%s6082_s17 + $0x368] sm:$0xff]  ;;  %v397_v45 = vld [vmem:[%s6082_s17 + $0x378] sm:$0xff] }
 0x105   : > { %2664 = vmatpush2.bf16.msra.mxu0 %v5600_v24  ;;  %v403_v13 = vld [vmem:[%s6082_s17 + $0x3a8] sm:$0xff] }
 0x106   : > { %2857 = vmatpush2.bf16.msra.mxu1 %v5603_v43  ;;  %2665 = vmatprep.subr.bf16.mxu0 %v5608_v33  ;;  %v390_v33 = vld [vmem:[%s6082_s17 + $0x340] sm:$0xff]  ;;  %v5623_v24 = vld [vmem:[%s8865_s1 + $0x32c] ss:$16 sps:$4 sm:$0xff]  }
 0x107   : > { %2858 = vmatprep.subr.bf16.mxu1 %v5611_v58  ;;  %2348 = vmatmul.mubr.bf16.gmra.mxu0 %v6831_v42  ;;  %v410_v43 = vld [vmem:[%s6082_s17 + $0x3e0] sm:$0xff]  ;;  %v5612_v58 = vld [vmem:[%s8865_s1 + $0x148] ss:$16 sps:$4 sm:$0xff]  }
 0x108   : > { %5246 = vmatmul.mubr.msk.bf16.gmra.mxu1 %vm1820_vm0, %v6833_v14  ;;  %2357 = vmatprep.mubr.bf16.mxu0 %v6835_v15  ;;  %v5615_v14 = vld [vmem:[%s8865_s1 + $0x348] ss:$16 sps:$4 sm:$0xff]   ;;  %v5620_v15 = vld [vmem:[%s8865_s1 + $0x12c] ss:$16 sps:$4 sm:$0xff]   ;;  %v6876_v42 = vpack.c.bf16 %v410_v43, %v403_v13  ;;  %v404_v13 = vld [vmem:[%s6082_s17 + $0x3b0] sm:$0xff] }
 0x109   : > { %2550 = vmatprep.mubr.bf16.mxu1 %v9034_v12  ;;  %2666 = vmatpush2.bf16.msra.mxu0 %v5606_v62  ;;  %v6872_v62 = vpack.c.bf16 %v395_v44, %v388_v63  ;;  %v5626_v63 = vld [vmem:[%s8865_s1 + $0x10c] ss:$16 sps:$4 sm:$0xff]   ;;  %v818_v44 = vld [vmem:[%s8866_s2] sm:$0xf] }
 0x10a   : > { %2859 = vmatpush2.bf16.msra.mxu1 %v5609_v17  ;;  %2667 = vmatprep.subr.bf16.mxu0 %v5614_v50  ;;  %v6874_v17 = vpack.c.bf16 %v397_v45, %v390_v33  ;;  %9058 = vst [vmem:[#allocation56_spill] sm:$0xff] %v6876_v42  ;;  %v5618_v50 = vld [vmem:[%s8865_s1 + $0x128] ss:$16 sps:$4 sm:$0xff]   ;;  %v402_v33 = vld [vmem:[%s6082_s17 + $0x3a0] sm:$0xff]  ;;  %v6904_v45 = vsub.s32 0, %v6879_v57 }
 0x10b   : > { %2860 = vmatprep.subr.bf16.mxu1 %v5617_v21  ;;  %9056 = vst [vmem:[#allocation54_spill] sm:$0xff] %v6872_v62  ;;  %v5621_v21 = vld [vmem:[%s8865_s1 + $0x328] ss:$16 sps:$4 sm:$0xff]  }
 0x10c   : > { %9057 = vst [vmem:[#allocation55_spill] sm:$0xff] %v6874_v17  ;;  %9061 = vst [vmem:[#allocation58_spill] sm:$0xff] %v6904_v45  ;;  %v417_v43 = vld [vmem:[%s6082_s17 + $0x418] sm:$0xff]  ;;  %v6930_v61 = vrot.slane %v818_v44, %v6904_v45 }
 0x10d   : > { %2668 = vmatpush2.bf16.msra.mxu0 %v5612_v58  ;;  %v424_v58 = vld [vmem:[%s6082_s17 + $0x450] sm:$0xff] }
 0x10e   : > { %2861 = vmatpush2.bf16.msra.mxu1 %v5615_v14  ;;  %2669 = vmatprep.subr.bf16.mxu0 %v5620_v15  ;;  %v5629_v14 = vld [vmem:[%s8865_s1 + $0x30c] ss:$16 sps:$4 sm:$0xff]  }
 0x10f   : > { %2862 = vmatprep.subr.bf16.mxu1 %v5623_v24  ;;  %2358 = vmatmul.mubr.bf16.gmra.mxu0 %v6872_v62  ;;  %v409_v15 = vld [vmem:[%s6082_s17 + $0x3d8] sm:$0xff]  ;;  %v411_v24 = vld [vmem:[%s6082_s17 + $0x3e8] sm:$0xff] }
 0x110   : > { %5247 = vmatmul.mubr.msk.bf16.gmra.mxu1 %vm1820_vm0, %v6874_v17  ;;  %2367 = vmatprep.mubr.bf16.mxu0 %v6876_v42  ;;  %v5627_v17 = vld [vmem:[%s8865_s1 + $0x308] ss:$16 sps:$4 sm:$0xff]   ;;  %v6917_v42 = vsub.s32 1, %v6879_v57  ;;  %v5632_v62 = vld [vmem:[%s8865_s1 + $0x4ec] ss:$16 sps:$4 sm:$0xff]   ;;  %v6927_v20 = vpack.c.bf16 %v411_v24, %v404_v13  ;;  %v416_v13 = vld [vmem:[%s6082_s17 + $0x410] sm:$0xff] }
 0x111   : > { %2560 = vmatprep.mubr.bf16.mxu1 %v9034_v12  ;;  %2670 = vmatpush2.bf16.msra.mxu0 %v5618_v50  ;;  %v5635_v50 = vld [vmem:[%s8865_s1 + $0x60c] ss:$16 sps:$4 sm:$0xff]  }
 0x112   : > { %2863 = vmatpush2.bf16.msra.mxu1 %v5621_v21  ;;  %9062 = vst [vmem:[#allocation59_spill] sm:$0xff] %v6917_v42  ;;  %2671 = vmatprep.subr.bf16.mxu0 %v5626_v63  ;;  %v6925_v21 = vpack.c.bf16 %v409_v15, %v402_v33  ;;  %9064 = vst [vmem:[#allocation61_spill] sm:$0xff] %v6927_v20  ;;  %v6932_v63 = vpack.c.bf16 %v424_v58, %v417_v43  ;;  %v431_v58 = vld [vmem:[%s6082_s17 + $0x488] sm:$0xff] }
 0x113   : > { %2864 = vmatprep.subr.bf16.mxu1 %v5629_v14  ;;  %v6935_v14 = vrot.slane %v818_v44, %v6917_v42  ;;  %v425_v44 = vld [vmem:[%s6082_s17 + $0x458] sm:$0xff] }
 0x114   : > { %9063 = vst [vmem:[#allocation60_spill] sm:$0xff] %v6925_v21  ;;  %9065 = vst [vmem:[#allocation62_spill] sm:$0xff] %v6932_v63 }
 0x115   : > { %2672 = vmatpush2.bf16.msra.mxu0 %v5624_v16  ;;  %v423_v16 = vld [vmem:[%s6082_s17 + $0x448] sm:$0xff] }
 0x116   : > { %2865 = vmatpush2.bf16.msra.mxu1 %v5627_v17  ;;  %3027 = vmatprep.subr.bf16.mxu0 %v5632_v62  ;;  %v418_v17 = vld [vmem:[%s6082_s17 + $0x420] sm:$0xff]  ;;  %v6952_v57 = vpack.c.bf16 %v423_v16, %v416_v13 }
 0x117   : > { %3234 = vmatprep.subr.bf16.mxu1 %v5635_v50  ;;  %v1903_v33 = vpop.f32.mrf.mxu0  ;;  %2368 = vmatmul.mubr.bf16.gmra.mxu0 %v6925_v21  ;;  %v438_v50 = vld [vmem:[%s6082_s17 + $0x4c0] sm:$0xff] }
 0x118   : > { %v2096_v15 = vpop.f32.mrf.mxu1  ;;  %5248 = vmatmul.mubr.msk.bf16.gmra.mxu1 %vm1820_vm0, %v6927_v20  ;;  %v1904_v24 = vadd.f32 %v1903_v33, %v6930_v61  ;;  %2377 = vmatprep.mubr.bf16.mxu0 %v6932_v63  ;;  %9066 = vst [vmem:[#allocation63_spill] sm:$0xff] %v6952_v57  ;;  %v6954_v33 = vpack.c.bf16 %v425_v44, %v418_v17  ;;  %v439_v44 = vld [vmem:[%s6082_s17 + $0x4c8] sm:$0xff] }
 0x119   : > { %2570 = vmatprep.mubr.bf16.mxu1 %v9034_v12  ;;  %v1905_v62 = vpop.f32.mrf.mxu0  ;;  %v6959_v59 = vpack.c.bf16 %v438_v50, %v431_v58  ;;  %v445_v50 = vld [vmem:[%s6082_s17 + $0x4f8] sm:$0xff] }
 0x11a   : > { %v2098_v43 = vpop.f32.mrf.mxu1  ;;  %v6949_v42 = vadd.f32 %v2096_v15, %v1904_v24  ;;  %v1906_v45 = vadd.f32 %v1905_v62, %v6935_v14  ;;  %9067 = vst [vmem:[#allocation64_spill] sm:$0xff] %v6954_v33 }
 0x11b   : > { %v1907_v20 = vpop.f32.mrf.mxu0  ;;  %9068 = vst [vmem:[#allocation65_spill] sm:$0xff] %v6959_v59 }
 0x11c   : > { %v2100_v21 = vpop.f32.mrf.mxu1  ;;  %v6956_v63 = vadd.f32 %v2098_v43, %v1906_v45  ;;  %v1908_v60 = vadd.f32 %v1907_v20, %v6930_v61  ;;  %v430_v20 = vld [vmem:[%s6082_s17 + $0x480] sm:$0xff] }
 0x11d   : > { %v1909_v15 = vpop.f32.mrf.mxu0 }
 0x11e   : > { %v2102_v24 = vpop.f32.mrf.mxu1  ;;  %v6961_v32 = vadd.f32 %v2100_v21, %v1908_v60  ;;  %v1910_v62 = vadd.f32 %v1909_v15, %v6935_v14  ;;  %v437_v60 = vld [vmem:[%s6082_s17 + $0x4b8] sm:$0xff]  ;;  %v432_v21 = vld [vmem:[%s6082_s17 + $0x490] sm:$0xff] }
 0x11f   : > { %v1913_v13 = vpop.f32.mrf.mxu0  ;;  %2378 = vmatmul.mubr.bf16.gmra.mxu0 %v6952_v57  ;;  %v452_v15 = vld [vmem:[%s6082_s17 + $0x530] sm:$0xff]  ;;  %v6981_v31 = vpack.c.bf16 %v437_v60, %v430_v20 }
 0x120   : > { %v2106_v16 = vpop.f32.mrf.mxu1  ;;  %5249 = vmatmul.mubr.msk.bf16.gmra.mxu1 %vm1820_vm0, %v6954_v33  ;;  %v6968_v45 = vadd.f32 %v2102_v24, %v1910_v62  ;;  %v1914_v17 = vadd.f32 %v1913_v13, %v6930_v61  ;;  %2387 = vmatprep.mubr.bf16.mxu0 %v6959_v59  ;;  %v6983_v13 = vpack.c.bf16 %v439_v44, %v432_v21 }
 0x121   : > { %2580 = vmatprep.mubr.bf16.mxu1 %v9034_v12  ;;  %v1915_v43 = vpop.f32.mrf.mxu0  ;;  %9071 = vst [vmem:[#allocation68_spill] sm:$0xff] %v6981_v31  ;;  %v6988_v25 = vpack.c.bf16 %v452_v15, %v445_v50  ;;  %v453_v50 = vld [vmem:[%s6082_s17 + $0x538] sm:$0xff] }
 0x122   : > { %9069 = vst [vmem:[#allocation66_spill] sm:$0xff] %v6968_v45  ;;  %v2108_v58 = vpop.f32.mrf.mxu1  ;;  %v6978_v57 = vadd.f32 %v2106_v16, %v1914_v17  ;;  %v1916_v33 = vadd.f32 %v1915_v43, %v6935_v14  ;;  %9072 = vst [vmem:[#allocation69_spill] sm:$0xff] %v6983_v13 }
 0x123   : > { %v1917_v24 = vpop.f32.mrf.mxu0  ;;  %9074 = vst [vmem:[#allocation71_spill] sm:$0xff] %v6988_v25 }
 0x124   : > { %9070 = vst [vmem:[#allocation67_spill] sm:$0xff] %v6978_v57  ;;  %v2110_v62 = vpop.f32.mrf.mxu1  ;;  %v6985_v59 = vadd.f32 %v2108_v58, %v1916_v33  ;;  %v1918_v30 = vadd.f32 %v1917_v24, %v6930_v61  ;;  %v444_v33 = vld [vmem:[%s6082_s17 + $0x4f0] sm:$0xff]  ;;  %v446_v58 = vld [vmem:[%s6082_s17 + $0x500] sm:$0xff] }
 0x125   : > { %v1919_v16 = vpop.f32.mrf.mxu0 }
 0x126   : > { %9073 = vst [vmem:[#allocation70_spill] sm:$0xff] %v6985_v59  ;;  %v2112_v17 = vpop.f32.mrf.mxu1  ;;  %v6990_v57 = vadd.f32 %v2110_v62, %v1918_v30  ;;  %v1920_v43 = vadd.f32 %v1919_v16, %v6935_v14  ;;  %v451_v30 = vld [vmem:[%s6082_s17 + $0x528] sm:$0xff]  ;;  %v466_v16 = vld [vmem:[%s6082_s17 + $0x5a0] sm:$0xff] }
 0x127   : > { %v1923_v20 = vpop.f32.mrf.mxu0  ;;  %2388 = vmatmul.mubr.bf16.gmra.mxu0 %v6981_v31  ;;  %v459_v62 = vld [vmem:[%s6082_s17 + $0x568] sm:$0xff] }
 0x128   : > { %9075 = vst [vmem:[#allocation72_spill] sm:$0xff] %v6990_v57  ;;  %v2116_v60 = vpop.f32.mrf.mxu1  ;;  %5250 = vmatmul.mubr.msk.bf16.gmra.mxu1 %vm1820_vm0, %v6983_v13  ;;  %v6997_v21 = vadd.f32 %v2112_v17, %v1920_v43  ;;  %v1924_v44 = vadd.f32 %v1923_v20, %v6930_v61  ;;  %2397 = vmatprep.mubr.bf16.mxu0 %v6988_v25 }
 0x129   : > { %2590 = vmatprep.mubr.bf16.mxu1 %v9034_v12  ;;  %v1925_v15 = vpop.f32.mrf.mxu0  ;;  %v7012_v20 = vpack.c.bf16 %v453_v50, %v446_v58  ;;  %v7017_v59 = vpack.c.bf16 %v466_v16, %v459_v62  ;;  %v467_v62 = vld [vmem:[%s6082_s17 + $0x5a8] sm:$0xff] }
 0x12a   : > { %9076 = vst [vmem:[#allocation73_spill] sm:$0xff] %v6997_v21  ;;  %v2118_v24 = vpop.f32.mrf.mxu1  ;;  %v7007_v31 = vadd.f32 %v2116_v60, %v1924_v44  ;;  %v1926_v13 = vadd.f32 %v1925_v15, %v6935_v14  ;;  %v7010_v21 = vpack.c.bf16 %v451_v30, %v444_v33 }
 0x12b   : > { %v1927_v17 = vpop.f32.mrf.mxu0  ;;  %9079 = vst [vmem:[#allocation76_spill] sm:$0xff] %v7012_v20  ;;  %9081 = vst [vmem:[#allocation78_spill] sm:$0xff] %v7017_v59 }
 0x12c   : > { %9077 = vst [vmem:[#allocation74_spill] sm:$0xff] %v7007_v31  ;;  %v2120_v43 = vpop.f32.mrf.mxu1  ;;  %9078 = vst [vmem:[#allocation75_spill] sm:$0xff] %v7010_v21  ;;  %v7014_v25 = vadd.f32 %v2118_v24, %v1926_v13  ;;  %v1928_v57 = vadd.f32 %v1927_v17, %v6930_v61  ;;  %v458_v13 = vld [vmem:[%s6082_s17 + $0x560] sm:$0xff]  ;;  %v460_v24 = vld [vmem:[%s6082_s17 + $0x570] sm:$0xff] }
 0x12d   : > { %v1929_v60 = vpop.f32.mrf.mxu0 }
 0x12e   : > { %9080 = vst [vmem:[#allocation77_spill] sm:$0xff] %v7014_v25  ;;  %v2122_v44 = vpop.f32.mrf.mxu1  ;;  %v7019_v31 = vadd.f32 %v2120_v43, %v1928_v57  ;;  %v1930_v15 = vadd.f32 %v1929_v60, %v6935_v14  ;;  %v465_v57 = vld [vmem:[%s6082_s17 + $0x598] sm:$0xff]  ;;  %v480_v60 = vld [vmem:[%s6082_s17 + $0x610] sm:$0xff] }
 0x12f   : > { %v1933_v33 = vpop.f32.mrf.mxu0  ;;  %2398 = vmatmul.mubr.bf16.gmra.mxu0 %v7010_v21  ;;  %v473_v43 = vld [vmem:[%s6082_s17 + $0x5d8] sm:$0xff] }
 0x130   : > { %9082 = vst [vmem:[#allocation79_spill] sm:$0xff] %v7019_v31  ;;  %v2126_v30 = vpop.f32.mrf.mxu1  ;;  %5251 = vmatmul.mubr.msk.bf16.gmra.mxu1 %vm1820_vm0, %v7012_v20  ;;  %v7026_v58 = vadd.f32 %v2122_v44, %v1930_v15  ;;  %v1934_v50 = vadd.f32 %v1933_v33, %v6930_v61  ;;  %2407 = vmatprep.mubr.bf16.mxu0 %v7017_v59 }
 0x131   : > { %2600 = vmatprep.mubr.bf16.mxu1 %v9034_v12  ;;  %v1935_v16 = vpop.f32.mrf.mxu0  ;;  %v7041_v33 = vpack.c.bf16 %v467_v62, %v460_v24  ;;  %v7046_v25 = vpack.c.bf16 %v480_v60, %v473_v43  ;;  %v481_v43 = vld [vmem:[%s6082_s17 + $0x618] sm:$0xff] }
 0x132   : > { %9083 = vst [vmem:[#allocation80_spill] sm:$0xff] %v7026_v58  ;;  %v2128_v17 = vpop.f32.mrf.mxu1  ;;  %v7036_v21 = vadd.f32 %v2126_v30, %v1934_v50  ;;  %v1936_v20 = vadd.f32 %v1935_v16, %v6935_v14  ;;  %v7039_v58 = vpack.c.bf16 %v465_v57, %v458_v13 }
 0x133   : > { %v1937_v44 = vpop.f32.mrf.mxu0  ;;  %9086 = vst [vmem:[#allocation83_spill] sm:$0xff] %v7041_v33  ;;  %9088 = vst [vmem:[#allocation85_spill] sm:$0xff] %v7046_v25 }
 0x134   : > { %9084 = vst [vmem:[#allocation81_spill] sm:$0xff] %v7036_v21  ;;  %v2130_v15 = vpop.f32.mrf.mxu1  ;;  %9085 = vst [vmem:[#allocation82_spill] sm:$0xff] %v7039_v58  ;;  %v7043_v59 = vadd.f32 %v2128_v17, %v1936_v20  ;;  %v1938_v31 = vadd.f32 %v1937_v44, %v6930_v61  ;;  %v472_v20 = vld [vmem:[%s6082_s17 + $0x5d0] sm:$0xff]  ;;  %v474_v17 = vld [vmem:[%s6082_s17 + $0x5e0] sm:$0xff] }
 0x135   : > { %v1939_v30 = vpop.f32.mrf.mxu0 }
 0x136   : > { %9087 = vst [vmem:[#allocation84_spill] sm:$0xff] %v7043_v59  ;;  %v2132_v50 = vpop.f32.mrf.mxu1  ;;  %v7048_v21 = vadd.f32 %v2130_v15, %v1938_v31  ;;  %v1940_v16 = vadd.f32 %v1939_v30, %v6935_v14  ;;  %v479_v31 = vld [vmem:[%s6082_s17 + $0x608] sm:$0xff]  ;;  %v494_v30 = vld [vmem:[%s6082_s17 + $0x680] sm:$0xff] }
 0x137   : > { %v1943_v13 = vpop.f32.mrf.mxu0  ;;  %2408 = vmatmul.mubr.bf16.gmra.mxu0 %v7039_v58  ;;  %v487_v15 = vld [vmem:[%s6082_s17 + $0x648] sm:$0xff] }
 0x138   : > { %9089 = vst [vmem:[#allocation86_spill] sm:$0xff] %v7048_v21  ;;  %v2136_v57 = vpop.f32.mrf.mxu1  ;;  %5252 = vmatmul.mubr.msk.bf16.gmra.mxu1 %vm1820_vm0, %v7041_v33  ;;  %v7055_v24 = vadd.f32 %v2132_v50, %v1940_v16  ;;  %v1944_v62 = vadd.f32 %v1943_v13, %v6930_v61  ;;  %2417 = vmatprep.mubr.bf16.mxu0 %v7046_v25 }
 0x139   : > { %2610 = vmatprep.mubr.bf16.mxu1 %v9034_v12  ;;  %v1945_v60 = vpop.f32.mrf.mxu0  ;;  %v7070_v13 = vpack.c.bf16 %v481_v43, %v474_v17  ;;  %v7075_v59 = vpack.c.bf16 %v494_v30, %v487_v15  ;;  %v495_v15 = vld [vmem:[%s6082_s17 + $0x688] sm:$0xff] }
 0x13a   : > { %9090 = vst [vmem:[#allocation87_spill] sm:$0xff] %v7055_v24  ;;  %v2138_v44 = vpop.f32.mrf.mxu1  ;;  %v7065_v58 = vadd.f32 %v2136_v57, %v1944_v62  ;;  %v1946_v33 = vadd.f32 %v1945_v60, %v6935_v14  ;;  %v7068_v24 = vpack.c.bf16 %v479_v31, %v472_v20 }
 0x13b   : > { %v1947_v50 = vpop.f32.mrf.mxu0  ;;  %9093 = vst [vmem:[#allocation90_spill] sm:$0xff] %v7070_v13  ;;  %9095 = vst [vmem:[#allocation92_spill] sm:$0xff] %v7075_v59 }
 0x13c   : > { %9091 = vst [vmem:[#allocation88_spill] sm:$0xff] %v7065_v58  ;;  %v2140_v16 = vpop.f32.mrf.mxu1  ;;  %9092 = vst [vmem:[#allocation89_spill] sm:$0xff] %v7068_v24  ;;  %v7072_v25 = vadd.f32 %v2138_v44, %v1946_v33  ;;  %v1948_v21 = vadd.f32 %v1947_v50, %v6930_v61  ;;  %v486_v33 = vld [vmem:[%s6082_s17 + $0x640] sm:$0xff]  ;;  %v488_v44 = vld [vmem:[%s6082_s17 + $0x650] sm:$0xff] }
 0x13d   : > { %v1949_v57 = vpop.f32.mrf.mxu0 }
 0x13e   : > { %9094 = vst [vmem:[#allocation91_spill] sm:$0xff] %v7072_v25  ;;  %v2142_v62 = vpop.f32.mrf.mxu1  ;;  %v7077_v58 = vadd.f32 %v2140_v16, %v1948_v21  ;;  %v1950_v60 = vadd.f32 %v1949_v57, %v6935_v14  ;;  %v493_v21 = vld [vmem:[%s6082_s17 + $0x678] sm:$0xff]  ;;  %v508_v57 = vld [vmem:[%s6082_s17 + $0x6f0] sm:$0xff] }
 0x13f   : > { %v1953_v20 = vpop.f32.mrf.mxu0  ;;  %2418 = vmatmul.mubr.bf16.gmra.mxu0 %v7068_v24  ;;  %v501_v16 = vld [vmem:[%s6082_s17 + $0x6b8] sm:$0xff] }
 0x140   : > { %9096 = vst [vmem:[#allocation93_spill] sm:$0xff] %v7077_v58  ;;  %v2146_v31 = vpop.f32.mrf.mxu1  ;;  %5253 = vmatmul.mubr.msk.bf16.gmra.mxu1 %vm1820_vm0, %v7070_v13  ;;  %v7084_v17 = vadd.f32 %v2142_v62, %v1950_v60  ;;  %v1954_v43 = vadd.f32 %v1953_v20, %v6930_v61  ;;  %2427 = vmatprep.mubr.bf16.mxu0 %v7075_v59 }
 0x141   : > { %2620 = vmatprep.mubr.bf16.mxu1 %v9034_v12  ;;  %v1955_v30 = vpop.f32.mrf.mxu0  ;;  %v7099_v20 = vpack.c.bf16 %v495_v15, %v488_v44  ;;  %v7104_v25 = vpack.c.bf16 %v508_v57, %v501_v16  ;;  %v502_v15 = vld [vmem:[%s6082_s17 + $0x6c0] sm:$0xff] }
 0x142   : > { %9097 = vst [vmem:[#allocation94_spill] sm:$0xff] %v7084_v17  ;;  %v2148_v50 = vpop.f32.mrf.mxu1  ;;  %v7094_v24 = vadd.f32 %v2146_v31, %v1954_v43  ;;  %v1956_v13 = vadd.f32 %v1955_v30, %v6935_v14  ;;  %v7097_v17 = vpack.c.bf16 %v493_v21, %v486_v33 }
 0x143   : > { %v1957_v62 = vpop.f32.mrf.mxu0  ;;  %9100 = vst [vmem:[#allocation97_spill] sm:$0xff] %v7099_v20  ;;  %9101 = vst [vmem:[#allocation98_spill] sm:$0xff] %v7104_v25 }
 0x144   : > { %9098 = vst [vmem:[#allocation95_spill] sm:$0xff] %v7094_v24  ;;  %v2150_v60 = vpop.f32.mrf.mxu1  ;;  %9099 = vst [vmem:[#allocation96_spill] sm:$0xff] %v7097_v17  ;;  %v7101_v59 = vadd.f32 %v2148_v50, %v1956_v13  ;;  %v1958_v58 = vadd.f32 %v1957_v62, %v6930_v61  ;;  %v500_v13 = vld [vmem:[%s6082_s17 + $0x6b0] sm:$0xff]  ;;  %v509_v50 = vld [vmem:[%s6082_s17 + $0x6f8] sm:$0xff] }
 0x145   : > { %v1959_v31 = vpop.f32.mrf.mxu0 }
 0x146   : > { %v2152_v43 = vpop.f32.mrf.mxu1  ;;  %v7106_v24 = vadd.f32 %v2150_v60, %v1958_v58  ;;  %v1960_v30 = vadd.f32 %v1959_v31, %v6935_v14  ;;  %v507_v58 = vld [vmem:[%s6082_s17 + $0x6e8] sm:$0xff] }
 0x147   : > { %v1963_v45 = vpop.f32.mrf.mxu0  ;;  %2428 = vmatmul.mubr.bf16.gmra.mxu0 %v7097_v17  ;;  %v7124_v17 = vpack.c.bf16 %v507_v58, %v500_v13 }
 0x148   : > { %9102 = vst [vmem:[#allocation99_spill] sm:$0xff] %v7106_v24  ;;  %v2156_v33 = vpop.f32.mrf.mxu1  ;;  %5254 = vmatmul.mubr.msk.bf16.gmra.mxu1 %vm1820_vm0, %v7099_v20  ;;  %v7113_v21 = vadd.f32 %v2152_v43, %v1960_v30  ;;  %v1964_v44 = vadd.f32 %v1963_v45, %v6930_v61  ;;  %2437 = vmatprep.mubr.bf16.mxu0 %v7104_v25 }
 0x149   : > { %2630 = vmatprep.mubr.bf16.mxu1 %v9034_v12  ;;  %v1965_v16 = vpop.f32.mrf.mxu0  ;;  %9104 = vst [vmem:[#allocation101_spill] sm:$0xff] %v7124_v17  ;;  %v7126_v43 = vpack.c.bf16 %v509_v50, %v502_v15 }
 0x14a   : > { %9103 = vst [vmem:[#allocation100_spill] sm:$0xff] %v7113_v21  ;;  %v2158_v57 = vpop.f32.mrf.mxu1  ;;  %v7121_v62 = vadd.f32 %v2156_v33, %v1964_v44  ;;  %v1966_v60 = vadd.f32 %v1965_v16, %v6935_v14 }
 0x14b   : > { %v1967_v31 = vpop.f32.mrf.mxu0  ;;  %9105 = vst [vmem:[#allocation102_spill] sm:$0xff] %v7126_v43 }
 0x14c   : > { %v2160_v20 = vpop.f32.mrf.mxu1  ;;  %v7128_v45 = vadd.f32 %v2158_v57, %v1966_v60  ;;  %v1968_v30 = vadd.f32 %v1967_v31, %v6930_v61 }
 0x14d   : > { %v1969_v25 = vpop.f32.mrf.mxu0 }
 0x14e   : > { %v2162_v12 = vpop.f32.mrf.mxu1  ;;  %v7131_v21 = vadd.f32 %v2160_v20, %v1968_v30  ;;  %v1970_v24 = vadd.f32 %v1969_v25, %v6935_v14 }
 0x14f   : > { %v1973_v33 = vpop.f32.mrf.mxu0  ;;  %2438 = vmatmul.mubr.bf16.gmra.mxu0 %v7124_v17 }
 0x150   : > { %v2166_v44 = vpop.f32.mrf.mxu1  ;;  %5255 = vmatmul.mubr.msk.bf16.gmra.mxu1 %vm1820_vm0, %v7126_v43  ;;  %v7137_v13 = vadd.f32 %v2162_v12, %v1970_v24  ;;  %v1974_v58 = vadd.f32 %v1973_v33, %v6930_v61  ;;  %2673 = vmatprep.mubr.bf16.mxu0 %v6103_v54  ;;  %v5630_v12 = vld [vmem:[%s8865_s1 + $0x4e8] ss:$16 sps:$4 sm:$0xff]  }
 0x151   : > { %2866 = vmatprep.mubr.bf16.mxu1 %v6105_v55  ;;  %v1975_v15 = vpop.f32.mrf.mxu0  ;;  %v5633_v54 = vld [vmem:[%s8865_s1 + $0x608] ss:$16 sps:$4 sm:$0xff]  }
 0x152   : > { %v2168_v20 = vpop.f32.mrf.mxu1  ;;  %v7142_v50 = vadd.f32 %v2166_v44, %v1974_v58  ;;  %v1976_v25 = vadd.f32 %v1975_v15, %v6935_v14  ;;  %v5638_v44 = vld [vmem:[%s8865_s1 + $0x4cc] ss:$16 sps:$4 sm:$0xff]  }
 0x153   : > { %v1977_v16 = vpop.f32.mrf.mxu0 }
 0x154   : > { %v2170_v57 = vpop.f32.mrf.mxu1  ;;  %v7145_v60 = vadd.f32 %v2168_v20, %v1976_v25  ;;  %v1978_v31 = vadd.f32 %v1977_v16, %v6930_v61  ;;  %v5636_v16 = vld [vmem:[%s8865_s1 + $0x4c8] ss:$16 sps:$4 sm:$0xff]  }
 0x155   : > { %v1979_v55 = vpop.f32.mrf.mxu0 }
 0x156   : > { %v2172_v24 = vpop.f32.mrf.mxu1  ;;  %v7154_v30 = vadd.f32 %v2170_v57, %v1978_v31  ;;  %v1980_v33 = vadd.f32 %v1979_v55, %v6935_v14 }
 0x157   : > { %v1983_v58 = vpop.f32.mrf.mxu0  ;;  %2674 = vmatmul.mubr.bf16.vlgmr.msra.gmra.mxu0 %v6169_v18  ;;  %v5641_v18 = vld [vmem:[%s8865_s1 + $0x4ac] ss:$16 sps:$4 sm:$0xff]  }
 0x158   : > { %v2176_v15 = vpop.f32.mrf.mxu1  ;;  %2867 = vmatmul.mubr.bf16.vlgmr.msra.gmra.mxu1 %v6171_v19  ;;  %v7162_v20 = vadd.f32 %v2172_v24, %v1980_v33  ;;  %v1984_v25 = vadd.f32 %v1983_v58, %v6930_v61  ;;  %3028 = vmatpush1.bf16.msra.mxu0 %v5630_v12 }
 0x159   : > { %3235 = vmatpush1.bf16.msra.mxu1 %v5633_v54  ;;  %v1985_v57 = vpop.f32.mrf.mxu0  ;;  %2683 = vmatprep.mubr.bf16.mxu0 %v6179_v22 }
 0x15a   : > { %v2178_v31 = vpop.f32.mrf.mxu1  ;;  %2876 = vmatprep.mubr.bf16.mxu1 %v6181_v23  ;;  %v7173_v19 = vadd.f32 %v2176_v15, %v1984_v25  ;;  %v1986_v55 = vadd.f32 %v1985_v57, %v6935_v14  ;;  %3029 = vmatprep.subr.bf16.mxu0 %v5638_v44  ;;  %v5639_v23 = vld [vmem:[%s8865_s1 + $0x4a8] ss:$16 sps:$4 sm:$0xff]   ;;  %v5644_v44 = vld [vmem:[%s8865_s1 + $0x48c] ss:$16 sps:$4 sm:$0xff]  }
 0x15b   : > { %v1987_v12 = vpop.f32.mrf.mxu0 }
 0x15c   : > { %v2180_v54 = vpop.f32.mrf.mxu1  ;;  %v7176_v24 = vadd.f32 %v2178_v31, %v1986_v55  ;;  %v1988_v33 = vadd.f32 %v1987_v12, %v6930_v61  ;;  %3030 = vmatpush1.bf16.msra.mxu0 %v5636_v16  ;;  %v5642_v12 = vld [vmem:[%s8865_s1 + $0x488] ss:$16 sps:$4 sm:$0xff]  }
 0x15d   : > { %v1989_v58 = vpop.f32.mrf.mxu0  ;;  %3031 = vmatprep.subr.bf16.mxu0 %v5641_v18 }
 0x15e   : > { %v2182_v22 = vpop.f32.mrf.mxu1  ;;  %v7182_v43 = vadd.f32 %v2180_v54, %v1988_v33  ;;  %v1990_v15 = vadd.f32 %v1989_v58, %v6935_v14 }
 0x15f   : > { %v1993_v25 = vpop.f32.mrf.mxu0  ;;  %2684 = vmatmul.mubr.bf16.gmra.mxu0 %v6204_v35 }
 0x160   : > { %v2186_v57 = vpop.f32.mrf.mxu1  ;;  %2877 = vmatmul.mubr.bf16.gmra.mxu1 %v6206_v36  ;;  %v7190_v16 = vadd.f32 %v2182_v22, %v1990_v15  ;;  %v1994_v31 = vadd.f32 %v1993_v25, %v6930_v61  ;;  %2693 = vmatprep.mubr.bf16.mxu0 %v6208_v37  ;;  %v5647_v36 = vld [vmem:[%s8865_s1 + $0x46c] ss:$16 sps:$4 sm:$0xff]   ;;  %v5645_v15 = vld [vmem:[%s8865_s1 + $0x468] ss:$16 sps:$4 sm:$0xff]  }
 0x161   : > { %2886 = vmatprep.mubr.bf16.mxu1 %v6210_v38  ;;  %v1995_v18 = vpop.f32.mrf.mxu0  ;;  %3032 = vmatpush1.bf16.msra.mxu0 %v5639_v23 }
 0x162   : > { %v2188_v55 = vpop.f32.mrf.mxu1  ;;  %v7198_v54 = vadd.f32 %v2186_v57, %v1994_v31  ;;  %v1996_v35 = vadd.f32 %v1995_v18, %v6935_v14  ;;  %3033 = vmatprep.subr.bf16.mxu0 %v5644_v44  ;;  %v5650_v57 = vld [vmem:[%s8865_s1 + $0x44c] ss:$16 sps:$4 sm:$0xff]  }
 0x163   : > { %v1997_v33 = vpop.f32.mrf.mxu0 }
 0x164   : > { %v2190_v37 = vpop.f32.mrf.mxu1  ;;  %v7204_v58 = vadd.f32 %v2188_v55, %v1996_v35  ;;  %v1998_v38 = vadd.f32 %v1997_v33, %v6930_v61  ;;  %v5648_v33 = vld [vmem:[%s8865_s1 + $0x448] ss:$16 sps:$4 sm:$0xff]  }
 0x165   : > { %v1999_v22 = vpop.f32.mrf.mxu0  ;;  %3034 = vmatpush1.bf16.msra.mxu0 %v5642_v12 }
 0x166   : > { %v2192_v23 = vpop.f32.mrf.mxu1  ;;  %v7210_v25 = vadd.f32 %v2190_v37, %v1998_v38  ;;  %v2000_v44 = vadd.f32 %v1999_v22, %v6935_v14  ;;  %3035 = vmatprep.subr.bf16.mxu0 %v5647_v36 }
 0x167   : > { %v2003_v31 = vpop.f32.mrf.mxu0  ;;  %2694 = vmatmul.mubr.bf16.gmra.mxu0 %v6236_v51 }
 0x168   : > { %v2196_v18 = vpop.f32.mrf.mxu1  ;;  %2887 = vmatmul.mubr.bf16.gmra.mxu1 %v6238_v52  ;;  %v7218_v55 = vadd.f32 %v2192_v23, %v2000_v44  ;;  %v2004_v12 = vadd.f32 %v2003_v31, %v6930_v61  ;;  %2703 = vmatprep.mubr.bf16.mxu0 %v6240_v53  ;;  %v5653_v52 = vld [vmem:[%s8865_s1 + $0x42c] ss:$16 sps:$4 sm:$0xff]   ;;  %v5651_v44 = vld [vmem:[%s8865_s1 + $0x428] ss:$16 sps:$4 sm:$0xff]  }
 0x169   : > { %2896 = vmatprep.mubr.bf16.mxu1 %v6242_v56  ;;  %v2005_v35 = vpop.f32.mrf.mxu0  ;;  %3036 = vmatpush1.bf16.msra.mxu0 %v5645_v15 }
 0x16a   : > { %v2198_v36 = vpop.f32.mrf.mxu1  ;;  %v7226_v37 = vadd.f32 %v2196_v18, %v2004_v12  ;;  %v2006_v51 = vadd.f32 %v2005_v35, %v6935_v14  ;;  %3037 = vmatprep.subr.bf16.mxu0 %v5650_v57  ;;  %v5656_v18 = vld [vmem:[%s8865_s1 + $0x40c] ss:$16 sps:$4 sm:$0xff]  }
 0x16b   : > { %v2007_v38 = vpop.f32.mrf.mxu0 }
 0x16c   : > { %v2200_v53 = vpop.f32.mrf.mxu1  ;;  %v7232_v22 = vadd.f32 %v2198_v36, %v2006_v51  ;;  %v2008_v56 = vadd.f32 %v2007_v38, %v6930_v61  ;;  %v5654_v38 = vld [vmem:[%s8865_s1 + $0x408] ss:$16 sps:$4 sm:$0xff]  }
 0x16d   : > { %v2009_v23 = vpop.f32.mrf.mxu0  ;;  %3038 = vmatpush1.bf16.msra.mxu0 %v5648_v33 }
 0x16e   : > { %v2202_v15 = vpop.f32.mrf.mxu1  ;;  %v7238_v31 = vadd.f32 %v2200_v53, %v2008_v56  ;;  %v2010_v57 = vadd.f32 %v2009_v23, %v6935_v14  ;;  %3039 = vmatprep.subr.bf16.mxu0 %v5653_v52 }
 0x16f   : > { %v2013_v12 = vpop.f32.mrf.mxu0  ;;  %2704 = vmatmul.mubr.bf16.gmra.mxu0 %v6268_v5 }
 0x170   : > { %v2206_v35 = vpop.f32.mrf.mxu1  ;;  %2897 = vmatmul.mubr.bf16.gmra.mxu1 %v6270_v6  ;;  %v7246_v36 = vadd.f32 %v2202_v15, %v2010_v57  ;;  %v2014_v33 = vadd.f32 %v2013_v12, %v6930_v61  ;;  %2713 = vmatprep.mubr.bf16.mxu0 %v6272_v7  ;;  %v5659_v6 = vld [vmem:[%s8865_s1 + $0x5ec] ss:$16 sps:$4 sm:$0xff]   ;;  %v5657_v57 = vld [vmem:[%s8865_s1 + $0x5e8] ss:$16 sps:$4 sm:$0xff]  }
 0x171   : > { %2906 = vmatprep.mubr.bf16.mxu1 %v6274_v8  ;;  %v2015_v51 = vpop.f32.mrf.mxu0  ;;  %3040 = vmatpush1.bf16.msra.mxu0 %v5651_v44 }
 0x172   : > { %v2208_v52 = vpop.f32.mrf.mxu1  ;;  %v7254_v53 = vadd.f32 %v2206_v35, %v2014_v33  ;;  %v2016_v5 = vadd.f32 %v2015_v51, %v6935_v14  ;;  %3041 = vmatprep.subr.bf16.mxu0 %v5656_v18  ;;  %v5662_v35 = vld [vmem:[%s8865_s1 + $0x5cc] ss:$16 sps:$4 sm:$0xff]  }
 0x173   : > { %v2017_v56 = vpop.f32.mrf.mxu0 }
 0x174   : > { %v2210_v7 = vpop.f32.mrf.mxu1  ;;  %v7260_v23 = vadd.f32 %v2208_v52, %v2016_v5  ;;  %v2018_v8 = vadd.f32 %v2017_v56, %v6930_v61  ;;  %v5660_v56 = vld [vmem:[%s8865_s1 + $0x5c8] ss:$16 sps:$4 sm:$0xff]  }
 0x175   : > { %v2019_v15 = vpop.f32.mrf.mxu0  ;;  %3042 = vmatpush1.bf16.msra.mxu0 %v5654_v38 }
 0x176   : > { %v2212_v44 = vpop.f32.mrf.mxu1  ;;  %v7266_v12 = vadd.f32 %v2210_v7, %v2018_v8  ;;  %v2020_v18 = vadd.f32 %v2019_v15, %v6935_v14  ;;  %3043 = vmatprep.subr.bf16.mxu0 %v5659_v6 }
 0x177   : > { %v2023_v33 = vpop.f32.mrf.mxu0  ;;  %2714 = vmatmul.mubr.bf16.gmra.mxu0 %v6300_v26 }
 0x178   : > { %v2216_v51 = vpop.f32.mrf.mxu1  ;;  %2907 = vmatmul.mubr.bf16.gmra.mxu1 %v6302_v27  ;;  %v7274_v52 = vadd.f32 %v2212_v44, %v2020_v18  ;;  %v2024_v38 = vadd.f32 %v2023_v33, %v6930_v61  ;;  %2723 = vmatprep.mubr.bf16.mxu0 %v6304_v28  ;;  %v5665_v27 = vld [vmem:[%s8865_s1 + $0x5ac] ss:$16 sps:$4 sm:$0xff]   ;;  %v5663_v18 = vld [vmem:[%s8865_s1 + $0x5a8] ss:$16 sps:$4 sm:$0xff]  }
 0x179   : > { %2916 = vmatprep.mubr.bf16.mxu1 %v6306_v29  ;;  %v2025_v5 = vpop.f32.mrf.mxu0  ;;  %3044 = vmatpush2.bf16.msra.mxu0 %v5657_v57 }
 0x17a   : > { %v2218_v6 = vpop.f32.mrf.mxu1  ;;  %v7282_v7 = vadd.f32 %v2216_v51, %v2024_v38  ;;  %v2026_v26 = vadd.f32 %v2025_v5, %v6935_v14  ;;  %3045 = vmatprep.subr.bf16.mxu0 %v5662_v35  ;;  %v5668_v51 = vld [vmem:[%s8865_s1 + $0x58c] ss:$16 sps:$4 sm:$0xff]  }
 0x17b   : > { %v2027_v8 = vpop.f32.mrf.mxu0 }
 0x17c   : > { %v2220_v28 = vpop.f32.mrf.mxu1  ;;  %v7288_v15 = vadd.f32 %v2218_v6, %v2026_v26  ;;  %v2028_v29 = vadd.f32 %v2027_v8, %v6930_v61  ;;  %v5666_v8 = vld [vmem:[%s8865_s1 + $0x588] ss:$16 sps:$4 sm:$0xff]  }
 0x17d   : > { %v2029_v44 = vpop.f32.mrf.mxu0  ;;  %3046 = vmatpush2.bf16.msra.mxu0 %v5660_v56 }
 0x17e   : > { %v2222_v57 = vpop.f32.mrf.mxu1  ;;  %v7294_v33 = vadd.f32 %v2220_v28, %v2028_v29  ;;  %v2030_v35 = vadd.f32 %v2029_v44, %v6935_v14  ;;  %3047 = vmatprep.subr.bf16.mxu0 %v5665_v27 }
 0x17f   : > { %v2033_v38 = vpop.f32.mrf.mxu0  ;;  %2724 = vmatmul.mubr.bf16.gmra.mxu0 %v6332_v46 }
 0x180   : > { %v2226_v5 = vpop.f32.mrf.mxu1  ;;  %2917 = vmatmul.mubr.bf16.gmra.mxu1 %v6334_v47  ;;  %v7302_v6 = vadd.f32 %v2222_v57, %v2030_v35  ;;  %v2034_v56 = vadd.f32 %v2033_v38, %v6930_v61  ;;  %2733 = vmatprep.mubr.bf16.mxu0 %v6336_v48  ;;  %v5671_v47 = vld [vmem:[%s8865_s1 + $0x56c] ss:$16 sps:$4 sm:$0xff]   ;;  %v5669_v35 = vld [vmem:[%s8865_s1 + $0x568] ss:$16 sps:$4 sm:$0xff]  }
 0x181   : > { %2926 = vmatprep.mubr.bf16.mxu1 %v6338_v49  ;;  %v2035_v26 = vpop.f32.mrf.mxu0  ;;  %3048 = vmatpush2.bf16.msra.mxu0 %v5663_v18 }
 0x182   : > { %v2228_v27 = vpop.f32.mrf.mxu1  ;;  %v7310_v28 = vadd.f32 %v2226_v5, %v2034_v56  ;;  %v2036_v46 = vadd.f32 %v2035_v26, %v6935_v14  ;;  %3049 = vmatprep.subr.bf16.mxu0 %v5668_v51  ;;  %v5674_v5 = vld [vmem:[%s8865_s1 + $0x54c] ss:$16 sps:$4 sm:$0xff]  }
 0x183   : > { %v2037_v29 = vpop.f32.mrf.mxu0 }
 0x184   : > { %v2230_v48 = vpop.f32.mrf.mxu1  ;;  %v7316_v44 = vadd.f32 %v2228_v27, %v2036_v46  ;;  %v2038_v49 = vadd.f32 %v2037_v29, %v6930_v61  ;;  %v5672_v29 = vld [vmem:[%s8865_s1 + $0x548] ss:$16 sps:$4 sm:$0xff]  }
 0x185   : > { %v2039_v57 = vpop.f32.mrf.mxu0  ;;  %3050 = vmatpush2.bf16.msra.mxu0 %v5666_v8 }
 0x186   : > { %v2232_v18 = vpop.f32.mrf.mxu1  ;;  %v7322_v38 = vadd.f32 %v2230_v48, %v2038_v49  ;;  %v2040_v51 = vadd.f32 %v2039_v57, %v6935_v14  ;;  %3051 = vmatprep.subr.bf16.mxu0 %v5671_v47 }
 0x187   : > { %v2043_v56 = vpop.f32.mrf.mxu0  ;;  %2734 = vmatmul.mubr.bf16.gmra.mxu0 %v6364_v4 }
 0x188   : > { %v2236_v26 = vpop.f32.mrf.mxu1  ;;  %2927 = vmatmul.mubr.bf16.gmra.mxu1 %v6366_v9  ;;  %v7330_v27 = vadd.f32 %v2232_v18, %v2040_v51  ;;  %v2044_v8 = vadd.f32 %v2043_v56, %v6930_v61  ;;  %2743 = vmatprep.mubr.bf16.mxu0 %v6368_v10  ;;  %v5677_v9 = vld [vmem:[%s8865_s1 + $0x52c] ss:$16 sps:$4 sm:$0xff]   ;;  %v5675_v51 = vld [vmem:[%s8865_s1 + $0x528] ss:$16 sps:$4 sm:$0xff]  }
 0x189   : > { %2936 = vmatprep.mubr.bf16.mxu1 %v6370_v11  ;;  %v2045_v46 = vpop.f32.mrf.mxu0  ;;  %3052 = vmatpush2.bf16.msra.mxu0 %v5669_v35 }
 0x18a   : > { %v2238_v47 = vpop.f32.mrf.mxu1  ;;  %v7338_v48 = vadd.f32 %v2236_v26, %v2044_v8  ;;  %v2046_v4 = vadd.f32 %v2045_v46, %v6935_v14  ;;  %3053 = vmatprep.subr.bf16.mxu0 %v5674_v5  ;;  %v5680_v26 = vld [vmem:[%s8865_s1 + $0x50c] ss:$16 sps:$4 sm:$0xff]  }
 0x18b   : > { %v2047_v49 = vpop.f32.mrf.mxu0 }
 0x18c   : > { %v2240_v10 = vpop.f32.mrf.mxu1  ;;  %v7344_v57 = vadd.f32 %v2238_v47, %v2046_v4  ;;  %v2048_v11 = vadd.f32 %v2047_v49, %v6930_v61  ;;  %v5678_v49 = vld [vmem:[%s8865_s1 + $0x508] ss:$16 sps:$4 sm:$0xff]  }
 0x18d   : > { %v2049_v18 = vpop.f32.mrf.mxu0  ;;  %3054 = vmatpush2.bf16.msra.mxu0 %v5672_v29 }
 0x18e   : > { %v2242_v35 = vpop.f32.mrf.mxu1  ;;  %v7350_v56 = vadd.f32 %v2240_v10, %v2048_v11  ;;  %v2050_v5 = vadd.f32 %v2049_v18, %v6935_v14  ;;  %3055 = vmatprep.subr.bf16.mxu0 %v5677_v9 }
 0x18f   : > { %v2053_v8 = vpop.f32.mrf.mxu0  ;;  %2744 = vmatmul.mubr.bf16.gmra.mxu0 %v6399_v34 }
 0x190   : > { %v2246_v46 = vpop.f32.mrf.mxu1  ;;  %2937 = vmatmul.mubr.bf16.gmra.mxu1 %v6401_v39  ;;  %v7358_v47 = vadd.f32 %v2242_v35, %v2050_v5  ;;  %v2054_v29 = vadd.f32 %v2053_v8, %v6930_v61  ;;  %2753 = vmatprep.mubr.bf16.mxu0 %v6403_v40  ;;  %v5683_v8 = vld [vmem:[%s8867_s3 + $0x74] ss:$8 sps:$4 sm:$0xff]  }
 0x191   : > { %2946 = vmatprep.mubr.bf16.mxu1 %v6405_v41  ;;  %v2055_v4 = vpop.f32.mrf.mxu0  ;;  %3056 = vmatpush2.bf16.msra.mxu0 %v5675_v51 }
 0x192   : > { %v2248_v9 = vpop.f32.mrf.mxu1  ;;  %v7366_v10 = vadd.f32 %v2246_v46, %v2054_v29  ;;  %v2056_v34 = vadd.f32 %v2055_v4, %v6935_v14  ;;  %3057 = vmatprep.subr.bf16.mxu0 %v5680_v26 }
 0x193   : > { %v2057_v39 = vpop.f32.mrf.mxu0 }
 0x194   : > { %v2250_v11 = vpop.f32.mrf.mxu1  ;;  %v7369_v18 = vadd.f32 %v2248_v9, %v2056_v34  ;;  %v2058_v40 = vadd.f32 %v2057_v39, %v6930_v61 }
 0x195   : > { %v2059_v35 = vpop.f32.mrf.mxu0  ;;  %3058 = vmatpush2.bf16.msra.mxu0 %v5678_v49 }
 0x196   : > { %v2252_v41 = vpop.f32.mrf.mxu1  ;;  %v7372_v5 = vadd.f32 %v2250_v11, %v2058_v40  ;;  %v2060_v51 = vadd.f32 %v2059_v35, %v6935_v14  ;;  %4257 = vmatprep.subr.bf16.mxu0 %v5683_v8  ;;  %v9110_v8 = vld [vmem:[#allocation7_spill] sm:$0xff] }
 0x197   : > { %v2289_v46 = vpop.f32.mrf.mxu0  ;;  %2754 = vmatmul.mubr.bf16.gmra.mxu0 %v6431_v0 }
 0x198   : > { %9106 = vst [vmem:[#allocation103_spill] sm:$0xff] %v7372_v5  ;;  %v2482_v29 = vpop.f32.mrf.mxu1  ;;  %2947 = vmatmul.mubr.bf16.gmra.mxu1 %v6433_v1  ;;  %v7380_v26 = vadd.f32 %v2252_v41, %v2060_v51  ;;  %v2290_v61 = vadd.f32 %v2289_v46, %v6949_v42  ;;  %2763 = vmatprep.mubr.bf16.mxu0 %v6435_v2  ;;  %v9108_v41 = vld [vmem:[#allocation66_spill] sm:$0xff] }
 0x199   : > { %2956 = vmatprep.mubr.bf16.mxu1 %v6437_v3  ;;  %v2291_v4 = vpop.f32.mrf.mxu0  ;;  %v9109_v46 = vld [vmem:[#allocation6_spill] sm:$0xff] }
 0x19a   : > { %9107 = vst [vmem:[#allocation104_spill] sm:$0xff] %v7380_v26  ;;  %v2484_v14 = vpop.f32.mrf.mxu1  ;;  %v2483_v9 = vadd.f32 %v2482_v29, %v2290_v61  ;;  %v2292_v49 = vadd.f32 %v2291_v4, %v6956_v63  ;;  %v9111_v29 = vld [vmem:[#allocation67_spill] sm:$0xff]  ;;  %v9112_v4 = vld [vmem:[#allocation8_spill] sm:$0xff] }
 0x19b   : > { %v2293_v34 = vpop.f32.mrf.mxu0 }
 0x19c   : > { %v2486_v39 = vpop.f32.mrf.mxu1  ;;  %v2485_v11 = vadd.f32 %v2484_v14, %v2292_v49  ;;  %v2294_v0 = vadd.f32 %v2293_v34, %v6961_v32  ;;  %v3541_v1 = vmul.f32 0.2, %v2483_v9  ;;  %vm3413_vm1 = vcmp.gt.f32.partialorder %v2483_v9, 0.0  ;;  %v9113_v32 = vld [vmem:[#allocation9_spill] sm:$0xff] }
 0x19d   : > { %v2295_v40 = vpop.f32.mrf.mxu0 }
 0x19e   : > { %v2488_v35 = vpop.f32.mrf.mxu1  ;;  %v2487_v42 = vadd.f32 %v2486_v39, %v2294_v0  ;;  %v2296_v2 = vadd.f32 %v2295_v40, %v9108_v41  ;;  %v7393_v14 = vsel %vm3413_vm1, %v2483_v9, %v3541_v1  ;;  %v3542_v0 = vmul.f32 0.2, %v2485_v11  ;;  %v9117_v9 = vld [vmem:[#allocation72_spill] sm:$0xff] }
 0x19f   : > { %v2299_v51 = vpop.f32.mrf.mxu0  ;;  %2764 = vmatmul.mubr.bf16.gmra.mxu0 %v9109_v46  ;;  %9114 = vst [vmem:[#allocation66_spill] sm:$0xff] %v7393_v14  ;;  %v9116_v46 = vld [vmem:[#allocation70_spill] sm:$0xff]  ;;  %vm3414_vm3 = vcmp.gt.f32.partialorder %v2485_v11, 0.0  ;;  %v9122_v14 = vld [vmem:[#allocation11_spill] sm:$0xff] }
 0x1a0   : > { %v2492_v3 = vpop.f32.mrf.mxu1  ;;  %2957 = vmatmul.mubr.bf16.gmra.mxu1 %v9110_v8  ;;  %vm3417_vm2 = vcmp.gt.f32.partialorder %v2487_v42, 0.0  ;;  %v3545_v63 = vmul.f32 0.2, %v2487_v42  ;;  %v2300_v61 = vadd.f32 %v2299_v51, %v9111_v29  ;;  %2773 = vmatprep.mubr.bf16.mxu0 %v9112_v4  ;;  %v2489_v49 = vadd.f32 %v2488_v35, %v2296_v2  ;;  %v9121_v8 = vld [vmem:[#allocation10_spill] sm:$0xff] }
 0x1a1   : > { %2966 = vmatprep.mubr.bf16.mxu1 %v9113_v32  ;;  %v2301_v34 = vpop.f32.mrf.mxu0 }
 0x1a2   : > { %v2494_v39 = vpop.f32.mrf.mxu1  ;;  %v7395_v40 = vsel %vm3417_vm2, %v2487_v42, %v3545_v63  ;;  %v2493_v41 = vadd.f32 %v2492_v3, %v2300_v61  ;;  %v2302_v17 = vadd.f32 %v2301_v34, %v9116_v46  ;;  %vm3418_vm4 = vcmp.gt.f32.partialorder %v2489_v49, 0.0  ;;  %v9120_v63 = vld [vmem:[#allocation73_spill] sm:$0xff] }
 0x1a3   : > { %9115 = vst [vmem:[#allocation6_spill] sm:$0xff] %v7395_v40  ;;  %v3546_v51 = vmul.f32 0.2, %v2489_v49  ;;  %v2303_v29 = vpop.f32.mrf.mxu0  ;;  %v7403_v3 = vsel %vm3414_vm3, %v2485_v11, %v3542_v0 }
 0x1a4   : > { %v2496_v4 = vpop.f32.mrf.mxu1  ;;  %v2495_v32 = vadd.f32 %v2494_v39, %v2302_v17  ;;  %v2304_v1 = vadd.f32 %v2303_v29, %v9117_v9  ;;  %v3549_v35 = vmul.f32 0.2, %v2493_v41  ;;  %vm3421_vm5 = vcmp.gt.f32.partialorder %v2493_v41, 0.0  ;;  %9119 = vst [vmem:[#allocation67_spill] sm:$0xff] %v7403_v3  ;;  %v9123_v29 = vld [vmem:[#allocation74_spill] sm:$0xff] }
 0x1a5   : > { %v2305_v2 = vpop.f32.mrf.mxu0  ;;  %v7401_v5 = vsel %vm3418_vm4, %v2489_v49, %v3546_v51  ;;  %v9124_v51 = vld [vmem:[#allocation12_spill] sm:$0xff] }
 0x1a6   : > { %v2498_v26 = vpop.f32.mrf.mxu1  ;;  %9118 = vst [vmem:[#allocation7_spill] sm:$0xff] %v7401_v5  ;;  %v2497_v42 = vadd.f32 %v2496_v4, %v2304_v1  ;;  %v2306_v61 = vadd.f32 %v2305_v2, %v9120_v63  ;;  %v9125_v4 = vld [vmem:[#allocation13_spill] sm:$0xff]  ;;  %v7413_v11 = vsel %vm3421_vm5, %v2493_v41, %v3549_v35  ;;  %v3550_v2 = vmul.f32 0.2, %v2495_v32  ;;  %v9134_v5 = vld [vmem:[#allocation15_spill] sm:$0xff] }
 0x1a7   : > { %v2309_v34 = vpop.f32.mrf.mxu0  ;;  %2774 = vmatmul.mubr.bf16.gmra.mxu0 %v9121_v8  ;;  %9126 = vst [vmem:[#allocation8_spill] sm:$0xff] %v7413_v11  ;;  %v9128_v63 = vld [vmem:[#allocation77_spill] sm:$0xff]  ;;  %vm3422_vm7 = vcmp.gt.f32.partialorder %v2495_v32, 0.0 }
 0x1a8   : > { %v2502_v46 = vpop.f32.mrf.mxu1  ;;  %2967 = vmatmul.mubr.bf16.gmra.mxu1 %v9122_v14  ;;  %vm3425_vm6 = vcmp.gt.f32.partialorder %v2497_v42, 0.0  ;;  %v3553_v39 = vmul.f32 0.2, %v2497_v42  ;;  %v2310_v49 = vadd.f32 %v2309_v34, %v9123_v29  ;;  %2783 = vmatprep.mubr.bf16.mxu0 %v9124_v51  ;;  %v2499_v0 = vadd.f32 %v2498_v26, %v2306_v61  ;;  %v5698_v17 = vld [vmem:[%s8867_s3 + $0x174] ss:$8 sps:$4 sm:$0xff]  }
 0x1a9   : > { %2976 = vmatprep.mubr.bf16.mxu1 %v9125_v4  ;;  %v2311_v9 = vpop.f32.mrf.mxu0  ;;  %v9129_v29 = vld [vmem:[#allocation79_spill] sm:$0xff]  ;;  %4450 = vmatprep.subr.bf16.mxu1 %v5698_v17 }
 0x1aa   : > { %v2504_v1 = vpop.f32.mrf.mxu1  ;;  %v7415_v8 = vsel %vm3425_vm6, %v2497_v42, %v3553_v39  ;;  %v2503_v14 = vadd.f32 %v2502_v46, %v2310_v49  ;;  %v2312_v40 = vadd.f32 %v2311_v9, %v9128_v63  ;;  %vm3426_vm8 = vcmp.gt.f32.partialorder %v2499_v0, 0.0  ;;  %v9132_v63 = vld [vmem:[#allocation80_spill] sm:$0xff] }
 0x1ab   : > { %9127 = vst [vmem:[#allocation9_spill] sm:$0xff] %v7415_v8  ;;  %v3554_v41 = vmul.f32 0.2, %v2499_v0  ;;  %v2313_v35 = vpop.f32.mrf.mxu0  ;;  %v7426_v9 = vsel %vm3422_vm7, %v2495_v32, %v3550_v2  ;;  %v9133_v8 = vld [vmem:[#allocation14_spill] sm:$0xff] }
 0x1ac   : > { %v2506_v26 = vpop.f32.mrf.mxu1  ;;  %v2505_v61 = vadd.f32 %v2504_v1, %v2312_v40  ;;  %v2314_v51 = vadd.f32 %v2313_v35, %v9129_v29  ;;  %v3557_v42 = vmul.f32 0.2, %v2503_v14  ;;  %vm3429_vm9 = vcmp.gt.f32.partialorder %v2503_v14, 0.0  ;;  %9131 = vst [vmem:[#allocation72_spill] sm:$0xff] %v7426_v9  ;;  %v9135_v1 = vld [vmem:[#allocation81_spill] sm:$0xff]  ;;  %v9145_v40 = vld [vmem:[#allocation18_spill] sm:$0xff] }
 0x1ad   : > { %v2315_v46 = vpop.f32.mrf.mxu0  ;;  %v7424_v49 = vsel %vm3426_vm8, %v2499_v0, %v3554_v41  ;;  %v9136_v41 = vld [vmem:[#allocation16_spill] sm:$0xff]  ;;  %v9137_v35 = vld [vmem:[#allocation17_spill] sm:$0xff] }
 0x1ae   : > { %v2508_v39 = vpop.f32.mrf.mxu1  ;;  %9130 = vst [vmem:[#allocation70_spill] sm:$0xff] %v7424_v49  ;;  %v2507_v4 = vadd.f32 %v2506_v26, %v2314_v51  ;;  %v2316_v3 = vadd.f32 %v2315_v46, %v9132_v63  ;;  %v7436_v32 = vsel %vm3429_vm9, %v2503_v14, %v3557_v42  ;;  %v3558_v51 = vmul.f32 0.2, %v2505_v61  ;;  %v9140_v46 = vld [vmem:[#allocation84_spill] sm:$0xff]  ;;  %v9141_v14 = vld [vmem:[#allocation86_spill] sm:$0xff] }
 0x1af   : > { %v2319_v34 = vpop.f32.mrf.mxu0  ;;  %2784 = vmatmul.mubr.bf16.gmra.mxu0 %v9133_v8  ;;  %9138 = vst [vmem:[#allocation73_spill] sm:$0xff] %v7436_v32  ;;  %vm3430_vm11 = vcmp.gt.f32.partialorder %v2505_v61, 0.0  ;;  %v9146_v32 = vld [vmem:[#allocation19_spill] sm:$0xff] }
 0x1b0   : > { %v2512_v11 = vpop.f32.mrf.mxu1  ;;  %2977 = vmatmul.mubr.bf16.gmra.mxu1 %v9134_v5  ;;  %vm3433_vm10 = vcmp.gt.f32.partialorder %v2507_v4, 0.0  ;;  %v3561_v17 = vmul.f32 0.2, %v2507_v4  ;;  %v2320_v0 = vadd.f32 %v2319_v34, %v9135_v1  ;;  %2793 = vmatprep.mubr.bf16.mxu0 %v9136_v41  ;;  %v2509_v2 = vadd.f32 %v2508_v39, %v2316_v3 }
 0x1b1   : > { %2986 = vmatprep.mubr.bf16.mxu1 %v9137_v35  ;;  %v2321_v26 = vpop.f32.mrf.mxu0 }
 0x1b2   : > { %v2514_v29 = vpop.f32.mrf.mxu1  ;;  %v7438_v8 = vsel %vm3433_vm10, %v2507_v4, %v3561_v17  ;;  %v2513_v5 = vadd.f32 %v2512_v11, %v2320_v0  ;;  %v2322_v63 = vadd.f32 %v2321_v26, %v9140_v46  ;;  %vm3434_vm12 = vcmp.gt.f32.partialorder %v2509_v2, 0.0  ;;  %v9144_v17 = vld [vmem:[#allocation87_spill] sm:$0xff] }
 0x1b3   : > { %9139 = vst [vmem:[#allocation10_spill] sm:$0xff] %v7438_v8  ;;  %v3562_v34 = vmul.f32 0.2, %v2509_v2  ;;  %v2323_v1 = vpop.f32.mrf.mxu0  ;;  %v7446_v4 = vsel %vm3430_vm11, %v2505_v61, %v3558_v51 }
 0x1b4   : > { %v2516_v41 = vpop.f32.mrf.mxu1  ;;  %v2515_v35 = vadd.f32 %v2514_v29, %v2322_v63  ;;  %v2324_v42 = vadd.f32 %v2323_v1, %v9141_v14  ;;  %v3565_v3 = vmul.f32 0.2, %v2513_v5  ;;  %vm3437_vm13 = vcmp.gt.f32.partialorder %v2513_v5, 0.0  ;;  %9143 = vst [vmem:[#allocation74_spill] sm:$0xff] %v7446_v4  ;;  %v9147_v1 = vld [vmem:[#allocation88_spill] sm:$0xff]  ;;  %v9156_v29 = vld [vmem:[#allocation22_spill] sm:$0xff] }
 0x1b5   : > { %v2325_v39 = vpop.f32.mrf.mxu0  ;;  %v7444_v49 = vsel %vm3434_vm12, %v2509_v2, %v3562_v34  ;;  %v9148_v34 = vld [vmem:[#allocation20_spill] sm:$0xff] }
 0x1b6   : > { %v2518_v9 = vpop.f32.mrf.mxu1  ;;  %9142 = vst [vmem:[#allocation11_spill] sm:$0xff] %v7444_v49  ;;  %v2517_v11 = vadd.f32 %v2516_v41, %v2324_v42  ;;  %v2326_v0 = vadd.f32 %v2325_v39, %v9144_v17  ;;  %v9149_v41 = vld [vmem:[#allocation21_spill] sm:$0xff]  ;;  %v7456_v61 = vsel %vm3437_vm13, %v2513_v5, %v3565_v3  ;;  %v3566_v39 = vmul.f32 0.2, %v2515_v35  ;;  %v9152_v17 = vld [vmem:[#allocation91_spill] sm:$0xff] }
 0x1b7   : > { %v2329_v26 = vpop.f32.mrf.mxu0  ;;  %2794 = vmatmul.mubr.bf16.gmra.mxu0 %v9145_v40  ;;  %9150 = vst [vmem:[#allocation12_spill] sm:$0xff] %v7456_v61  ;;  %vm3438_vm15 = vcmp.gt.f32.partialorder %v2515_v35, 0.0  ;;  %v9153_v5 = vld [vmem:[#allocation93_spill] sm:$0xff]  ;;  %v9157_v61 = vld [vmem:[#allocation23_spill] sm:$0xff] }
 0x1b8   : > { %v2522_v46 = vpop.f32.mrf.mxu1  ;;  %2987 = vmatmul.mubr.bf16.gmra.mxu1 %v9146_v32  ;;  %vm3441_vm14 = vcmp.gt.f32.partialorder %v2517_v11, 0.0  ;;  %v3569_v63 = vmul.f32 0.2, %v2517_v11  ;;  %v2330_v2 = vadd.f32 %v2329_v26, %v9147_v1  ;;  %2803 = vmatprep.mubr.bf16.mxu0 %v9148_v34  ;;  %v2519_v51 = vadd.f32 %v2518_v9, %v2326_v0 }
 0x1b9   : > { %2996 = vmatprep.mubr.bf16.mxu1 %v9149_v41  ;;  %v2331_v14 = vpop.f32.mrf.mxu0 }
 0x1ba   : > { %v2524_v42 = vpop.f32.mrf.mxu1  ;;  %v7458_v40 = vsel %vm3441_vm14, %v2517_v11, %v3569_v63  ;;  %v2523_v32 = vadd.f32 %v2522_v46, %v2330_v2  ;;  %v2332_v8 = vadd.f32 %v2331_v14, %v9152_v17  ;;  %vm3442_vm1 = vcmp.gt.f32.partialorder %v2519_v51, 0.0  ;;  %v9155_v63 = vld [vmem:[#allocation94_spill] sm:$0xff] }
 0x1bb   : > { %9151 = vst [vmem:[#allocation13_spill] sm:$0xff] %v7458_v40  ;;  %v3570_v26 = vmul.f32 0.2, %v2519_v51  ;;  %v2333_v1 = vpop.f32.mrf.mxu0  ;;  %v7466_v46 = vsel %vm3438_vm15, %v2515_v35, %v3566_v39 }
 0x1bc   : > { %v2526_v34 = vpop.f32.mrf.mxu1  ;;  %v2525_v41 = vadd.f32 %v2524_v42, %v2332_v8  ;;  %v2334_v3 = vadd.f32 %v2333_v1, %v9153_v5  ;;  %v3573_v9 = vmul.f32 0.2, %v2523_v32  ;;  %vm3445_vm2 = vcmp.gt.f32.partialorder %v2523_v32, 0.0  ;;  %9154 = vst [vmem:[#allocation77_spill] sm:$0xff] %v7466_v46  ;;  %v9158_v1 = vld [vmem:[#allocation95_spill] sm:$0xff]  ;;  %v9164_v8 = vld [vmem:[#allocation26_spill] sm:$0xff] }
 0x1bd   : > { %v2335_v0 = vpop.f32.mrf.mxu0  ;;  %v7464_v49 = vsel %vm3442_vm1, %v2519_v51, %v3570_v26  ;;  %v9159_v26 = vld [vmem:[#allocation24_spill] sm:$0xff] }
 0x1be   : > { %v2528_v4 = vpop.f32.mrf.mxu1  ;;  %v2527_v11 = vadd.f32 %v2526_v34, %v2334_v3  ;;  %v2336_v2 = vadd.f32 %v2335_v0, %v9155_v63  ;;  %v9160_v34 = vld [vmem:[#allocation25_spill] sm:$0xff]  ;;  %v7476_v35 = vsel %vm3445_vm2, %v2523_v32, %v3573_v9  ;;  %v3574_v0 = vmul.f32 0.2, %v2525_v41  ;;  %v9162_v32 = vld [vmem:[#allocation99_spill] sm:$0xff] }
 0x1bf   : > { %v2339_v14 = vpop.f32.mrf.mxu0  ;;  %2804 = vmatmul.mubr.bf16.gmra.mxu0 %v9156_v29  ;;  %9161 = vst [vmem:[#allocation79_spill] sm:$0xff] %v7476_v35  ;;  %vm3446_vm4 = vcmp.gt.f32.partialorder %v2525_v41, 0.0  ;;  %v9165_v35 = vld [vmem:[#allocation27_spill] sm:$0xff] }
 0x1c0   : > { %v2532_v17 = vpop.f32.mrf.mxu1  ;;  %2997 = vmatmul.mubr.bf16.gmra.mxu1 %v9157_v61  ;;  %vm3449_vm3 = vcmp.gt.f32.partialorder %v2527_v11, 0.0  ;;  %v3577_v42 = vmul.f32 0.2, %v2527_v11  ;;  %v2340_v51 = vadd.f32 %v2339_v14, %v9158_v1  ;;  %2813 = vmatprep.mubr.bf16.mxu0 %v9159_v26  ;;  %v2529_v39 = vadd.f32 %v2528_v4, %v2336_v2 }
 0x1c1   : > { %3006 = vmatprep.mubr.bf16.mxu1 %v9160_v34  ;;  %v2341_v5 = vpop.f32.mrf.mxu0 }
 0x1c2   : > { %v2534_v3 = vpop.f32.mrf.mxu1  ;;  %v7478_v29 = vsel %vm3449_vm3, %v2527_v11, %v3577_v42  ;;  %v2533_v61 = vadd.f32 %v2532_v17, %v2340_v51  ;;  %v2342_v63 = vadd.f32 %v2341_v5, %v7101_v59  ;;  %vm3450_vm5 = vcmp.gt.f32.partialorder %v2529_v39, 0.0  ;;  %v9163_v59 = vld [vmem:[#allocation100_spill] sm:$0xff] }
 0x1c3   : > { %v3578_v14 = vmul.f32 0.2, %v2529_v39  ;;  %v2343_v1 = vpop.f32.mrf.mxu0  ;;  %v7486_v17 = vsel %vm3446_vm4, %v2525_v41, %v3574_v0 }
 0x1c4   : > { %v2536_v26 = vpop.f32.mrf.mxu1  ;;  %v2535_v34 = vadd.f32 %v2534_v3, %v2342_v63  ;;  %v2344_v9 = vadd.f32 %v2343_v1, %v9162_v32  ;;  %v3581_v4 = vmul.f32 0.2, %v2533_v61  ;;  %vm3453_vm6 = vcmp.gt.f32.partialorder %v2533_v61, 0.0  ;;  %v9167_v1 = vld [vmem:[#allocation29_spill] sm:$0xff] }
 0x1c5   : > { %v2345_v2 = vpop.f32.mrf.mxu0  ;;  %v7484_v46 = vsel %vm3450_vm5, %v2529_v39, %v3578_v14  ;;  %v9166_v14 = vld [vmem:[#allocation28_spill] sm:$0xff] }
 0x1c6   : > { %v2538_v40 = vpop.f32.mrf.mxu1  ;;  %v2537_v11 = vadd.f32 %v2536_v26, %v2344_v9  ;;  %v2346_v42 = vadd.f32 %v2345_v2, %v9163_v59  ;;  %v7496_v41 = vsel %vm3453_vm6, %v2533_v61, %v3581_v4  ;;  %v3582_v9 = vmul.f32 0.2, %v2535_v34  ;;  %v9169_v59 = vld [vmem:[#allocation31_spill] sm:$0xff] }
 0x1c7   : > { %v2349_v51 = vpop.f32.mrf.mxu0  ;;  %2814 = vmatmul.mubr.bf16.gmra.mxu0 %v9164_v8  ;;  %vm3454_vm8 = vcmp.gt.f32.partialorder %v2535_v34, 0.0 }
 0x1c8   : > { %v2542_v5 = vpop.f32.mrf.mxu1  ;;  %3007 = vmatmul.mubr.bf16.gmra.mxu1 %v9165_v35  ;;  %vm3457_vm7 = vcmp.gt.f32.partialorder %v2537_v11, 0.0  ;;  %v3585_v63 = vmul.f32 0.2, %v2537_v11  ;;  %v2350_v39 = vadd.f32 %v2349_v51, %v7121_v62  ;;  %2823 = vmatprep.mubr.bf16.mxu0 %v9166_v14  ;;  %v2539_v0 = vadd.f32 %v2538_v40, %v2346_v42 }
 0x1c9   : > { %3016 = vmatprep.mubr.bf16.mxu1 %v9167_v1  ;;  %v2351_v26 = vpop.f32.mrf.mxu0 }
 0x1ca   : > { %v2544_v32 = vpop.f32.mrf.mxu1  ;;  %v7498_v8 = vsel %vm3457_vm7, %v2537_v11, %v3585_v63  ;;  %v2543_v35 = vadd.f32 %v2542_v5, %v2350_v39  ;;  %v2352_v2 = vadd.f32 %v2351_v26, %v7128_v45  ;;  %vm3458_vm9 = vcmp.gt.f32.partialorder %v2539_v0, 0.0  ;;  %v9168_v26 = vld [vmem:[#allocation30_spill] sm:$0xff] }
 0x1cb   : > { %v3586_v62 = vmul.f32 0.2, %v2539_v0  ;;  %v2353_v51 = vpop.f32.mrf.mxu0  ;;  %v7506_v5 = vsel %vm3454_vm8, %v2535_v34, %v3582_v9 }
 0x1cc   : > { %v2546_v14 = vpop.f32.mrf.mxu1  ;;  %v2545_v1 = vadd.f32 %v2544_v32, %v2352_v2  ;;  %v2354_v61 = vadd.f32 %v2353_v51, %v7131_v21  ;;  %v3589_v40 = vmul.f32 0.2, %v2543_v35  ;;  %vm3461_vm10 = vcmp.gt.f32.partialorder %v2543_v35, 0.0  ;;  %v9170_v2 = vld [vmem:[#allocation32_spill] sm:$0xff] }
 0x1cd   : > { %v2355_v4 = vpop.f32.mrf.mxu0  ;;  %v7504_v3 = vsel %vm3458_vm9, %v2539_v0, %v3586_v62  ;;  %v9171_v62 = vmov 0  }
 0x1ce   : > { %v2548_v42 = vpop.f32.mrf.mxu1  ;;  %v2547_v11 = vadd.f32 %v2546_v14, %v2354_v61  ;;  %v2356_v45 = vadd.f32 %v2355_v4, %v7137_v13  ;;  %v7516_v34 = vsel %vm3461_vm10, %v2543_v35, %v3589_v40  ;;  %v3590_v14 = vmul.f32 0.2, %v2545_v1 }
 0x1cf   : > { %v2359_v63 = vpop.f32.mrf.mxu0  ;;  %2824 = vmatmul.mubr.bf16.gmra.mxu0 %v9168_v26  ;;  %9172 = vst [vmem:[#allocation80_spill] sm:$0xff] %v7516_v34  ;;  %vm3462_vm12 = vcmp.gt.f32.partialorder %v2545_v1, 0.0  ;;  %v9173_v26 = vld [vmem:[#allocation33_spill] sm:$0xff]  ;;  %v9175_v34 = vld [vmem:[#allocation35_spill] sm:$0xff] }
 0x1d0   : > { %v2552_v39 = vpop.f32.mrf.mxu1  ;;  %3017 = vmatmul.mubr.bf16.gmra.mxu1 %v9169_v59  ;;  %vm3465_vm11 = vcmp.gt.f32.partialorder %v2547_v11, 0.0  ;;  %v3593_v32 = vmul.f32 0.2, %v2547_v11  ;;  %v2360_v0 = vadd.f32 %v2359_v63, %v7142_v50  ;;  %3059 = vmatprep.mubr.bf16.mxu0 %v9170_v2  ;;  %v2549_v13 = vadd.f32 %v2548_v42, %v2356_v45 }
 0x1d1   : > { %3252 = vmatprep.mubr.bf16.mxu1 %v9171_v62  ;;  %v2361_v9 = vpop.f32.mrf.mxu0 }
 0x1d2   : > { %v2554_v51 = vpop.f32.mrf.mxu1  ;;  %v7518_v61 = vsel %vm3465_vm11, %v2547_v11, %v3593_v32  ;;  %v2553_v59 = vadd.f32 %v2552_v39, %v2360_v0  ;;  %v2362_v4 = vadd.f32 %v2361_v9, %v7145_v60  ;;  %vm3466_vm13 = vcmp.gt.f32.partialorder %v2549_v13, 0.0  ;;  %v5681_v11 = vld [vmem:[%s8867_s3 + $0x70] ss:$8 sps:$4 sm:$0xff]   ;;  %v5686_v0 = vld [vmem:[%s8867_s3 + $0x64] ss:$8 sps:$4 sm:$0xff]  }
 0x1d3   : > { %v3594_v50 = vmul.f32 0.2, %v2549_v13  ;;  %v2363_v63 = vpop.f32.mrf.mxu0  ;;  %v5696_v60 = vld [vmem:[%s8867_s3 + $0x170] ss:$8 sps:$4 sm:$0xff]   ;;  %v7541_v9 = vsel %vm3462_vm12, %v2545_v1, %v3590_v14 }
 0x1d4   : > { %v2556_v2 = vpop.f32.mrf.mxu1  ;;  %v7523_v21 = vadd.f32 %v2554_v51, %v2362_v4  ;;  %v2364_v35 = vadd.f32 %v2363_v63, %v7154_v30  ;;  %v3597_v40 = vmul.f32 0.2, %v2553_v59  ;;  %vm3469_vm14 = vcmp.gt.f32.partialorder %v2553_v59, 0.0  ;;  %v5707_v30 = vld [vmem:[%s8867_s3 + $0x164] ss:$8 sps:$4 sm:$0xff]  }
 0x1d5   : > { %v2365_v42 = vpop.f32.mrf.mxu0  ;;  %v7532_v39 = vsel %vm3466_vm13, %v2549_v13, %v3594_v50  ;;  %v9174_v13 = vld [vmem:[#allocation34_spill] sm:$0xff] }
 0x1d6   : > { %v2558_v45 = vpop.f32.mrf.mxu1  ;;  %v2557_v32 = vadd.f32 %v2556_v2, %v2364_v35  ;;  %v2366_v51 = vadd.f32 %v2365_v42, %v7162_v20  ;;  %v7553_v20 = vsel %vm3469_vm14, %v2553_v59, %v3597_v40  ;;  %v5684_v42 = vld [vmem:[%s8867_s3 + $0x60] ss:$8 sps:$4 sm:$0xff]   ;;  %v5689_v40 = vld [vmem:[%s8867_s3 + $0x54] ss:$8 sps:$4 sm:$0xff]   ;;  %vm3470_vm1 = vcmp.gt.f32.partialorder %v7523_v21, 0.0 }
 0x1d7   : > { %v2369_v4 = vpop.f32.mrf.mxu0  ;;  %3060 = vmatmul.mubr.bf16.vlgmr.msra.gmra.mxu0 %v9173_v26  ;;  %v9178_v50 = vld [vmem:[#allocation38_spill] sm:$0xff] }
 0x1d8   : > { %v2562_v63 = vpop.f32.mrf.mxu1  ;;  %5256 = vmatmul.mubr.msk.bf16.vlgmr.msra.gmra.mxu1 %vm1820_vm0, %v9174_v13  ;;  %vm3473_vm15 = vcmp.gt.f32.partialorder %v2557_v32, 0.0  ;;  %v3601_v2 = vmul.f32 0.2, %v2557_v32  ;;  %v2370_v35 = vadd.f32 %v2369_v4, %v7173_v19  ;;  %3069 = vmatprep.mubr.bf16.mxu0 %v9175_v34  ;;  %v2559_v1 = vadd.f32 %v2558_v45, %v2366_v51  ;;  %v5705_v19 = vld [vmem:[%s8867_s3 + $0x160] ss:$8 sps:$4 sm:$0xff]  }
 0x1d9   : > { %3262 = vmatprep.mubr.bf16.mxu1 %v9171_v62  ;;  %v2371_v14 = vpop.f32.mrf.mxu0  ;;  %4258 = vmatpush1.bf16.msra.mxu0 %v5681_v11  ;;  %v3598_v34 = vmul.f32 0.2, %v7523_v21  ;;  %v5716_v45 = vld [vmem:[%s8867_s3 + $0x154] ss:$8 sps:$4 sm:$0xff]  }
 0x1da   : > { %v2564_v26 = vpop.f32.mrf.mxu1  ;;  %4451 = vmatpush1.bf16.msra.mxu1 %v5696_v60  ;;  %v7562_v4 = vsel %vm3473_vm15, %v2557_v32, %v3601_v2  ;;  %v2563_v13 = vadd.f32 %v2562_v63, %v2370_v35  ;;  %v2372_v59 = vadd.f32 %v2371_v14, %v7176_v24  ;;  %4259 = vmatprep.subr.bf16.mxu0 %v5686_v0  ;;  %vm3474_vm2 = vcmp.gt.f32.partialorder %v2559_v1, 0.0  ;;  %v5687_v35 = vld [vmem:[%s8867_s3 + $0x50] ss:$8 sps:$4 sm:$0xff]  }
 0x1db   : > { %4452 = vmatprep.subr.bf16.mxu1 %v5707_v30  ;;  %v3602_v60 = vmul.f32 0.2, %v2559_v1  ;;  %v2373_v32 = vpop.f32.mrf.mxu0  ;;  %v5714_v14 = vld [vmem:[%s8867_s3 + $0x150] ss:$8 sps:$4 sm:$0xff]  }
 0x1dc   : > { %v2566_v51 = vpop.f32.mrf.mxu1  ;;  %v7574_v24 = vadd.f32 %v2564_v26, %v2372_v59  ;;  %v2374_v0 = vadd.f32 %v2373_v32, %v7182_v43  ;;  %v3605_v63 = vmul.f32 0.2, %v2563_v13  ;;  %vm3477_vm3 = vcmp.gt.f32.partialorder %v2563_v13, 0.0  ;;  %v5692_v43 = vld [vmem:[%s8867_s3 + $0x44] ss:$8 sps:$4 sm:$0xff]   ;;  %v9176_v32 = vld [vmem:[#allocation36_spill] sm:$0xff] }
 0x1dd   : > { %v2375_v2 = vpop.f32.mrf.mxu0  ;;  %4260 = vmatpush1.bf16.msra.mxu0 %v5684_v42  ;;  %v7583_v11 = vsel %vm3474_vm2, %v2559_v1, %v3602_v60  ;;  %v5725_v42 = vld [vmem:[%s8867_s3 + $0x144] ss:$8 sps:$4 sm:$0xff]  }
 0x1de   : > { %v2568_v30 = vpop.f32.mrf.mxu1  ;;  %4453 = vmatpush1.bf16.msra.mxu1 %v5705_v19  ;;  %v2567_v26 = vadd.f32 %v2566_v51, %v2374_v0  ;;  %4261 = vmatprep.subr.bf16.mxu0 %v5689_v40  ;;  %v7594_v19 = vsel %vm3470_vm1, %v7523_v21, %v3598_v34  ;;  %v2376_v1 = vadd.f32 %v2375_v2, %v7190_v16  ;;  %v9177_v40 = vld [vmem:[#allocation37_spill] sm:$0xff]  ;;  %vm3478_vm5 = vcmp.gt.f32.partialorder %v7574_v24, 0.0 }
 0x1df   : > { %4454 = vmatprep.subr.bf16.mxu1 %v5716_v45  ;;  %v2379_v59 = vpop.f32.mrf.mxu0  ;;  %3070 = vmatmul.mubr.bf16.gmra.mxu0 %v9176_v32  ;;  %v7606_v16 = vsel %vm3477_vm3, %v2563_v13, %v3605_v63  ;;  %v5690_v32 = vld [vmem:[%s8867_s3 + $0x40] ss:$8 sps:$4 sm:$0xff]   ;;  %v5695_v63 = vld [vmem:[%s8867_s3 + $0x34] ss:$8 sps:$4 sm:$0xff]  }
 0x1e0   : > { %v2572_v60 = vpop.f32.mrf.mxu1  ;;  %5257 = vmatmul.mubr.msk.bf16.gmra.mxu1 %vm1820_vm0, %v9177_v40  ;;  %vm3481_vm4 = vcmp.gt.f32.partialorder %v2567_v26, 0.0  ;;  %v3609_v51 = vmul.f32 0.2, %v2567_v26  ;;  %v2380_v0 = vadd.f32 %v2379_v59, %v7198_v54  ;;  %3079 = vmatprep.mubr.bf16.mxu0 %v9178_v50  ;;  %v2569_v21 = vadd.f32 %v2568_v30, %v2376_v1  ;;  %v5723_v54 = vld [vmem:[%s8867_s3 + $0x140] ss:$8 sps:$4 sm:$0xff]  }
 0x1e1   : > { %3272 = vmatprep.mubr.bf16.mxu1 %v9171_v62  ;;  %v2381_v34 = vpop.f32.mrf.mxu0  ;;  %4262 = vmatpush1.bf16.msra.mxu0 %v5687_v35  ;;  %v3606_v50 = vmul.f32 0.2, %v7574_v24  ;;  %v5734_v30 = vld [vmem:[%s8867_s3 + $0x134] ss:$8 sps:$4 sm:$0xff]  }
 0x1e2   : > { %v2574_v2 = vpop.f32.mrf.mxu1  ;;  %4455 = vmatpush1.bf16.msra.mxu1 %v5714_v14  ;;  %v7615_v59 = vsel %vm3481_vm4, %v2567_v26, %v3609_v51  ;;  %v2573_v40 = vadd.f32 %v2572_v60, %v2380_v0  ;;  %v2382_v13 = vadd.f32 %v2381_v34, %v7204_v58  ;;  %4263 = vmatprep.subr.bf16.mxu0 %v5692_v43  ;;  %vm3482_vm6 = vcmp.gt.f32.partialorder %v2569_v21, 0.0  ;;  %v5693_v0 = vld [vmem:[%s8867_s3 + $0x30] ss:$8 sps:$4 sm:$0xff]   ;;  %v9181_v45 = vld [vmem:[#allocation41_spill] sm:$0xff] }
 0x1e3   : > { %4456 = vmatprep.subr.bf16.mxu1 %v5725_v42  ;;  %v3610_v14 = vmul.f32 0.2, %v2569_v21  ;;  %v2383_v26 = vpop.f32.mrf.mxu0  ;;  %v5732_v34 = vld [vmem:[%s8867_s3 + $0x130] ss:$8 sps:$4 sm:$0xff]  }
 0x1e4   : > { %v2576_v1 = vpop.f32.mrf.mxu1  ;;  %v7627_v58 = vadd.f32 %v2574_v2, %v2382_v13  ;;  %v2384_v43 = vadd.f32 %v2383_v26, %v7210_v25  ;;  %v3613_v60 = vmul.f32 0.2, %v2573_v40  ;;  %vm3485_vm7 = vcmp.gt.f32.partialorder %v2573_v40, 0.0  ;;  %v5701_v25 = vld [vmem:[%s8867_s3 + $0x24] ss:$8 sps:$4 sm:$0xff]  }
 0x1e5   : > { %v2385_v51 = vpop.f32.mrf.mxu0  ;;  %4264 = vmatpush1.bf16.msra.mxu0 %v5690_v32  ;;  %v7636_v35 = vsel %vm3482_vm6, %v2569_v21, %v3610_v14  ;;  %v5743_v32 = vld [vmem:[%s8867_s3 + $0x124] ss:$8 sps:$4 sm:$0xff]  }
 0x1e6   : > { %v2578_v42 = vpop.f32.mrf.mxu1  ;;  %4457 = vmatpush1.bf16.msra.mxu1 %v5723_v54  ;;  %v2577_v2 = vadd.f32 %v2576_v1, %v2384_v43  ;;  %4265 = vmatprep.subr.bf16.mxu0 %v5695_v63  ;;  %v7647_v54 = vsel %vm3478_vm5, %v7574_v24, %v3606_v50  ;;  %v2386_v21 = vadd.f32 %v2385_v51, %v7218_v55  ;;  %v9179_v26 = vld [vmem:[#allocation39_spill] sm:$0xff]  ;;  %v9180_v63 = vld [vmem:[#allocation40_spill] sm:$0xff]  ;;  %vm3486_vm9 = vcmp.gt.f32.partialorder %v7627_v58, 0.0 }
 0x1e7   : > { %4458 = vmatprep.subr.bf16.mxu1 %v5734_v30  ;;  %v2389_v13 = vpop.f32.mrf.mxu0  ;;  %3080 = vmatmul.mubr.bf16.gmra.mxu0 %v9179_v26  ;;  %v7659_v55 = vsel %vm3485_vm7, %v2573_v40, %v3613_v60  ;;  %v5699_v26 = vld [vmem:[%s8867_s3 + $0x20] ss:$8 sps:$4 sm:$0xff]   ;;  %v5704_v60 = vld [vmem:[%s8867_s3 + $0x14] ss:$8 sps:$4 sm:$0xff]  }
 0x1e8   : > { %v2582_v14 = vpop.f32.mrf.mxu1  ;;  %5258 = vmatmul.mubr.msk.bf16.gmra.mxu1 %vm1820_vm0, %v9180_v63  ;;  %vm3489_vm8 = vcmp.gt.f32.partialorder %v2577_v2, 0.0  ;;  %v3617_v1 = vmul.f32 0.2, %v2577_v2  ;;  %v2390_v43 = vadd.f32 %v2389_v13, %v7226_v37  ;;  %3089 = vmatprep.mubr.bf16.mxu0 %v9181_v45  ;;  %v2579_v24 = vadd.f32 %v2578_v42, %v2386_v21  ;;  %v5741_v37 = vld [vmem:[%s8867_s3 + $0x120] ss:$8 sps:$4 sm:$0xff]   ;;  %v9184_v30 = vld [vmem:[#allocation44_spill] sm:$0xff] }
 0x1e9   : > { %3282 = vmatprep.mubr.bf16.mxu1 %v9171_v62  ;;  %v2391_v50 = vpop.f32.mrf.mxu0  ;;  %4266 = vmatpush1.bf16.msra.mxu0 %v5693_v0  ;;  %v3614_v45 = vmul.f32 0.2, %v7627_v58  ;;  %v5749_v42 = vld [vmem:[%s8867_s3 + $0x114] ss:$8 sps:$4 sm:$0xff]  }
 0x1ea   : > { %v2584_v51 = vpop.f32.mrf.mxu1  ;;  %4459 = vmatpush1.bf16.msra.mxu1 %v5732_v34  ;;  %v7668_v13 = vsel %vm3489_vm8, %v2577_v2, %v3617_v1  ;;  %v2583_v63 = vadd.f32 %v2582_v14, %v2390_v43  ;;  %v2392_v40 = vadd.f32 %v2391_v50, %v7232_v22  ;;  %4267 = vmatprep.subr.bf16.mxu0 %v5701_v25  ;;  %vm3490_vm10 = vcmp.gt.f32.partialorder %v2579_v24, 0.0  ;;  %v5702_v43 = vld [vmem:[%s8867_s3 + $0x10] ss:$8 sps:$4 sm:$0xff]  }
 0x1eb   : > { %4460 = vmatprep.subr.bf16.mxu1 %v5743_v32  ;;  %v3618_v34 = vmul.f32 0.2, %v2579_v24  ;;  %v2393_v2 = vpop.f32.mrf.mxu0  ;;  %v5747_v50 = vld [vmem:[%s8867_s3 + $0x110] ss:$8 sps:$4 sm:$0xff]  }
 0x1ec   : > { %v2586_v21 = vpop.f32.mrf.mxu1  ;;  %v7680_v22 = vadd.f32 %v2584_v51, %v2392_v40  ;;  %v2394_v25 = vadd.f32 %v2393_v2, %v7238_v31  ;;  %v3621_v14 = vmul.f32 0.2, %v2583_v63  ;;  %vm3493_vm11 = vcmp.gt.f32.partialorder %v2583_v63, 0.0  ;;  %v5710_v31 = vld [vmem:[%s8867_s3 + $0x4] ss:$8 sps:$4 sm:$0xff]  }
 0x1ed   : > { %v2395_v1 = vpop.f32.mrf.mxu0  ;;  %4268 = vmatpush1.bf16.msra.mxu0 %v5699_v26  ;;  %v7689_v0 = vsel %vm3490_vm10, %v2579_v24, %v3618_v34  ;;  %v5752_v26 = vld [vmem:[%s8867_s3 + $0x104] ss:$8 sps:$4 sm:$0xff]  }
 0x1ee   : > { %v2588_v32 = vpop.f32.mrf.mxu1  ;;  %4461 = vmatpush1.bf16.msra.mxu1 %v5741_v37  ;;  %v2587_v51 = vadd.f32 %v2586_v21, %v2394_v25  ;;  %4269 = vmatprep.subr.bf16.mxu0 %v5704_v60  ;;  %v7700_v37 = vsel %vm3486_vm9, %v7627_v58, %v3614_v45  ;;  %v2396_v24 = vadd.f32 %v2395_v1, %v7246_v36  ;;  %v9182_v2 = vld [vmem:[#allocation42_spill] sm:$0xff]  ;;  %v9183_v60 = vld [vmem:[#allocation43_spill] sm:$0xff]  ;;  %vm3494_vm13 = vcmp.gt.f32.partialorder %v7680_v22, 0.0 }
 0x1ef   : > { %4462 = vmatprep.subr.bf16.mxu1 %v5749_v42  ;;  %v2399_v40 = vpop.f32.mrf.mxu0  ;;  %3090 = vmatmul.mubr.bf16.gmra.mxu0 %v9182_v2  ;;  %v7712_v36 = vsel %vm3493_vm11, %v2583_v63, %v3621_v14  ;;  %v5708_v2 = vld [vmem:[%s8867_s3] ss:$8 sps:$4 sm:$0xff]   ;;  %v5713_v14 = vld [vmem:[%s8867_s3 + $0xf4] ss:$8 sps:$4 sm:$0xff]  }
 0x1f0   : > { %v2592_v34 = vpop.f32.mrf.mxu1  ;;  %5259 = vmatmul.mubr.msk.bf16.gmra.mxu1 %vm1820_vm0, %v9183_v60  ;;  %vm3497_vm12 = vcmp.gt.f32.partialorder %v2587_v51, 0.0  ;;  %v3625_v21 = vmul.f32 0.2, %v2587_v51  ;;  %v2400_v25 = vadd.f32 %v2399_v40, %v7254_v53  ;;  %3099 = vmatprep.mubr.bf16.mxu0 %v9184_v30  ;;  %v2589_v58 = vadd.f32 %v2588_v32, %v2396_v24  ;;  %v5750_v53 = vld [vmem:[%s8867_s3 + $0x100] ss:$8 sps:$4 sm:$0xff]   ;;  %v9187_v42 = vld [vmem:[#allocation47_spill] sm:$0xff] }
 0x1f1   : > { %3292 = vmatprep.mubr.bf16.mxu1 %v9171_v62  ;;  %v2401_v45 = vpop.f32.mrf.mxu0  ;;  %4270 = vmatpush1.bf16.msra.mxu0 %v5702_v43  ;;  %v3622_v30 = vmul.f32 0.2, %v7680_v22  ;;  %v5755_v32 = vld [vmem:[%s8867_s3 + $0x1f4] ss:$8 sps:$4 sm:$0xff]  }
 0x1f2   : > { %v2594_v1 = vpop.f32.mrf.mxu1  ;;  %4463 = vmatpush1.bf16.msra.mxu1 %v5747_v50  ;;  %v7721_v40 = vsel %vm3497_vm12, %v2587_v51, %v3625_v21  ;;  %v2593_v60 = vadd.f32 %v2592_v34, %v2400_v25  ;;  %v2402_v63 = vadd.f32 %v2401_v45, %v7260_v23  ;;  %4271 = vmatprep.subr.bf16.mxu0 %v5710_v31  ;;  %vm3498_vm14 = vcmp.gt.f32.partialorder %v2589_v58, 0.0  ;;  %v5711_v25 = vld [vmem:[%s8867_s3 + $0xf0] ss:$8 sps:$4 sm:$0xff]  }
 0x1f3   : > { %4464 = vmatprep.subr.bf16.mxu1 %v5752_v26  ;;  %v3626_v50 = vmul.f32 0.2, %v2589_v58  ;;  %v2403_v51 = vpop.f32.mrf.mxu0  ;;  %v5753_v45 = vld [vmem:[%s8867_s3 + $0x1f0] ss:$8 sps:$4 sm:$0xff]  }
 0x1f4   : > { %v2596_v24 = vpop.f32.mrf.mxu1  ;;  %v7733_v23 = vadd.f32 %v2594_v1, %v2402_v63  ;;  %v2404_v31 = vadd.f32 %v2403_v51, %v7266_v12  ;;  %v3629_v34 = vmul.f32 0.2, %v2593_v60  ;;  %vm3501_vm15 = vcmp.gt.f32.partialorder %v2593_v60, 0.0  ;;  %v5719_v12 = vld [vmem:[%s8867_s3 + $0xe4] ss:$8 sps:$4 sm:$0xff]  }
 0x1f5   : > { %v2405_v21 = vpop.f32.mrf.mxu0  ;;  %4272 = vmatpush1.bf16.msra.mxu0 %v5708_v2  ;;  %v7742_v43 = vsel %vm3498_vm14, %v2589_v58, %v3626_v50  ;;  %v5758_v2 = vld [vmem:[%s8867_s3 + $0x1e4] ss:$8 sps:$4 sm:$0xff]  }
 0x1f6   : > { %v2598_v26 = vpop.f32.mrf.mxu1  ;;  %4465 = vmatpush1.bf16.msra.mxu1 %v5750_v53  ;;  %v2597_v1 = vadd.f32 %v2596_v24, %v2404_v31  ;;  %4273 = vmatprep.subr.bf16.mxu0 %v5713_v14  ;;  %v7753_v53 = vsel %vm3494_vm13, %v7680_v22, %v3622_v30  ;;  %v2406_v58 = vadd.f32 %v2405_v21, %v7274_v52  ;;  %v9185_v51 = vld [vmem:[#allocation45_spill] sm:$0xff]  ;;  %v9186_v14 = vld [vmem:[#allocation46_spill] sm:$0xff]  ;;  %vm3502_vm2 = vcmp.gt.f32.partialorder %v7733_v23, 0.0 }
 0x1f7   : > { %4466 = vmatprep.subr.bf16.mxu1 %v5755_v32  ;;  %v2409_v63 = vpop.f32.mrf.mxu0  ;;  %3100 = vmatmul.mubr.bf16.gmra.mxu0 %v9185_v51  ;;  %v7765_v52 = vsel %vm3501_vm15, %v2593_v60, %v3629_v34  ;;  %v5717_v51 = vld [vmem:[%s8867_s3 + $0xe0] ss:$8 sps:$4 sm:$0xff]   ;;  %v5722_v34 = vld [vmem:[%s8867_s3 + $0xd4] ss:$8 sps:$4 sm:$0xff]  }
 0x1f8   : > { %v2602_v50 = vpop.f32.mrf.mxu1  ;;  %5260 = vmatmul.mubr.msk.bf16.gmra.mxu1 %vm1820_vm0, %v9186_v14  ;;  %vm3505_vm1 = vcmp.gt.f32.partialorder %v2597_v1, 0.0  ;;  %v3633_v24 = vmul.f32 0.2, %v2597_v1  ;;  %v2410_v31 = vadd.f32 %v2409_v63, %v7282_v7  ;;  %3109 = vmatprep.mubr.bf16.mxu0 %v9187_v42  ;;  %v2599_v22 = vadd.f32 %v2598_v26, %v2406_v58  ;;  %v5756_v7 = vld [vmem:[%s8867_s3 + $0x1e0] ss:$8 sps:$4 sm:$0xff]   ;;  %v9188_v32 = vld [vmem:[#allocation48_spill] sm:$0xff] }
 0x1f9   : > { %3302 = vmatprep.mubr.bf16.mxu1 %v9171_v62  ;;  %v2411_v30 = vpop.f32.mrf.mxu0  ;;  %4274 = vmatpush2.bf16.msra.mxu0 %v5711_v25  ;;  %v3630_v42 = vmul.f32 0.2, %v7733_v23  ;;  %v5761_v26 = vld [vmem:[%s8867_s3 + $0x1d4] ss:$8 sps:$4 sm:$0xff]  }
 0x1fa   : > { %v2604_v21 = vpop.f32.mrf.mxu1  ;;  %4467 = vmatpush2.bf16.msra.mxu1 %v5753_v45  ;;  %v7774_v63 = vsel %vm3505_vm1, %v2597_v1, %v3633_v24  ;;  %v2603_v14 = vadd.f32 %v2602_v50, %v2410_v31  ;;  %v2412_v60 = vadd.f32 %v2411_v30, %v7288_v15  ;;  %4275 = vmatprep.subr.bf16.mxu0 %v5719_v12  ;;  %vm3506_vm3 = vcmp.gt.f32.partialorder %v2599_v22, 0.0  ;;  %v5720_v31 = vld [vmem:[%s8867_s3 + $0xd0] ss:$8 sps:$4 sm:$0xff]  }
 0x1fb   : > { %4468 = vmatprep.subr.bf16.mxu1 %v5758_v2  ;;  %v3634_v45 = vmul.f32 0.2, %v2599_v22  ;;  %v2413_v1 = vpop.f32.mrf.mxu0  ;;  %v5759_v30 = vld [vmem:[%s8867_s3 + $0x1d0] ss:$8 sps:$4 sm:$0xff]  }
 0x1fc   : > { %v2606_v58 = vpop.f32.mrf.mxu1  ;;  %v7786_v15 = vadd.f32 %v2604_v21, %v2412_v60  ;;  %v2414_v12 = vadd.f32 %v2413_v1, %v7294_v33  ;;  %v3637_v50 = vmul.f32 0.2, %v2603_v14  ;;  %vm3509_vm4 = vcmp.gt.f32.partialorder %v2603_v14, 0.0  ;;  %v5728_v33 = vld [vmem:[%s8867_s3 + $0xc4] ss:$8 sps:$4 sm:$0xff]  }
 0x1fd   : > { %v2415_v24 = vpop.f32.mrf.mxu0  ;;  %4276 = vmatpush2.bf16.msra.mxu0 %v5717_v51  ;;  %v7795_v25 = vsel %vm3506_vm3, %v2599_v22, %v3634_v45  ;;  %v7803_v51 = vsel %vm3502_vm2, %v7733_v23, %v3630_v42  ;;  %v9189_v22 = vld [vmem:[#allocation49_spill] sm:$0xff] }
 0x1fe   : > { %v2608_v2 = vpop.f32.mrf.mxu1  ;;  %4469 = vmatpush2.bf16.msra.mxu1 %v5756_v7  ;;  %v2607_v21 = vadd.f32 %v2606_v58, %v2414_v12  ;;  %4277 = vmatprep.subr.bf16.mxu0 %v5722_v34  ;;  %v2416_v7 = vadd.f32 %v2415_v24, %v7302_v6  ;;  %v9190_v58 = vld [vmem:[#allocation50_spill] sm:$0xff]  ;;  %v7815_v6 = vsel %vm3509_vm4, %v2603_v14, %v3637_v50  ;;  %v5731_v24 = vld [vmem:[%s8867_s3 + $0xb4] ss:$8 sps:$4 sm:$0xff]   ;;  %vm3510_vm6 = vcmp.gt.f32.partialorder %v7786_v15, 0.0 }
 0x1ff   : > { %4470 = vmatprep.subr.bf16.mxu1 %v5761_v26  ;;  %v2419_v60 = vpop.f32.mrf.mxu0  ;;  %3110 = vmatmul.mubr.bf16.gmra.mxu0 %v9188_v32  ;;  %9191 = vst [vmem:[#allocation14_spill] sm:$0xff] %v7815_v6  ;;  %v5726_v12 = vld [vmem:[%s8867_s3 + $0xc0] ss:$8 sps:$4 sm:$0xff]   ;;  %v9202_v34 = vld [vmem:[#allocation55_spill] sm:$0xff] }
 0x200   : > { %v2612_v1 = vpop.f32.mrf.mxu1  ;;  %5261 = vmatmul.mubr.msk.bf16.gmra.mxu1 %vm1820_vm0, %v9189_v22  ;;  %vm3513_vm5 = vcmp.gt.f32.partialorder %v2607_v21, 0.0  ;;  %v3641_v45 = vmul.f32 0.2, %v2607_v21  ;;  %v2420_v26 = vadd.f32 %v2419_v60, %v7310_v28  ;;  %3119 = vmatprep.mubr.bf16.mxu0 %v9190_v58  ;;  %v2609_v23 = vadd.f32 %v2608_v2, %v2416_v7  ;;  %v5762_v50 = vld [vmem:[%s8867_s3 + $0x1c0] ss:$8 sps:$4 sm:$0xff]  }
 0x201   : > { %3312 = vmatprep.mubr.bf16.mxu1 %v9171_v62  ;;  %v2421_v42 = vpop.f32.mrf.mxu0  ;;  %4278 = vmatpush2.bf16.msra.mxu0 %v5720_v31  ;;  %v3638_v28 = vmul.f32 0.2, %v7786_v15  ;;  %v5764_v2 = vld [vmem:[%s8867_s3 + $0x1c4] ss:$8 sps:$4 sm:$0xff]   ;;  %v5729_v58 = vld [vmem:[%s8867_s3 + $0xb0] ss:$8 sps:$4 sm:$0xff]  }
 0x202   : > { %v2614_v32 = vpop.f32.mrf.mxu1  ;;  %4471 = vmatpush2.bf16.msra.mxu1 %v5759_v30  ;;  %v7824_v60 = vsel %vm3513_vm5, %v2607_v21, %v3641_v45  ;;  %v2613_v22 = vadd.f32 %v2612_v1, %v2420_v26  ;;  %v2422_v14 = vadd.f32 %v2421_v42, %v7316_v44  ;;  %4279 = vmatprep.subr.bf16.mxu0 %v5728_v33  ;;  %vm3514_vm7 = vcmp.gt.f32.partialorder %v2609_v23, 0.0 }
 0x203   : > { %9192 = vst [vmem:[#allocation15_spill] sm:$0xff] %v7824_v60  ;;  %v3642_v30 = vmul.f32 0.2, %v2609_v23  ;;  %v2423_v21 = vpop.f32.mrf.mxu0  ;;  %4472 = vmatprep.subr.bf16.mxu1 %v5764_v2 }
 0x204   : > { %v2616_v7 = vpop.f32.mrf.mxu1  ;;  %v2615_v1 = vadd.f32 %v2614_v32, %v2422_v14  ;;  %v2424_v44 = vadd.f32 %v2423_v21, %v7322_v38  ;;  %v3645_v33 = vmul.f32 0.2, %v2613_v22  ;;  %vm3517_vm8 = vcmp.gt.f32.partialorder %v2613_v22, 0.0  ;;  %v5737_v32 = vld [vmem:[%s8867_s3 + $0xa4] ss:$8 sps:$4 sm:$0xff]  }
 0x205   : > { %v2425_v45 = vpop.f32.mrf.mxu0  ;;  %4280 = vmatpush2.bf16.msra.mxu0 %v5726_v12  ;;  %v7840_v42 = vsel %vm3514_vm7, %v2609_v23, %v3642_v30  ;;  %v7848_v38 = vsel %vm3510_vm6, %v7786_v15, %v3638_v28  ;;  %v9194_v21 = vld [vmem:[#allocation51_spill] sm:$0xff]  ;;  %v9195_v23 = vld [vmem:[#allocation52_spill] sm:$0xff] }
 0x206   : > { %v2618_v26 = vpop.f32.mrf.mxu1  ;;  %4473 = vmatpush2.bf16.msra.mxu1 %v5762_v50  ;;  %v2617_v31 = vadd.f32 %v2616_v7, %v2424_v44  ;;  %4281 = vmatprep.subr.bf16.mxu0 %v5731_v24  ;;  %9193 = vst [vmem:[#allocation81_spill] sm:$0xff] %v7848_v38  ;;  %v2426_v12 = vadd.f32 %v2425_v45, %v7330_v27  ;;  %v9196_v7 = vld [vmem:[#allocation53_spill] sm:$0xff]  ;;  %vm3518_vm10 = vcmp.gt.f32.partialorder %v2615_v1, 0.0  ;;  %v9229_v38 = vld [vmem:[#allocation82_spill] sm:$0xff] }
 0x207   : > { %v2429_v14 = vpop.f32.mrf.mxu0  ;;  %3120 = vmatmul.mubr.bf16.gmra.mxu0 %v9194_v21  ;;  %v7860_v27 = vsel %vm3517_vm8, %v2613_v22, %v3645_v33  ;;  %v5735_v45 = vld [vmem:[%s8867_s3 + $0xa0] ss:$8 sps:$4 sm:$0xff]   ;;  %v5740_v21 = vld [vmem:[%s8867_s3 + $0x94] ss:$8 sps:$4 sm:$0xff]   ;;  %v5765_v22 = vld [vmem:[%s8867_s3 + $0x1b0] ss:$8 sps:$4 sm:$0xff]  }
 0x208   : > { %v2622_v2 = vpop.f32.mrf.mxu1  ;;  %5262 = vmatmul.mubr.msk.bf16.gmra.mxu1 %vm1820_vm0, %v9195_v23  ;;  %vm3521_vm9 = vcmp.gt.f32.partialorder %v2617_v31, 0.0  ;;  %v3649_v50 = vmul.f32 0.2, %v2617_v31  ;;  %v2430_v30 = vadd.f32 %v2429_v14, %v7338_v48  ;;  %3129 = vmatprep.mubr.bf16.mxu0 %v9196_v7  ;;  %9197 = vst [vmem:[#allocation16_spill] sm:$0xff] %v7860_v27  ;;  %v2619_v15 = vadd.f32 %v2618_v26, %v2426_v12  ;;  %v5767_v33 = vld [vmem:[%s8867_s3 + $0x1b4] ss:$8 sps:$4 sm:$0xff]  }
 0x209   : > { %3322 = vmatprep.mubr.bf16.mxu1 %v9171_v62  ;;  %v2431_v28 = vpop.f32.mrf.mxu0  ;;  %4282 = vmatpush2.bf16.msra.mxu0 %v5729_v58  ;;  %v3646_v48 = vmul.f32 0.2, %v2615_v1 }
 0x20a   : > { %v2624_v44 = vpop.f32.mrf.mxu1  ;;  %v7868_v14 = vsel %vm3521_vm9, %v2617_v31, %v3649_v50  ;;  %v2623_v23 = vadd.f32 %v2622_v2, %v2430_v30  ;;  %v2432_v7 = vadd.f32 %v2431_v28, %v7344_v57  ;;  %4283 = vmatprep.subr.bf16.mxu0 %v5737_v32  ;;  %vm3522_vm11 = vcmp.gt.f32.partialorder %v2619_v15, 0.0  ;;  %4474 = vmatprep.subr.bf16.mxu1 %v5767_v33  ;;  %v5738_v28 = vld [vmem:[%s8867_s3 + $0x90] ss:$8 sps:$4 sm:$0xff]  }
 0x20b   : > { %9198 = vst [vmem:[#allocation17_spill] sm:$0xff] %v7868_v14  ;;  %v3650_v58 = vmul.f32 0.2, %v2619_v15  ;;  %v2433_v31 = vpop.f32.mrf.mxu0  ;;  %4475 = vmatpush2.bf16.msra.mxu1 %v5765_v22  ;;  %v9211_v14 = vld [vmem:[#allocation60_spill] sm:$0xff] }
 0x20c   : > { %v2626_v12 = vpop.f32.mrf.mxu1  ;;  %v2625_v2 = vadd.f32 %v2624_v44, %v2432_v7  ;;  %v2434_v57 = vadd.f32 %v2433_v31, %v7350_v56  ;;  %v3653_v32 = vmul.f32 0.2, %v2623_v23  ;;  %vm3525_vm12 = vcmp.gt.f32.partialorder %v2623_v23, 0.0  ;;  %v5746_v44 = vld [vmem:[%s8867_s3 + $0x84] ss:$8 sps:$4 sm:$0xff]  }
 0x20d   : > { %v2435_v50 = vpop.f32.mrf.mxu0  ;;  %4284 = vmatpush2.bf16.msra.mxu0 %v5735_v45  ;;  %v7883_v24 = vsel %vm3522_vm11, %v2619_v15, %v3650_v58  ;;  %v7889_v56 = vsel %vm3518_vm10, %v2615_v1, %v3646_v48  ;;  %v9201_v31 = vld [vmem:[#allocation54_spill] sm:$0xff]  ;;  %v9203_v58 = vld [vmem:[#allocation56_spill] sm:$0xff]  ;;  %v9204_v1 = vld [vmem:[#allocation57_spill] sm:$0xff] }
 0x20e   : > { %v2628_v30 = vpop.f32.mrf.mxu1  ;;  %9199 = vst [vmem:[#allocation84_spill] sm:$0xff] %v7883_v24  ;;  %v2627_v26 = vadd.f32 %v2626_v12, %v2434_v57  ;;  %4285 = vmatprep.subr.bf16.mxu0 %v5740_v21  ;;  %9200 = vst [vmem:[#allocation86_spill] sm:$0xff] %v7889_v56  ;;  %v2436_v7 = vadd.f32 %v2435_v50, %v7358_v47  ;;  %v830_v47 = vsub.s32 2, %v9204_v1  ;;  %vm3526_vm14 = vcmp.gt.f32.partialorder %v2625_v2, 0.0  ;;  %v9224_v24 = vld [vmem:[#allocation75_spill] sm:$0xff] }
 0x20f   : > { %v2439_v45 = vpop.f32.mrf.mxu0  ;;  %3130 = vmatmul.mubr.bf16.gmra.mxu0 %v9201_v31  ;;  %v7902_v48 = vsel %vm3525_vm12, %v2623_v23, %v3653_v32  ;;  %v5744_v31 = vld [vmem:[%s8867_s3 + $0x80] ss:$8 sps:$4 sm:$0xff]   ;;  %v5770_v32 = vld [vmem:[%s8867_s3 + $0x1a4] ss:$8 sps:$4 sm:$0xff]  }
 0x210   : > { %v2632_v33 = vpop.f32.mrf.mxu1  ;;  %5263 = vmatmul.mubr.msk.bf16.gmra.mxu1 %vm1820_vm0, %v9202_v34  ;;  %vm3529_vm13 = vcmp.gt.f32.partialorder %v2627_v26, 0.0  ;;  %v3657_v21 = vmul.f32 0.2, %v2627_v26  ;;  %v2440_v22 = vadd.f32 %v2439_v45, %v7366_v10  ;;  %3139 = vmatprep.mubr.bf16.mxu0 %v9203_v58  ;;  %9205 = vst [vmem:[#allocation87_spill] sm:$0xff] %v7902_v48  ;;  %v2629_v12 = vadd.f32 %v2628_v30, %v2436_v7  ;;  %v5768_v23 = vld [vmem:[%s8867_s3 + $0x1a0] ss:$8 sps:$4 sm:$0xff]  }
 0x211   : > { %3332 = vmatprep.mubr.bf16.mxu1 %v9171_v62  ;;  %v2441_v57 = vpop.f32.mrf.mxu0  ;;  %v834_v34 = vsub.s32 3, %v9204_v1  ;;  %4286 = vmatpush2.bf16.msra.mxu0 %v5738_v28  ;;  %v3654_v10 = vmul.f32 0.2, %v2625_v2 }
 0x212   : > { %v2634_v50 = vpop.f32.mrf.mxu1  ;;  %v7908_v45 = vsel %vm3529_vm13, %v2627_v26, %v3657_v21  ;;  %v2633_v58 = vadd.f32 %v2632_v33, %v2440_v22  ;;  %v2442_v15 = vadd.f32 %v2441_v57, %v7369_v18  ;;  %4287 = vmatprep.subr.bf16.mxu0 %v5746_v44  ;;  %vm3530_vm15 = vcmp.gt.f32.partialorder %v2629_v12, 0.0  ;;  %v9207_v21 = vld [vmem:[#allocation103_spill] sm:$0xff]  ;;  %v5785_v44 = vld [vmem:[%s8866_s2] sm:$0xf]  ;;  %4476 = vmatprep.subr.bf16.mxu1 %v5770_v32 }
 0x213   : > { %9206 = vst [vmem:[#allocation18_spill] sm:$0xff] %v7908_v45  ;;  %v3658_v28 = vmul.f32 0.2, %v2629_v12  ;;  %v2443_v26 = vpop.f32.mrf.mxu0  ;;  %v7923_v22 = vrot.slane %v5785_v44, %v830_v47  ;;  %4477 = vmatpush2.bf16.msra.mxu1 %v5768_v23  ;;  %v7927_v45 = vrot.slane %v5785_v44, %v834_v34  ;;  %v9212_v32 = vld [vmem:[#allocation61_spill] sm:$0xff]  ;;  %v9213_v23 = vld [vmem:[#allocation62_spill] sm:$0xff] }
 0x214   : > { %v2636_v7 = vpop.f32.mrf.mxu1  ;;  %v2635_v33 = vadd.f32 %v2634_v50, %v2442_v15  ;;  %v2444_v18 = vadd.f32 %v2443_v26, %v9207_v21  ;;  %v3661_v57 = vmul.f32 0.2, %v2633_v58  ;;  %vm3533_vm1 = vcmp.gt.f32.partialorder %v2633_v58, 0.0  ;;  %v9210_v50 = vld [vmem:[#allocation104_spill] sm:$0xff] }
 0x215   : > { %v2445_v1 = vpop.f32.mrf.mxu0  ;;  %4288 = vmatpush2.bf16.msra.mxu0 %v5744_v31  ;;  %v7925_v30 = vsel %vm3530_vm15, %v2629_v12, %v3658_v28  ;;  %v7930_v15 = vsel %vm3526_vm14, %v2625_v2, %v3654_v10 }
 0x216   : > { %v2638_v27 = vpop.f32.mrf.mxu1  ;;  %9208 = vst [vmem:[#allocation19_spill] sm:$0xff] %v7925_v30  ;;  %v2637_v48 = vadd.f32 %v2636_v7, %v2444_v18  ;;  %9209 = vst [vmem:[#allocation88_spill] sm:$0xff] %v7930_v15  ;;  %v2446_v26 = vadd.f32 %v2445_v1, %v9210_v50  ;;  %v7941_v2 = vsel %vm3533_vm1, %v2633_v58, %v3661_v57  ;;  %v3662_v1 = vmul.f32 0.2, %v2635_v33 }
 0x217   : > { %v2675_v21 = vpop.f32.mrf.mxu0  ;;  %3140 = vmatmul.mubr.bf16.gmra.mxu0 %v9211_v14  ;;  %9214 = vst [vmem:[#allocation20_spill] sm:$0xff] %v7941_v2  ;;  %vm3534_vm3 = vcmp.gt.f32.partialorder %v2635_v33, 0.0 }
 0x218   : > { %v2868_v47 = vpop.f32.mrf.mxu1  ;;  %5264 = vmatmul.mubr.msk.bf16.gmra.mxu1 %vm1820_vm0, %v9212_v32  ;;  %vm3537_vm2 = vcmp.gt.f32.partialorder %v2637_v48, 0.0  ;;  %v3665_v31 = vmul.f32 0.2, %v2637_v48  ;;  %v2676_v34 = vadd.f32 %v2675_v21, %v7923_v22  ;;  %3149 = vmatprep.mubr.bf16.mxu0 %v9213_v23  ;;  %v2639_v10 = vadd.f32 %v2638_v27, %v2446_v26 }
 0x219   : > { %3342 = vmatprep.mubr.bf16.mxu1 %v9171_v62  ;;  %v2677_v28 = vpop.f32.mrf.mxu0  ;;  %v7953_v12 = vsel %vm3534_vm3, %v2635_v33, %v3662_v1  ;;  %v9218_v1 = vld [vmem:[#allocation63_spill] sm:$0xff] }
 0x21a   : > { %v2870_v14 = vpop.f32.mrf.mxu1  ;;  %v7943_v7 = vsel %vm3537_vm2, %v2637_v48, %v3665_v31  ;;  %v7945_v18 = vadd.f32 %v2868_v47, %v2676_v34  ;;  %v2678_v44 = vadd.f32 %v2677_v28, %v7927_v45  ;;  %vm3538_vm4 = vcmp.gt.f32.partialorder %v2639_v10, 0.0  ;;  %9216 = vst [vmem:[#allocation91_spill] sm:$0xff] %v7953_v12  ;;  %v5771_v34 = vld [vmem:[%s8867_s3 + $0x190] ss:$8 sps:$4 sm:$0xff]   ;;  %v5773_v28 = vld [vmem:[%s8867_s3 + $0x194] ss:$8 sps:$4 sm:$0xff]  }
 0x21b   : > { %9215 = vst [vmem:[#allocation21_spill] sm:$0xff] %v7943_v7  ;;  %v3666_v21 = vmul.f32 0.2, %v2639_v10  ;;  %v2679_v32 = vpop.f32.mrf.mxu0  ;;  %4478 = vmatprep.subr.bf16.mxu1 %v5773_v28  ;;  %v5774_v28 = vld [vmem:[%s8867_s3 + $0x180] ss:$8 sps:$4 sm:$0xff]   ;;  %v9223_v12 = vld [vmem:[#allocation71_spill] sm:$0xff] }
 0x21c   : > { %v2872_v23 = vpop.f32.mrf.mxu1  ;;  %v7950_v58 = vadd.f32 %v2870_v14, %v2678_v44  ;;  %v2680_v27 = vadd.f32 %v2679_v32, %v7923_v22  ;;  %4479 = vmatpush2.bf16.msra.mxu1 %v5771_v34 }
 0x21d   : > { %v2681_v57 = vpop.f32.mrf.mxu0  ;;  %v7955_v48 = vsel %vm3538_vm4, %v2639_v10, %v3666_v21  ;;  %v9219_v10 = vld [vmem:[#allocation64_spill] sm:$0xff] }
 0x21e   : > { %v2874_v26 = vpop.f32.mrf.mxu1  ;;  %9217 = vst [vmem:[#allocation93_spill] sm:$0xff] %v7955_v48  ;;  %v7957_v47 = vadd.f32 %v2872_v23, %v2680_v27  ;;  %v2682_v31 = vadd.f32 %v2681_v57, %v7927_v45  ;;  %v9220_v23 = vld [vmem:[#allocation65_spill] sm:$0xff] }
 0x21f   : > { %v2685_v44 = vpop.f32.mrf.mxu0  ;;  %3150 = vmatmul.mubr.bf16.gmra.mxu0 %v9218_v1 }
 0x220   : > { %v2878_v33 = vpop.f32.mrf.mxu1  ;;  %5265 = vmatmul.mubr.msk.bf16.gmra.mxu1 %vm1820_vm0, %v9219_v10  ;;  %v7971_v21 = vadd.f32 %v2874_v26, %v2682_v31  ;;  %v2686_v32 = vadd.f32 %v2685_v44, %v7923_v22  ;;  %3159 = vmatprep.mubr.bf16.mxu0 %v9220_v23  ;;  %v5776_v31 = vld [vmem:[%s8867_s3 + $0x184] ss:$8 sps:$4 sm:$0xff]   ;;  %v9221_v23 = vld [vmem:[#allocation68_spill] sm:$0xff] }
 0x221   : > { %3352 = vmatprep.mubr.bf16.mxu1 %v9171_v62  ;;  %v2687_v27 = vpop.f32.mrf.mxu0  ;;  %4480 = vmatprep.subr.bf16.mxu1 %v5776_v31 }
 0x222   : > { %v2880_v57 = vpop.f32.mrf.mxu1  ;;  %v7976_v50 = vadd.f32 %v2878_v33, %v2686_v32  ;;  %v2688_v14 = vadd.f32 %v2687_v27, %v7927_v45  ;;  %v9222_v27 = vld [vmem:[#allocation69_spill] sm:$0xff]  ;;  %4481 = vmatpush2.bf16.msra.mxu1 %v5774_v28  ;;  %v9225_v28 = vld [vmem:[#allocation76_spill] sm:$0xff] }
 0x223   : > { %v2689_v1 = vpop.f32.mrf.mxu0 }
 0x224   : > { %v2882_v2 = vpop.f32.mrf.mxu1  ;;  %v7979_v7 = vadd.f32 %v2880_v57, %v2688_v14  ;;  %v2690_v26 = vadd.f32 %v2689_v1, %v7923_v22 }
 0x225   : > { %v2691_v44 = vpop.f32.mrf.mxu0 }
 0x226   : > { %v2884_v10 = vpop.f32.mrf.mxu1  ;;  %v7988_v33 = vadd.f32 %v2882_v2, %v2690_v26  ;;  %v2692_v34 = vadd.f32 %v2691_v44, %v7927_v45 }
 0x227   : > { %v2695_v32 = vpop.f32.mrf.mxu0  ;;  %3160 = vmatmul.mubr.bf16.gmra.mxu0 %v9221_v23 }
 0x228   : > { %v2888_v14 = vpop.f32.mrf.mxu1  ;;  %5266 = vmatmul.mubr.msk.bf16.gmra.mxu1 %vm1820_vm0, %v9222_v27  ;;  %v7994_v57 = vadd.f32 %v2884_v10, %v2692_v34  ;;  %v2696_v1 = vadd.f32 %v2695_v32, %v7923_v22  ;;  %3169 = vmatprep.mubr.bf16.mxu0 %v9223_v12 }
 0x229   : > { %3362 = vmatprep.mubr.bf16.mxu1 %v9171_v62  ;;  %v2697_v2 = vpop.f32.mrf.mxu0 }
 0x22a   : > { %v2890_v26 = vpop.f32.mrf.mxu1  ;;  %v7999_v44 = vadd.f32 %v2888_v14, %v2696_v1  ;;  %v2698_v31 = vadd.f32 %v2697_v2, %v7927_v45  ;;  %v9226_v2 = vld [vmem:[#allocation78_spill] sm:$0xff] }
 0x22b   : > { %v2699_v48 = vpop.f32.mrf.mxu0 }
 0x22c   : > { %v2892_v23 = vpop.f32.mrf.mxu1  ;;  %v8002_v15 = vadd.f32 %v2890_v26, %v2698_v31  ;;  %v2700_v10 = vadd.f32 %v2699_v48, %v7923_v22 }
 0x22d   : > { %v2701_v34 = vpop.f32.mrf.mxu0 }
 0x22e   : > { %v2894_v27 = vpop.f32.mrf.mxu1  ;;  %v8005_v32 = vadd.f32 %v2892_v23, %v2700_v10  ;;  %v2702_v12 = vadd.f32 %v2701_v34, %v7927_v45 }
 0x22f   : > { %v2705_v30 = vpop.f32.mrf.mxu0  ;;  %3170 = vmatmul.mubr.bf16.gmra.mxu0 %v9224_v24 }
 0x230   : > { %v2898_v56 = vpop.f32.mrf.mxu1  ;;  %5267 = vmatmul.mubr.msk.bf16.gmra.mxu1 %vm1820_vm0, %v9225_v28  ;;  %v8011_v14 = vadd.f32 %v2894_v27, %v2702_v12  ;;  %v2706_v1 = vadd.f32 %v2705_v30, %v7923_v22  ;;  %3179 = vmatprep.mubr.bf16.mxu0 %v9226_v2 }
 0x231   : > { %3372 = vmatprep.mubr.bf16.mxu1 %v9171_v62  ;;  %v2707_v48 = vpop.f32.mrf.mxu0 }
 0x232   : > { %v2900_v26 = vpop.f32.mrf.mxu1  ;;  %v8016_v31 = vadd.f32 %v2898_v56, %v2706_v1  ;;  %v2708_v23 = vadd.f32 %v2707_v48, %v7927_v45  ;;  %v9230_v56 = vld [vmem:[#allocation83_spill] sm:$0xff] }
 0x233   : > { %v2709_v10 = vpop.f32.mrf.mxu0 }
 0x234   : > { %v2902_v34 = vpop.f32.mrf.mxu1  ;;  %v8019_v24 = vadd.f32 %v2900_v26, %v2708_v23  ;;  %v2710_v28 = vadd.f32 %v2709_v10, %v7923_v22  ;;  %v9232_v26 = vld [vmem:[#allocation85_spill] sm:$0xff] }
 0x235   : > { %v2711_v27 = vpop.f32.mrf.mxu0 }
 0x236   : > { %9227 = vst [vmem:[#allocation94_spill] sm:$0xff] %v8019_v24  ;;  %v2904_v12 = vpop.f32.mrf.mxu1  ;;  %v8022_v6 = vadd.f32 %v2902_v34, %v2710_v28  ;;  %v2712_v30 = vadd.f32 %v2711_v27, %v7927_v45  ;;  %v9238_v24 = vld [vmem:[#allocation89_spill] sm:$0xff] }
 0x237   : > { %v2715_v2 = vpop.f32.mrf.mxu0  ;;  %3180 = vmatmul.mubr.bf16.gmra.mxu0 %v9229_v38 }
 0x238   : > { %9228 = vst [vmem:[#allocation22_spill] sm:$0xff] %v8022_v6  ;;  %v2908_v60 = vpop.f32.mrf.mxu1  ;;  %5268 = vmatmul.mubr.msk.bf16.gmra.mxu1 %vm1820_vm0, %v9230_v56  ;;  %v8028_v1 = vadd.f32 %v2904_v12, %v2712_v30  ;;  %v2716_v48 = vadd.f32 %v2715_v2, %v7923_v22  ;;  %3189 = vmatprep.mubr.bf16.mxu0 %v9232_v26 }
 0x239   : > { %3382 = vmatprep.mubr.bf16.mxu1 %v9171_v62  ;;  %v2717_v23 = vpop.f32.mrf.mxu0 }
 0x23a   : > { %9231 = vst [vmem:[#allocation23_spill] sm:$0xff] %v8028_v1  ;;  %v2910_v10 = vpop.f32.mrf.mxu1  ;;  %v8033_v34 = vadd.f32 %v2908_v60, %v2716_v48  ;;  %v2718_v28 = vadd.f32 %v2717_v23, %v7927_v45  ;;  %v9239_v60 = vld [vmem:[#allocation90_spill] sm:$0xff]  ;;  %v9240_v23 = vld [vmem:[#allocation92_spill] sm:$0xff] }
 0x23b   : > { %v2719_v27 = vpop.f32.mrf.mxu0 }
 0x23c   : > { %9233 = vst [vmem:[#allocation95_spill] sm:$0xff] %v8033_v34  ;;  %v2912_v6 = vpop.f32.mrf.mxu1  ;;  %v8036_v38 = vadd.f32 %v2910_v10, %v2718_v28  ;;  %v2720_v56 = vadd.f32 %v2719_v27, %v7923_v22  ;;  %v9246_v34 = vld [vmem:[#allocation96_spill] sm:$0xff] }
 0x23d   : > { %v8039_v12 = vpop.f32.mrf.mxu0 }
 0x23e   : > { %9234 = vst [vmem:[#allocation24_spill] sm:$0xff] %v8036_v38  ;;  %9235 = vst [vmem:[#allocation25_spill] sm:$0xff] %v8039_v12  ;;  %v8041_v30 = vpop.f32.mrf.mxu1  ;;  %v8043_v2 = vadd.f32 %v2912_v6, %v2720_v56 }
 0x23f   : > { %9236 = vst [vmem:[#allocation99_spill] sm:$0xff] %v8041_v30  ;;  %v2725_v26 = vpop.f32.mrf.mxu0  ;;  %3190 = vmatmul.mubr.bf16.gmra.mxu0 %v9238_v24 }
 0x240   : > { %9237 = vst [vmem:[#allocation100_spill] sm:$0xff] %v8043_v2  ;;  %v2918_v1 = vpop.f32.mrf.mxu1  ;;  %5269 = vmatmul.mubr.msk.bf16.gmra.mxu1 %vm1820_vm0, %v9239_v60  ;;  %v2726_v48 = vadd.f32 %v2725_v26, %v7923_v22  ;;  %3199 = vmatprep.mubr.bf16.mxu0 %v9240_v23 }
 0x241   : > { %3392 = vmatprep.mubr.bf16.mxu1 %v9171_v62  ;;  %v2727_v10 = vpop.f32.mrf.mxu0 }
 0x242   : > { %v2920_v28 = vpop.f32.mrf.mxu1  ;;  %v8051_v27 = vadd.f32 %v2918_v1, %v2726_v48  ;;  %v2728_v6 = vadd.f32 %v2727_v10, %v7927_v45  ;;  %v9247_v1 = vld [vmem:[#allocation97_spill] sm:$0xff]  ;;  %v9248_v10 = vld [vmem:[#allocation98_spill] sm:$0xff] }
 0x243   : > { %v2729_v56 = vpop.f32.mrf.mxu0 }
 0x244   : > { %9241 = vst [vmem:[#allocation26_spill] sm:$0xff] %v8051_v27  ;;  %v2922_v30 = vpop.f32.mrf.mxu1  ;;  %v8054_v2 = vadd.f32 %v2920_v28, %v2728_v6  ;;  %v2730_v24 = vadd.f32 %v2729_v56, %v7923_v22  ;;  %v9265_v27 = vld [vmem:[#allocation66_spill] sm:$0xff] }
 0x245   : > { %v8057_v38 = vpop.f32.mrf.mxu0 }
 0x246   : > { %9242 = vst [vmem:[#allocation27_spill] sm:$0xff] %v8054_v2  ;;  %9243 = vst [vmem:[#allocation28_spill] sm:$0xff] %v8057_v38  ;;  %v8059_v60 = vpop.f32.mrf.mxu1  ;;  %v8061_v26 = vadd.f32 %v2922_v30, %v2730_v24  ;;  %v9254_v38 = vld [vmem:[#allocation101_spill] sm:$0xff] }
 0x247   : > { %9244 = vst [vmem:[#allocation29_spill] sm:$0xff] %v8059_v60  ;;  %v2735_v23 = vpop.f32.mrf.mxu0  ;;  %3200 = vmatmul.mubr.bf16.gmra.mxu0 %v9246_v34 }
 0x248   : > { %9245 = vst [vmem:[#allocation30_spill] sm:$0xff] %v8061_v26  ;;  %v2928_v12 = vpop.f32.mrf.mxu1  ;;  %5270 = vmatmul.mubr.msk.bf16.gmra.mxu1 %vm1820_vm0, %v9247_v1  ;;  %v2736_v48 = vadd.f32 %v2735_v23, %v7923_v22  ;;  %3209 = vmatprep.mubr.bf16.mxu0 %v9248_v10 }
 0x249   : > { %3402 = vmatprep.mubr.bf16.mxu1 %v9171_v62  ;;  %v2737_v28 = vpop.f32.mrf.mxu0 }
 0x24a   : > { %v2930_v6 = vpop.f32.mrf.mxu1  ;;  %v8069_v56 = vadd.f32 %v2928_v12, %v2736_v48  ;;  %v2738_v30 = vadd.f32 %v2737_v28, %v7927_v45  ;;  %v9255_v12 = vld [vmem:[#allocation102_spill] sm:$0xff]  ;;  %v9256_v28 = vld [vmem:[#allocation7_spill] sm:$0xff] }
 0x24b   : > { %v2739_v24 = vpop.f32.mrf.mxu0 }
 0x24c   : > { %9249 = vst [vmem:[#allocation31_spill] sm:$0xff] %v8069_v56  ;;  %v2932_v60 = vpop.f32.mrf.mxu1  ;;  %v8072_v26 = vadd.f32 %v2930_v6, %v2738_v30  ;;  %v2740_v34 = vadd.f32 %v2739_v24, %v7923_v22  ;;  %v9257_v6 = vld [vmem:[#allocation67_spill] sm:$0xff] }
 0x24d   : > { %v8075_v2 = vpop.f32.mrf.mxu0  ;;  %v9258_v30 = vpack.c.bf16 %v9256_v28, %v9257_v6 }
 0x24e   : > { %9250 = vst [vmem:[#allocation32_spill] sm:$0xff] %v8072_v26  ;;  %9251 = vst [vmem:[#allocation33_spill] sm:$0xff] %v8075_v2  ;;  %v8077_v1 = vpop.f32.mrf.mxu1  ;;  %v8079_v23 = vadd.f32 %v2932_v60, %v2740_v34 }
 0x24f   : > { %9252 = vst [vmem:[#allocation34_spill] sm:$0xff] %v8077_v1  ;;  %v2745_v10 = vpop.f32.mrf.mxu0  ;;  %3210 = vmatmul.mubr.bf16.gmra.mxu0 %v9254_v38 }
 0x250   : > { %9253 = vst [vmem:[#allocation35_spill] sm:$0xff] %v8079_v23  ;;  %v2938_v62 = vpop.f32.mrf.mxu1  ;;  %5271 = vmatmul.mubr.msk.bf16.gmra.mxu1 %vm1820_vm0, %v9255_v12  ;;  %v2746_v48 = vadd.f32 %v2745_v10, %v7923_v22  ;;  %4289 = vmatprep.mubr.bf16.mxu0 %v9258_v30  ;;  %v9264_v30 = vld [vmem:[#allocation6_spill] sm:$0xff] }
 0x251   : > { %v2747_v24 = vpop.f32.mrf.mxu0 }
 0x252   : > { %v2940_v26 = vpop.f32.mrf.mxu1  ;;  %v8088_v2 = vadd.f32 %v2938_v62, %v2746_v48  ;;  %v2748_v60 = vadd.f32 %v2747_v24, %v7927_v45  ;;  %v9266_v62 = vpack.c.bf16 %v9264_v30, %v9265_v27  ;;  %v9267_v24 = vld [vmem:[#allocation70_spill] sm:$0xff] }
 0x253   : > { %v2749_v34 = vpop.f32.mrf.mxu0 }
 0x254   : > { %9259 = vst [vmem:[#allocation36_spill] sm:$0xff] %v8088_v2  ;;  %v2942_v1 = vpop.f32.mrf.mxu1  ;;  %v8091_v23 = vadd.f32 %v2940_v26, %v2748_v60  ;;  %v2750_v38 = vadd.f32 %v2749_v34, %v7923_v22  ;;  %v9268_v2 = vld [vmem:[#allocation72_spill] sm:$0xff] }
 0x255   : > { %v8094_v56 = vpop.f32.mrf.mxu0  ;;  %v9269_v26 = vpack.c.bf16 %v9267_v24, %v9268_v2  ;;  %v9275_v24 = vld [vmem:[#allocation9_spill] sm:$0xff] }
 0x256   : > { %9260 = vst [vmem:[#allocation37_spill] sm:$0xff] %v8091_v23  ;;  %9261 = vst [vmem:[#allocation38_spill] sm:$0xff] %v8094_v56  ;;  %v8096_v12 = vpop.f32.mrf.mxu1  ;;  %v8098_v10 = vadd.f32 %v2942_v1, %v2750_v38 }
 0x257   : > { %9262 = vst [vmem:[#allocation39_spill] sm:$0xff] %v8096_v12  ;;  %v2755_v28 = vpop.f32.mrf.mxu0  ;;  %4290 = vmatmul.mubr.bf16.vlgmr.msra.gmra.mxu0 %v9266_v62 }
 0x258   : > { %9263 = vst [vmem:[#allocation40_spill] sm:$0xff] %v8098_v10  ;;  %v2948_v6 = vpop.f32.mrf.mxu1  ;;  %v2756_v48 = vadd.f32 %v2755_v28, %v7923_v22  ;;  %4299 = vmatprep.mubr.bf16.mxu0 %v9269_v26  ;;  %v9276_v26 = vld [vmem:[#allocation8_spill] sm:$0xff] }
 0x259   : > { %v2757_v60 = vpop.f32.mrf.mxu0 }
 0x25a   : > { %v2950_v34 = vpop.f32.mrf.mxu1  ;;  %v8107_v23 = vadd.f32 %v2948_v6, %v2756_v48  ;;  %v2758_v12 = vadd.f32 %v2757_v60, %v7927_v45  ;;  %v9277_v6 = vpack.c.bf16 %v9275_v24, %v9276_v26  ;;  %v9278_v60 = vld [vmem:[#allocation11_spill] sm:$0xff] }
 0x25b   : > { %v2759_v1 = vpop.f32.mrf.mxu0 }
 0x25c   : > { %9270 = vst [vmem:[#allocation41_spill] sm:$0xff] %v8107_v23  ;;  %v2952_v38 = vpop.f32.mrf.mxu1  ;;  %v8110_v10 = vadd.f32 %v2950_v34, %v2758_v12  ;;  %v2760_v56 = vadd.f32 %v2759_v1, %v7923_v22  ;;  %v9279_v23 = vld [vmem:[#allocation74_spill] sm:$0xff] }
 0x25d   : > { %v8113_v27 = vpop.f32.mrf.mxu0  ;;  %v9280_v12 = vpack.c.bf16 %v9278_v60, %v9279_v23  ;;  %v9285_v60 = vld [vmem:[#allocation10_spill] sm:$0xff] }
 0x25e   : > { %9271 = vst [vmem:[#allocation42_spill] sm:$0xff] %v8110_v10  ;;  %9272 = vst [vmem:[#allocation43_spill] sm:$0xff] %v8113_v27  ;;  %v8115_v30 = vpop.f32.mrf.mxu1  ;;  %v8117_v28 = vadd.f32 %v2952_v38, %v2760_v56 }
 0x25f   : > { %9273 = vst [vmem:[#allocation44_spill] sm:$0xff] %v8115_v30  ;;  %v2765_v2 = vpop.f32.mrf.mxu0  ;;  %4300 = vmatmul.mubr.bf16.gmra.mxu0 %v9277_v6 }
 0x260   : > { %9274 = vst [vmem:[#allocation45_spill] sm:$0xff] %v8117_v28  ;;  %v2958_v62 = vpop.f32.mrf.mxu1  ;;  %v2766_v48 = vadd.f32 %v2765_v2, %v7923_v22  ;;  %4309 = vmatprep.mubr.bf16.mxu0 %v9280_v12  ;;  %v9286_v12 = vld [vmem:[#allocation73_spill] sm:$0xff] }
 0x261   : > { %v2767_v34 = vpop.f32.mrf.mxu0 }
 0x262   : > { %v2960_v1 = vpop.f32.mrf.mxu1  ;;  %v8126_v10 = vadd.f32 %v2958_v62, %v2766_v48  ;;  %v2768_v30 = vadd.f32 %v2767_v34, %v7927_v45  ;;  %v9287_v62 = vpack.c.bf16 %v9285_v60, %v9286_v12  ;;  %v9288_v34 = vld [vmem:[#allocation77_spill] sm:$0xff] }
 0x263   : > { %v2769_v56 = vpop.f32.mrf.mxu0 }
 0x264   : > { %v2962_v38 = vpop.f32.mrf.mxu1  ;;  %v8129_v28 = vadd.f32 %v2960_v1, %v2768_v30  ;;  %v2770_v27 = vadd.f32 %v2769_v56, %v7923_v22  ;;  %v9289_v30 = vpack.c.bf16 %v7464_v49, %v9288_v34  ;;  %v9293_v34 = vld [vmem:[#allocation13_spill] sm:$0xff] }
 0x265   : > { %v8132_v24 = vpop.f32.mrf.mxu0 }
 0x266   : > { %9281 = vst [vmem:[#allocation46_spill] sm:$0xff] %v8129_v28  ;;  %9282 = vst [vmem:[#allocation47_spill] sm:$0xff] %v8132_v24  ;;  %v8134_v26 = vpop.f32.mrf.mxu1  ;;  %v8136_v2 = vadd.f32 %v2962_v38, %v2770_v27 }
 0x267   : > { %9283 = vst [vmem:[#allocation48_spill] sm:$0xff] %v8134_v26  ;;  %v2775_v23 = vpop.f32.mrf.mxu0  ;;  %4310 = vmatmul.mubr.bf16.gmra.mxu0 %v9287_v62 }
 0x268   : > { %9284 = vst [vmem:[#allocation49_spill] sm:$0xff] %v8136_v2  ;;  %v2968_v6 = vpop.f32.mrf.mxu1  ;;  %v2776_v48 = vadd.f32 %v2775_v23, %v7923_v22  ;;  %4319 = vmatprep.mubr.bf16.mxu0 %v9289_v30  ;;  %v9294_v30 = vld [vmem:[#allocation12_spill] sm:$0xff] }
 0x269   : > { %v2777_v1 = vpop.f32.mrf.mxu0 }
 0x26a   : > { %v2970_v56 = vpop.f32.mrf.mxu1  ;;  %v8145_v28 = vadd.f32 %v2968_v6, %v2776_v48  ;;  %v2778_v26 = vadd.f32 %v2777_v1, %v7927_v45  ;;  %v9295_v6 = vpack.c.bf16 %v9293_v34, %v9294_v30 }
 0x26b   : > { %v2779_v27 = vpop.f32.mrf.mxu0 }
 0x26c   : > { %v2972_v38 = vpop.f32.mrf.mxu1  ;;  %v8148_v2 = vadd.f32 %v2970_v56, %v2778_v26  ;;  %v2780_v24 = vadd.f32 %v2779_v27, %v7923_v22  ;;  %v9296_v26 = vpack.c.bf16 %v7484_v46, %v7486_v17 }
 0x26d   : > { %v8151_v60 = vpop.f32.mrf.mxu0 }
 0x26e   : > { %9290 = vst [vmem:[#allocation50_spill] sm:$0xff] %v8148_v2  ;;  %v8153_v12 = vpop.f32.mrf.mxu1  ;;  %v8155_v23 = vadd.f32 %v2972_v38, %v2780_v24 }
 0x26f   : > { %9291 = vst [vmem:[#allocation51_spill] sm:$0xff] %v8153_v12  ;;  %v2785_v49 = vpop.f32.mrf.mxu0  ;;  %4320 = vmatmul.mubr.bf16.gmra.mxu0 %v9295_v6  ;;  %v9299_v6 = vld [vmem:[#allocation79_spill] sm:$0xff] }
 0x270   : > { %9292 = vst [vmem:[#allocation52_spill] sm:$0xff] %v8155_v23  ;;  %v2978_v62 = vpop.f32.mrf.mxu1  ;;  %v2786_v48 = vadd.f32 %v2785_v49, %v7923_v22  ;;  %4329 = vmatprep.mubr.bf16.mxu0 %v9296_v26 }
 0x271   : > { %v2787_v1 = vpop.f32.mrf.mxu0 }
 0x272   : > { %v2980_v56 = vpop.f32.mrf.mxu1  ;;  %v8164_v27 = vadd.f32 %v2978_v62, %v2786_v48  ;;  %v2788_v12 = vadd.f32 %v2787_v1, %v7927_v45  ;;  %v9300_v62 = vpack.c.bf16 %v7478_v29, %v9299_v6 }
 0x273   : > { %v2789_v24 = vpop.f32.mrf.mxu0 }
 0x274   : > { %v2982_v38 = vpop.f32.mrf.mxu1  ;;  %v8167_v23 = vadd.f32 %v2980_v56, %v2788_v12  ;;  %v2790_v2 = vadd.f32 %v2789_v24, %v7923_v22  ;;  %v9301_v12 = vpack.c.bf16 %v7504_v3, %v7506_v5 }
 0x275   : > { %v8170_v34 = vpop.f32.mrf.mxu0 }
 0x276   : > { %v8172_v30 = vpop.f32.mrf.mxu1  ;;  %v8174_v49 = vadd.f32 %v2982_v38, %v2790_v2 }
 0x277   : > { %9297 = vst [vmem:[#allocation53_spill] sm:$0xff] %v8172_v30  ;;  %v2795_v46 = vpop.f32.mrf.mxu0  ;;  %4330 = vmatmul.mubr.bf16.gmra.mxu0 %v9300_v62 }
 0x278   : > { %9298 = vst [vmem:[#allocation54_spill] sm:$0xff] %v8174_v49  ;;  %v2988_v17 = vpop.f32.mrf.mxu1  ;;  %v2796_v48 = vadd.f32 %v2795_v46, %v7923_v22  ;;  %4339 = vmatprep.mubr.bf16.mxu0 %v9301_v12 }
 0x279   : > { %v2797_v26 = vpop.f32.mrf.mxu0 }
 0x27a   : > { %v2990_v1 = vpop.f32.mrf.mxu1  ;;  %v8183_v56 = vadd.f32 %v2988_v17, %v2796_v48  ;;  %v2798_v24 = vadd.f32 %v2797_v26, %v7927_v45  ;;  %v9303_v17 = vpack.c.bf16 %v7498_v8, %v7496_v41  ;;  %v9304_v48 = vpack.c.bf16 %v7532_v39, %v7541_v9 }
 0x27b   : > { %v2799_v2 = vpop.f32.mrf.mxu0 }
 0x27c   : > { %v2992_v38 = vpop.f32.mrf.mxu1  ;;  %v8186_v30 = vadd.f32 %v2990_v1, %v2798_v24  ;;  %v2800_v49 = vadd.f32 %v2799_v2, %v7923_v22 }
 0x27d   : > { %v8189_v29 = vpop.f32.mrf.mxu0 }
 0x27e   : > { %v8191_v6 = vpop.f32.mrf.mxu1  ;;  %v8193_v46 = vadd.f32 %v2992_v38, %v2800_v49 }
 0x27f   : > { %9302 = vst [vmem:[#allocation55_spill] sm:$0xff] %v8191_v6  ;;  %v2805_v3 = vpop.f32.mrf.mxu0  ;;  %4340 = vmatmul.mubr.bf16.gmra.mxu0 %v9303_v17  ;;  %v9307_v17 = vld [vmem:[#allocation80_spill] sm:$0xff] }
 0x280   : > { %v2998_v5 = vpop.f32.mrf.mxu1  ;;  %v2806_v62 = vadd.f32 %v2805_v3, %v7923_v22  ;;  %4349 = vmatprep.mubr.bf16.mxu0 %v9304_v48  ;;  %v9309_v48 = vpack.c.bf16 %v7583_v11, %v7594_v19 }
 0x281   : > { %v2807_v12 = vpop.f32.mrf.mxu0 }
 0x282   : > { %v3000_v26 = vpop.f32.mrf.mxu1  ;;  %v8202_v1 = vadd.f32 %v2998_v5, %v2806_v62  ;;  %v2808_v24 = vadd.f32 %v2807_v12, %v7927_v45  ;;  %v9308_v5 = vpack.c.bf16 %v7518_v61, %v9307_v17 }
 0x283   : > { %v2809_v49 = vpop.f32.mrf.mxu0 }
 0x284   : > { %v3002_v2 = vpop.f32.mrf.mxu1  ;;  %v8205_v38 = vadd.f32 %v3000_v26, %v2808_v24  ;;  %v2810_v6 = vadd.f32 %v2809_v49, %v7923_v22 }
 0x285   : > { %v8208_v41 = vpop.f32.mrf.mxu0 }
 0x286   : > { %v8210_v8 = vpop.f32.mrf.mxu1  ;;  %v8212_v3 = vadd.f32 %v3002_v2, %v2810_v6 }
 0x287   : > { %9305 = vst [vmem:[#allocation56_spill] sm:$0xff] %v8210_v8  ;;  %v2815_v39 = vpop.f32.mrf.mxu0  ;;  %4350 = vmatmul.mubr.bf16.gmra.mxu0 %v9308_v5 }
 0x288   : > { %9306 = vst [vmem:[#allocation103_spill] sm:$0xff] %v8212_v3  ;;  %v3008_v9 = vpop.f32.mrf.mxu1  ;;  %v2816_v62 = vadd.f32 %v2815_v39, %v7923_v22  ;;  %4359 = vmatprep.mubr.bf16.mxu0 %v9309_v48 }
 0x289   : > { %v2817_v12 = vpop.f32.mrf.mxu0 }
 0x28a   : > { %v3010_v26 = vpop.f32.mrf.mxu1  ;;  %v8221_v24 = vadd.f32 %v3008_v9, %v2816_v62  ;;  %v2818_v49 = vadd.f32 %v2817_v12, %v7927_v45  ;;  %v9311_v9 = vpack.c.bf16 %v7562_v4, %v7553_v20  ;;  %v9312_v62 = vpack.c.bf16 %v7636_v35, %v7647_v54 }
 0x28b   : > { %v2819_v6 = vpop.f32.mrf.mxu0 }
 0x28c   : > { %v3012_v2 = vpop.f32.mrf.mxu1  ;;  %v8224_v8 = vadd.f32 %v3010_v26, %v2818_v49  ;;  %v2820_v3 = vadd.f32 %v2819_v6, %v7923_v22 }
 0x28d   : > { %v8227_v61 = vpop.f32.mrf.mxu0 }
 0x28e   : > { %v8229_v17 = vpop.f32.mrf.mxu1  ;;  %v8231_v39 = vadd.f32 %v3012_v2, %v2820_v3 }
 0x28f   : > { %9310 = vst [vmem:[#allocation104_spill] sm:$0xff] %v8229_v17  ;;  %v2825_v11 = vpop.f32.mrf.mxu0  ;;  %4360 = vmatmul.mubr.bf16.gmra.mxu0 %v9311_v9 }
 0x290   : > { %v3018_v19 = vpop.f32.mrf.mxu1  ;;  %v2826_v5 = vadd.f32 %v2825_v11, %v7923_v22  ;;  %4369 = vmatprep.mubr.bf16.mxu0 %v9312_v62 }
 0x291   : > { %v2827_v48 = vpop.f32.mrf.mxu0 }
 0x292   : > { %v3020_v12 = vpop.f32.mrf.mxu1  ;;  %v8240_v26 = vadd.f32 %v3018_v19, %v2826_v5  ;;  %v2828_v49 = vadd.f32 %v2827_v48, %v7927_v45  ;;  %v9315_v19 = vpack.c.bf16 %v7615_v59, %v7606_v16  ;;  %v9316_v5 = vpack.c.bf16 %v7689_v0, %v7700_v37 }
 0x293   : > { %v2829_v3 = vpop.f32.mrf.mxu0  ;;  %v9317_v37 = vpack.c.bf16 %v7668_v13, %v7659_v55 }
 0x294   : > { %v3022_v6 = vpop.f32.mrf.mxu1  ;;  %v8243_v2 = vadd.f32 %v3020_v12, %v2828_v49  ;;  %v2830_v17 = vadd.f32 %v2829_v3, %v7923_v22 }
 0x295   : > { %v8246_v20 = vpop.f32.mrf.mxu0 }
 0x296   : > { %v8248_v4 = vpop.f32.mrf.mxu1  ;;  %v8250_v11 = vadd.f32 %v3022_v6, %v2830_v17 }
 0x297   : > { %9313 = vst [vmem:[#allocation60_spill] sm:$0xff] %v8248_v4  ;;  %v3061_v35 = vpop.f32.mrf.mxu0  ;;  %4370 = vmatmul.mubr.bf16.gmra.mxu0 %v9315_v19 }
 0x298   : > { %9314 = vst [vmem:[#allocation61_spill] sm:$0xff] %v8250_v11  ;;  %v3254_v54 = vpop.f32.mrf.mxu1  ;;  %v3062_v9 = vadd.f32 %v3061_v35, %v7945_v18  ;;  %4379 = vmatprep.mubr.bf16.mxu0 %v9316_v5 }
 0x299   : > { %v3063_v62 = vpop.f32.mrf.mxu0 }
 0x29a   : > { %v3256_v22 = vpop.f32.mrf.mxu1  ;;  %v3255_v48 = vadd.f32 %v3254_v54, %v3062_v9  ;;  %v3064_v12 = vadd.f32 %v3063_v62, %v7950_v58 }
 0x29b   : > { %v3065_v49 = vpop.f32.mrf.mxu0 }
 0x29c   : > { %v3258_v17 = vpop.f32.mrf.mxu1  ;;  %v3066_v3 = vadd.f32 %v3065_v49, %v7957_v47  ;;  %v3543_v6 = vmul.f32 0.2, %v3255_v48  ;;  %vm3415_vm0 = vcmp.gt.f32.partialorder %v3255_v48, 0.0  ;;  %v3257_v16 = vadd.f32 %v3256_v22, %v3064_v12 }
 0x29d   : > { %v3067_v4 = vpop.f32.mrf.mxu0  ;;  %v9318_v47 = vpack.c.bf16 %v7742_v43, %v7753_v53 }
 0x29e   : > { %v3260_v11 = vpop.f32.mrf.mxu1  ;;  %v3259_v59 = vadd.f32 %v3258_v17, %v3066_v3  ;;  %v3068_v18 = vadd.f32 %v3067_v4, %v7971_v21  ;;  %v3671_v19 = vsel %vm3415_vm0, %v3255_v48, %v3543_v6  ;;  %v3544_v22 = vmul.f32 0.2, %v3257_v16 }
 0x29f   : > { %v3071_v35 = vpop.f32.mrf.mxu0  ;;  %4380 = vmatmul.mubr.bf16.gmra.mxu0 %v9317_v37  ;;  %vm3416_vm6 = vcmp.gt.f32.partialorder %v3257_v16, 0.0 }
 0x2a0   : > { %v3264_v0 = vpop.f32.mrf.mxu1  ;;  %vm3419_vm5 = vcmp.gt.f32.partialorder %v3259_v59, 0.0  ;;  %v3547_v58 = vmul.f32 0.2, %v3259_v59  ;;  %v3072_v54 = vadd.f32 %v3071_v35, %v7976_v50  ;;  %4389 = vmatprep.mubr.bf16.mxu0 %v9318_v47  ;;  %v3261_v9 = vadd.f32 %v3260_v11, %v3068_v18 }
 0x2a1   : > { %v3073_v5 = vpop.f32.mrf.mxu0  ;;  %v3672_v18 = vsel %vm3416_vm6, %v3257_v16, %v3544_v22 }
 0x2a2   : > { %v3266_v62 = vpop.f32.mrf.mxu1  ;;  %v3675_v21 = vsel %vm3419_vm5, %v3259_v59, %v3547_v58  ;;  %v3265_v4 = vadd.f32 %v3264_v0, %v3072_v54  ;;  %v3074_v12 = vadd.f32 %v3073_v5, %v7979_v7  ;;  %vm3420_vm7 = vcmp.gt.f32.partialorder %v3261_v9, 0.0 }
 0x2a3   : > { %v3799_v55 = vpack.c.bf16 %v3675_v21, %v3671_v19  ;;  %v3548_v13 = vmul.f32 0.2, %v3261_v9  ;;  %v3075_v49 = vpop.f32.mrf.mxu0  ;;  %v9319_v0 = vpack.c.bf16 %v7721_v40, %v7712_v36  ;;  %v9320_v54 = vpack.c.bf16 %v7795_v25, %v7803_v51 }
 0x2a4   : > { %v3268_v17 = vpop.f32.mrf.mxu1  ;;  %v3076_v50 = vadd.f32 %v3075_v49, %v7988_v33  ;;  %v3551_v3 = vmul.f32 0.2, %v3265_v4  ;;  %vm3423_vm8 = vcmp.gt.f32.partialorder %v3265_v4, 0.0  ;;  %v3267_v11 = vadd.f32 %v3266_v62, %v3074_v12 }
 0x2a5   : > { %v3077_v43 = vpop.f32.mrf.mxu0  ;;  %v3676_v48 = vsel %vm3420_vm7, %v3261_v9, %v3548_v13 }
 0x2a6   : > { %v3270_v53 = vpop.f32.mrf.mxu1  ;;  %v3269_v6 = vadd.f32 %v3268_v17, %v3076_v50  ;;  %v3078_v59 = vadd.f32 %v3077_v43, %v7994_v57  ;;  %v3800_v37 = vpack.c.bf16 %v3676_v48, %v3672_v18  ;;  %v3679_v47 = vsel %vm3423_vm8, %v3265_v4, %v3551_v3 }
 0x2a7   : > { %v3081_v35 = vpop.f32.mrf.mxu0  ;;  %4390 = vmatmul.mubr.bf16.gmra.mxu0 %v9319_v0  ;;  %v3552_v9 = vmul.f32 0.2, %v3267_v11  ;;  %vm3424_vm10 = vcmp.gt.f32.partialorder %v3267_v11, 0.0  ;;  %v9321_v43 = vpack.c.bf16 %v7774_v63, %v7765_v52  ;;  %v9324_v52 = vld [vmem:[#allocation94_spill] sm:$0xff] }
 0x2a8   : > { %v3274_v7 = vpop.f32.mrf.mxu1  ;;  %vm3427_vm9 = vcmp.gt.f32.partialorder %v3269_v6, 0.0  ;;  %v3555_v58 = vmul.f32 0.2, %v3269_v6  ;;  %v3082_v33 = vadd.f32 %v3081_v35, %v7999_v44  ;;  %4399 = vmatprep.mubr.bf16.mxu0 %v9320_v54  ;;  %v3271_v19 = vadd.f32 %v3270_v53, %v3078_v59  ;;  %4482 = vmatprep.mubr.bf16.mxu1 %v3800_v37 }
 0x2a9   : > { %v3083_v16 = vpop.f32.mrf.mxu0  ;;  %4483 = vmatmul.mubr.bf16.vlgmr.msra.gmra.mxu1 %v3799_v55  ;;  %v3680_v50 = vsel %vm3424_vm10, %v3267_v11, %v3552_v9 }
 0x2aa   : > { %v3276_v57 = vpop.f32.mrf.mxu1  ;;  %v3683_v5 = vsel %vm3427_vm9, %v3269_v6, %v3555_v58  ;;  %v3275_v62 = vadd.f32 %v3274_v7, %v3082_v33  ;;  %v3084_v36 = vadd.f32 %v3083_v16, %v8002_v15  ;;  %vm3428_vm11 = vcmp.gt.f32.partialorder %v3271_v19, 0.0  ;;  %v9322_v6 = vld [vmem:[#allocation81_spill] sm:$0xff] }
 0x2ab   : > { %v3803_v40 = vpack.c.bf16 %v3683_v5, %v3679_v47  ;;  %v3556_v22 = vmul.f32 0.2, %v3271_v19  ;;  %v3085_v44 = vpop.f32.mrf.mxu0  ;;  %v9323_v18 = vpack.c.bf16 %v7840_v42, %v9322_v6  ;;  %v9325_v47 = vld [vmem:[#allocation22_spill] sm:$0xff] }
 0x2ac   : > { %v3278_v21 = vpop.f32.mrf.mxu1  ;;  %v3086_v25 = vadd.f32 %v3085_v44, %v8005_v32  ;;  %v3559_v51 = vmul.f32 0.2, %v3275_v62  ;;  %vm3431_vm12 = vcmp.gt.f32.partialorder %v3275_v62, 0.0  ;;  %v3277_v49 = vadd.f32 %v3276_v57, %v3084_v36 }
 0x2ad   : > { %v3087_v4 = vpop.f32.mrf.mxu0  ;;  %v3684_v13 = vsel %vm3428_vm11, %v3271_v19, %v3556_v22  ;;  %v9326_v22 = vld [vmem:[#allocation23_spill] sm:$0xff] }
 0x2ae   : > { %v3280_v12 = vpop.f32.mrf.mxu1  ;;  %v3279_v17 = vadd.f32 %v3278_v21, %v3086_v25  ;;  %v3088_v55 = vadd.f32 %v3087_v4, %v8011_v14  ;;  %v3804_v53 = vpack.c.bf16 %v3684_v13, %v3680_v50  ;;  %v3687_v59 = vsel %vm3431_vm12, %v3275_v62, %v3559_v51  ;;  %v9327_v25 = vld [vmem:[#allocation15_spill] sm:$0xff]  ;;  %v9328_v51 = vld [vmem:[#allocation14_spill] sm:$0xff] }
 0x2af   : > { %v3091_v3 = vpop.f32.mrf.mxu0  ;;  %4400 = vmatmul.mubr.bf16.gmra.mxu0 %v9321_v43  ;;  %v3560_v7 = vmul.f32 0.2, %v3277_v49  ;;  %vm3432_vm14 = vcmp.gt.f32.partialorder %v3277_v49, 0.0  ;;  %v9329_v4 = vpack.c.bf16 %v9327_v25, %v9328_v51  ;;  %v9334_v43 = vld [vmem:[#allocation25_spill] sm:$0xff] }
 0x2b0   : > { %v3284_v15 = vpop.f32.mrf.mxu1  ;;  %vm3435_vm13 = vcmp.gt.f32.partialorder %v3279_v17, 0.0  ;;  %v3563_v48 = vmul.f32 0.2, %v3279_v17  ;;  %v3092_v32 = vadd.f32 %v3091_v3, %v8016_v31  ;;  %4409 = vmatprep.mubr.bf16.mxu0 %v9323_v18  ;;  %v3281_v35 = vadd.f32 %v3280_v12, %v3088_v55  ;;  %4492 = vmatprep.mubr.bf16.mxu1 %v3804_v53  ;;  %v9331_v55 = vld [vmem:[#allocation84_spill] sm:$0xff]  ;;  %v9332_v3 = vld [vmem:[#allocation86_spill] sm:$0xff] }
 0x2b1   : > { %v3093_v11 = vpop.f32.mrf.mxu0  ;;  %4493 = vmatmul.mubr.bf16.gmra.mxu1 %v3803_v40  ;;  %v3688_v36 = vsel %vm3432_vm14, %v3277_v49, %v3560_v7  ;;  %v2722_v49 = vadd.f32 %v9334_v43, %v7927_v45 }
 0x2b2   : > { %v3286_v14 = vpop.f32.mrf.mxu1  ;;  %v3691_v0 = vsel %vm3435_vm13, %v3279_v17, %v3563_v48  ;;  %v3285_v37 = vadd.f32 %v3284_v15, %v3092_v32  ;;  %v3094_v63 = vadd.f32 %v3093_v11, %v9324_v52  ;;  %vm3436_vm15 = vcmp.gt.f32.partialorder %v3281_v35, 0.0  ;;  %v9330_v17 = vld [vmem:[#allocation95_spill] sm:$0xff]  ;;  %v9335_v11 = vld [vmem:[#allocation24_spill] sm:$0xff] }
 0x2b3   : > { %v3807_v58 = vpack.c.bf16 %v3691_v0, %v3687_v59  ;;  %v3564_v33 = vmul.f32 0.2, %v3281_v35  ;;  %v3095_v31 = vpop.f32.mrf.mxu0  ;;  %v9333_v15 = vpack.c.bf16 %v9331_v55, %v9332_v3  ;;  %v9345_v55 = vld [vmem:[#allocation28_spill] sm:$0xff] }
 0x2b4   : > { %v3288_v54 = vpop.f32.mrf.mxu1  ;;  %v3096_v42 = vadd.f32 %v3095_v31, %v9325_v47  ;;  %v3567_v19 = vmul.f32 0.2, %v3285_v37  ;;  %vm3439_vm1 = vcmp.gt.f32.partialorder %v3285_v37, 0.0  ;;  %v3287_v5 = vadd.f32 %v3286_v14, %v3094_v63 }
 0x2b5   : > { %v3097_v16 = vpop.f32.mrf.mxu0  ;;  %v3692_v9 = vsel %vm3436_vm15, %v3281_v35, %v3564_v33  ;;  %v9336_v33 = vld [vmem:[#allocation100_spill] sm:$0xff]  ;;  %v2732_v3 = vadd.f32 %v9345_v55, %v7927_v45 }
 0x2b6   : > { %v3290_v57 = vpop.f32.mrf.mxu1  ;;  %v3289_v62 = vadd.f32 %v3288_v54, %v3096_v42  ;;  %v3098_v40 = vadd.f32 %v3097_v16, %v9326_v22  ;;  %v3808_v12 = vpack.c.bf16 %v3692_v9, %v3688_v36  ;;  %v3695_v53 = vsel %vm3439_vm1, %v3285_v37, %v3567_v19  ;;  %v9337_v54 = vld [vmem:[#allocation99_spill] sm:$0xff] }
 0x2b7   : > { %v3101_v44 = vpop.f32.mrf.mxu0  ;;  %4410 = vmatmul.mubr.bf16.gmra.mxu0 %v9329_v4  ;;  %v3568_v18 = vmul.f32 0.2, %v3287_v5  ;;  %vm3440_vm3 = vcmp.gt.f32.partialorder %v3287_v5, 0.0  ;;  %v2915_v37 = vadd.f32 %v9337_v54, %v2722_v49  ;;  %v9341_v4 = vld [vmem:[#allocation26_spill] sm:$0xff] }
 0x2b8   : > { %v3294_v21 = vpop.f32.mrf.mxu1  ;;  %vm3443_vm2 = vcmp.gt.f32.partialorder %v3289_v62, 0.0  ;;  %v3571_v13 = vmul.f32 0.2, %v3289_v62  ;;  %v3102_v50 = vadd.f32 %v3101_v44, %v9330_v17  ;;  %4419 = vmatprep.mubr.bf16.mxu0 %v9333_v15  ;;  %v3291_v48 = vadd.f32 %v3290_v57, %v3098_v40  ;;  %4502 = vmatprep.mubr.bf16.mxu1 %v3808_v12  ;;  %v9338_v40 = vld [vmem:[#allocation17_spill] sm:$0xff]  ;;  %v9339_v44 = vld [vmem:[#allocation16_spill] sm:$0xff] }
 0x2b9   : > { %v3103_v32 = vpop.f32.mrf.mxu0  ;;  %4503 = vmatmul.mubr.bf16.gmra.mxu1 %v3807_v58  ;;  %v3696_v58 = vsel %vm3440_vm3, %v3287_v5, %v3568_v18  ;;  %v9343_v17 = vld [vmem:[#allocation88_spill] sm:$0xff] }
 0x2ba   : > { %v3296_v6 = vpop.f32.mrf.mxu1  ;;  %v3699_v59 = vsel %vm3443_vm2, %v3289_v62, %v3571_v13  ;;  %v3295_v35 = vadd.f32 %v3294_v21, %v3102_v50  ;;  %v3104_v14 = vadd.f32 %v3103_v32, %v9335_v11  ;;  %vm3444_vm4 = vcmp.gt.f32.partialorder %v3291_v48, 0.0  ;;  %v9342_v13 = vld [vmem:[#allocation19_spill] sm:$0xff] }
 0x2bb   : > { %v3811_v7 = vpack.c.bf16 %v3699_v59, %v3695_v53  ;;  %v3572_v0 = vmul.f32 0.2, %v3291_v48  ;;  %v3105_v52 = vpop.f32.mrf.mxu0  ;;  %v9340_v21 = vpack.c.bf16 %v9338_v40, %v9339_v44  ;;  %v9344_v50 = vpack.c.bf16 %v9342_v13, %v9343_v17  ;;  %v9356_v13 = vld [vmem:[#allocation33_spill] sm:$0xff] }
 0x2bc   : > { %v3298_v63 = vpop.f32.mrf.mxu1  ;;  %v3106_v31 = vadd.f32 %v3105_v52, %v9336_v33  ;;  %v3575_v47 = vmul.f32 0.2, %v3295_v35  ;;  %vm3447_vm0 = vcmp.gt.f32.partialorder %v3295_v35, 0.0  ;;  %v3297_v57 = vadd.f32 %v3296_v6, %v3104_v14  ;;  %v9346_v6 = vld [vmem:[#allocation27_spill] sm:$0xff]  ;;  %v9347_v52 = vld [vmem:[#allocation30_spill] sm:$0xff]  ;;  %v9348_v33 = vld [vmem:[#allocation29_spill] sm:$0xff] }
 0x2bd   : > { %v3107_v42 = vpop.f32.mrf.mxu0  ;;  %v3700_v16 = vsel %vm3444_vm4, %v3291_v48, %v3572_v0  ;;  %v2742_v17 = vadd.f32 %v9356_v13, %v7927_v45 }
 0x2be   : > { %v3300_v19 = vpop.f32.mrf.mxu1  ;;  %v3299_v9 = vadd.f32 %v3298_v63, %v3106_v31  ;;  %v3108_v62 = vadd.f32 %v3107_v42, %v2915_v37  ;;  %v3812_v25 = vpack.c.bf16 %v3700_v16, %v3696_v58  ;;  %v3703_v5 = vsel %vm3447_vm0, %v3295_v35, %v3575_v47 }
 0x2bf   : > { %v3111_v36 = vpop.f32.mrf.mxu0  ;;  %4420 = vmatmul.mubr.bf16.gmra.mxu0 %v9340_v21  ;;  %v3576_v53 = vmul.f32 0.2, %v3297_v57  ;;  %vm3448_vm6 = vcmp.gt.f32.partialorder %v3297_v57, 0.0  ;;  %v2925_v35 = vadd.f32 %v9348_v33, %v2732_v3  ;;  %v9352_v21 = vld [vmem:[#allocation31_spill] sm:$0xff] }
 0x2c0   : > { %v3304_v22 = vpop.f32.mrf.mxu1  ;;  %vm3451_vm5 = vcmp.gt.f32.partialorder %v3299_v9, 0.0  ;;  %v3579_v51 = vmul.f32 0.2, %v3299_v9  ;;  %v3112_v12 = vadd.f32 %v3111_v36, %v9341_v4  ;;  %4429 = vmatprep.mubr.bf16.mxu0 %v9344_v50  ;;  %v3301_v15 = vadd.f32 %v3300_v19, %v3108_v62  ;;  %4512 = vmatprep.mubr.bf16.mxu1 %v3812_v25  ;;  %v9349_v62 = vld [vmem:[#allocation18_spill] sm:$0xff]  ;;  %v9350_v36 = vld [vmem:[#allocation87_spill] sm:$0xff] }
 0x2c1   : > { %v3113_v43 = vpop.f32.mrf.mxu0  ;;  %4513 = vmatmul.mubr.bf16.gmra.mxu1 %v3811_v7  ;;  %v3704_v7 = vsel %vm3448_vm6, %v3297_v57, %v3576_v53  ;;  %v9354_v4 = vld [vmem:[#allocation91_spill] sm:$0xff] }
 0x2c2   : > { %v3306_v49 = vpop.f32.mrf.mxu1  ;;  %v3707_v48 = vsel %vm3451_vm5, %v3299_v9, %v3579_v51  ;;  %v3305_v32 = vadd.f32 %v3304_v22, %v3112_v12  ;;  %v3114_v18 = vadd.f32 %v3113_v43, %v9346_v6  ;;  %vm3452_vm7 = vcmp.gt.f32.partialorder %v3301_v15, 0.0  ;;  %v9353_v51 = vld [vmem:[#allocation93_spill] sm:$0xff] }
 0x2c3   : > { %v3815_v59 = vpack.c.bf16 %v3707_v48, %v3703_v5  ;;  %v3580_v11 = vmul.f32 0.2, %v3301_v15  ;;  %v3115_v14 = vpop.f32.mrf.mxu0  ;;  %v9351_v22 = vpack.c.bf16 %v9349_v62, %v9350_v36  ;;  %v9355_v12 = vpack.c.bf16 %v9353_v51, %v9354_v4 }
 0x2c4   : > { %v3308_v0 = vpop.f32.mrf.mxu1  ;;  %v3116_v63 = vadd.f32 %v3115_v14, %v9347_v52  ;;  %v3583_v31 = vmul.f32 0.2, %v3305_v32  ;;  %vm3455_vm8 = vcmp.gt.f32.partialorder %v3305_v32, 0.0  ;;  %v3307_v42 = vadd.f32 %v3306_v49, %v3114_v18  ;;  %v9357_v49 = vld [vmem:[#allocation32_spill] sm:$0xff]  ;;  %v9358_v14 = vld [vmem:[#allocation35_spill] sm:$0xff]  ;;  %v9359_v52 = vld [vmem:[#allocation34_spill] sm:$0xff] }
 0x2c5   : > { %v3117_v54 = vpop.f32.mrf.mxu0  ;;  %v3708_v47 = vsel %vm3452_vm7, %v3301_v15, %v3580_v11 }
 0x2c6   : > { %v3310_v37 = vpop.f32.mrf.mxu1  ;;  %v3309_v19 = vadd.f32 %v3308_v0, %v3116_v63  ;;  %v3118_v16 = vadd.f32 %v3117_v54, %v2925_v35  ;;  %v3816_v40 = vpack.c.bf16 %v3708_v47, %v3704_v7  ;;  %v3711_v57 = vsel %vm3455_vm8, %v3305_v32, %v3583_v31 }
 0x2c7   : > { %v3121_v9 = vpop.f32.mrf.mxu0  ;;  %4430 = vmatmul.mubr.bf16.gmra.mxu0 %v9351_v22  ;;  %v3584_v5 = vmul.f32 0.2, %v3307_v42  ;;  %vm3456_vm10 = vcmp.gt.f32.partialorder %v3307_v42, 0.0  ;;  %v2935_v32 = vadd.f32 %v9359_v52, %v2742_v17  ;;  %v9363_v22 = vld [vmem:[#allocation36_spill] sm:$0xff] }
 0x2c8   : > { %v3314_v58 = vpop.f32.mrf.mxu1  ;;  %vm3459_vm9 = vcmp.gt.f32.partialorder %v3309_v19, 0.0  ;;  %v3587_v44 = vmul.f32 0.2, %v3309_v19  ;;  %v3122_v25 = vadd.f32 %v3121_v9, %v9352_v21  ;;  %4439 = vmatprep.mubr.bf16.mxu0 %v9355_v12  ;;  %v3311_v50 = vadd.f32 %v3310_v37, %v3118_v16  ;;  %4522 = vmatprep.mubr.bf16.mxu1 %v3816_v40  ;;  %v9360_v16 = vld [vmem:[#allocation21_spill] sm:$0xff]  ;;  %v9361_v9 = vld [vmem:[#allocation20_spill] sm:$0xff] }
 0x2c9   : > { %v3123_v55 = vpop.f32.mrf.mxu0  ;;  %4523 = vmatmul.mubr.bf16.gmra.mxu1 %v3815_v59  ;;  %v3712_v59 = vsel %vm3456_vm10, %v3307_v42, %v3584_v5 }
 0x2ca   : > { %v3316_v3 = vpop.f32.mrf.mxu1  ;;  %v3715_v15 = vsel %vm3459_vm9, %v3309_v19, %v3587_v44  ;;  %v3315_v43 = vadd.f32 %v3314_v58, %v3122_v25  ;;  %v3124_v53 = vadd.f32 %v3123_v55, %v9357_v49  ;;  %vm3460_vm11 = vcmp.gt.f32.partialorder %v3311_v50, 0.0  ;;  %v9364_v44 = vld [vmem:[#allocation38_spill] sm:$0xff]  ;;  %v9366_v49 = vld [vmem:[#allocation40_spill] sm:$0xff] }
 0x2cb   : > { %v3819_v48 = vpack.c.bf16 %v3715_v15, %v3711_v57  ;;  %v3588_v6 = vmul.f32 0.2, %v3311_v50  ;;  %v3125_v18 = vpop.f32.mrf.mxu0  ;;  %v9362_v58 = vpack.c.bf16 %v9360_v16, %v9361_v9  ;;  %v2752_v21 = vadd.f32 %v9364_v44, %v7927_v45  ;;  %v9365_v57 = vld [vmem:[#allocation37_spill] sm:$0xff] }
 0x2cc   : > { %v3318_v11 = vpop.f32.mrf.mxu1  ;;  %v3126_v0 = vadd.f32 %v3125_v18, %v9358_v14  ;;  %v3591_v63 = vmul.f32 0.2, %v3315_v43  ;;  %vm3463_vm12 = vcmp.gt.f32.partialorder %v3315_v43, 0.0  ;;  %v3317_v54 = vadd.f32 %v3316_v3, %v3124_v53 }
 0x2cd   : > { %v3127_v33 = vpop.f32.mrf.mxu0  ;;  %v3716_v31 = vsel %vm3460_vm11, %v3311_v50, %v3588_v6  ;;  %v9367_v6 = vld [vmem:[#allocation39_spill] sm:$0xff] }
 0x2ce   : > { %v3320_v35 = vpop.f32.mrf.mxu1  ;;  %v3319_v37 = vadd.f32 %v3318_v11, %v3126_v0  ;;  %v3128_v47 = vadd.f32 %v3127_v33, %v2935_v32  ;;  %v3820_v62 = vpack.c.bf16 %v3716_v31, %v3712_v59  ;;  %v3719_v25 = vsel %vm3463_vm12, %v3315_v43, %v3591_v63  ;;  %v9368_v59 = vld [vmem:[#allocation41_spill] sm:$0xff] }
 0x2cf   : > { %v3131_v19 = vpop.f32.mrf.mxu0  ;;  %4440 = vmatmul.mubr.bf16.gmra.mxu0 %v9362_v58  ;;  %v3592_v12 = vmul.f32 0.2, %v3317_v54  ;;  %vm3464_vm14 = vcmp.gt.f32.partialorder %v3317_v54, 0.0  ;;  %v2945_v43 = vadd.f32 %v9367_v6, %v2752_v21 }
 0x2d0   : > { %v3324_v7 = vpop.f32.mrf.mxu1  ;;  %vm3467_vm13 = vcmp.gt.f32.partialorder %v3319_v37, 0.0  ;;  %v3595_v36 = vmul.f32 0.2, %v3319_v37  ;;  %v3132_v40 = vadd.f32 %v3131_v19, %v9363_v22  ;;  %v3321_v51 = vadd.f32 %v3320_v35, %v3128_v47  ;;  %4532 = vmatprep.mubr.bf16.mxu1 %v3820_v62  ;;  %v9369_v19 = vld [vmem:[#allocation43_spill] sm:$0xff] }
 0x2d1   : > { %v3133_v4 = vpop.f32.mrf.mxu0  ;;  %4533 = vmatmul.mubr.bf16.gmra.mxu1 %v3819_v48  ;;  %v3720_v48 = vsel %vm3464_vm14, %v3317_v54, %v3592_v12  ;;  %v9370_v54 = vld [vmem:[#allocation42_spill] sm:$0xff] }
 0x2d2   : > { %v3326_v42 = vpop.f32.mrf.mxu1  ;;  %v3723_v13 = vsel %vm3467_vm13, %v3319_v37, %v3595_v36  ;;  %v3325_v17 = vadd.f32 %v3324_v7, %v3132_v40  ;;  %v3134_v50 = vadd.f32 %v3133_v4, %v9365_v57  ;;  %vm3468_vm15 = vcmp.gt.f32.partialorder %v3321_v51, 0.0 }
 0x2d3   : > { %v3823_v55 = vpack.c.bf16 %v3723_v13, %v3719_v25  ;;  %v3596_v3 = vmul.f32 0.2, %v3321_v51  ;;  %v3135_v5 = vpop.f32.mrf.mxu0  ;;  %v2762_v7 = vadd.f32 %v9369_v19, %v7927_v45  ;;  %v9372_v13 = vld [vmem:[#allocation44_spill] sm:$0xff] }
 0x2d4   : > { %v3328_v15 = vpop.f32.mrf.mxu1  ;;  %v3136_v53 = vadd.f32 %v3135_v5, %v9366_v49  ;;  %v3599_v18 = vmul.f32 0.2, %v3325_v17  ;;  %vm3471_vm1 = vcmp.gt.f32.partialorder %v3325_v17, 0.0  ;;  %v3327_v52 = vadd.f32 %v3326_v42, %v3134_v50  ;;  %v9371_v42 = vld [vmem:[#allocation45_spill] sm:$0xff] }
 0x2d5   : > { %v3137_v11 = vpop.f32.mrf.mxu0  ;;  %v3724_v0 = vsel %vm3468_vm15, %v3321_v51, %v3596_v3 }
 0x2d6   : > { %v3330_v14 = vpop.f32.mrf.mxu1  ;;  %v3329_v32 = vadd.f32 %v3328_v15, %v3136_v53  ;;  %v3138_v63 = vadd.f32 %v3137_v11, %v2945_v43  ;;  %v3824_v31 = vpack.c.bf16 %v3724_v0, %v3720_v48  ;;  %v3727_v16 = vsel %vm3471_vm1, %v3325_v17, %v3599_v18  ;;  %v9373_v0 = vld [vmem:[#allocation47_spill] sm:$0xff] }
 0x2d7   : > { %v3141_v33 = vpop.f32.mrf.mxu0  ;;  %v3600_v36 = vmul.f32 0.2, %v3327_v52  ;;  %vm3472_vm3 = vcmp.gt.f32.partialorder %v3327_v52, 0.0  ;;  %v2955_v17 = vadd.f32 %v9372_v13, %v2762_v7 }
 0x2d8   : > { %v3334_v35 = vpop.f32.mrf.mxu1  ;;  %vm3475_vm2 = vcmp.gt.f32.partialorder %v3329_v32, 0.0  ;;  %v3603_v37 = vmul.f32 0.2, %v3329_v32  ;;  %v3142_v47 = vadd.f32 %v3141_v33, %v9368_v59  ;;  %v3331_v9 = vadd.f32 %v3330_v14, %v3138_v63  ;;  %4542 = vmatprep.mubr.bf16.mxu1 %v3824_v31 }
 0x2d9   : > { %v3143_v58 = vpop.f32.mrf.mxu0  ;;  %4543 = vmatmul.mubr.bf16.gmra.mxu1 %v3823_v55  ;;  %v3728_v55 = vsel %vm3472_vm3, %v3327_v52, %v3600_v36  ;;  %v9374_v52 = vld [vmem:[#allocation46_spill] sm:$0xff] }
 0x2da   : > { %v3336_v62 = vpop.f32.mrf.mxu1  ;;  %v3731_v22 = vsel %vm3475_vm2, %v3329_v32, %v3603_v37  ;;  %v3335_v40 = vadd.f32 %v3334_v35, %v3142_v47  ;;  %v3144_v44 = vadd.f32 %v3143_v58, %v9370_v54  ;;  %vm3476_vm4 = vcmp.gt.f32.partialorder %v3331_v9, 0.0 }
 0x2db   : > { %v3827_v21 = vpack.c.bf16 %v3731_v22, %v3727_v16  ;;  %v3604_v25 = vmul.f32 0.2, %v3331_v9  ;;  %v3145_v51 = vpop.f32.mrf.mxu0  ;;  %v2772_v32 = vadd.f32 %v9373_v0, %v7927_v45 }
 0x2dc   : > { %v3338_v4 = vpop.f32.mrf.mxu1  ;;  %v3146_v12 = vadd.f32 %v3145_v51, %v9371_v42  ;;  %v3607_v57 = vmul.f32 0.2, %v3335_v40  ;;  %vm3479_vm0 = vcmp.gt.f32.partialorder %v3335_v40, 0.0  ;;  %v3337_v15 = vadd.f32 %v3336_v62, %v3144_v44  ;;  %v9376_v62 = vld [vmem:[#allocation48_spill] sm:$0xff] }
 0x2dd   : > { %v3147_v50 = vpop.f32.mrf.mxu0  ;;  %v3732_v5 = vsel %vm3476_vm4, %v3331_v9, %v3604_v25  ;;  %v9375_v9 = vld [vmem:[#allocation49_spill] sm:$0xff]  ;;  %v2965_v36 = vadd.f32 %v9376_v62, %v2772_v32  ;;  %v9378_v32 = vld [vmem:[#allocation52_spill] sm:$0xff]  ;;  %v2792_v62 = vadd.f32 %v8170_v34, %v7927_v45 }
 0x2de   : > { %v3340_v3 = vpop.f32.mrf.mxu1  ;;  %v3339_v49 = vadd.f32 %v3338_v4, %v3146_v12  ;;  %v3148_v53 = vadd.f32 %v3147_v50, %v2955_v17  ;;  %v3828_v18 = vpack.c.bf16 %v3732_v5, %v3728_v55  ;;  %v3735_v48 = vsel %vm3479_vm0, %v3335_v40, %v3607_v57  ;;  %v9381_v34 = vld [vmem:[#allocation53_spill] sm:$0xff] }
 0x2df   : > { %v3151_v6 = vpop.f32.mrf.mxu0  ;;  %v3608_v31 = vmul.f32 0.2, %v3337_v15  ;;  %vm3480_vm6 = vcmp.gt.f32.partialorder %v3337_v15, 0.0  ;;  %v2782_v50 = vadd.f32 %v8151_v60, %v7927_v45  ;;  %v9379_v60 = vld [vmem:[#allocation51_spill] sm:$0xff] }
 0x2e0   : > { %v3344_v43 = vpop.f32.mrf.mxu1  ;;  %vm3483_vm5 = vcmp.gt.f32.partialorder %v3339_v49, 0.0  ;;  %v3611_v11 = vmul.f32 0.2, %v3339_v49  ;;  %v3152_v14 = vadd.f32 %v3151_v6, %v8126_v10  ;;  %v3341_v63 = vadd.f32 %v3340_v3, %v3148_v53  ;;  %4552 = vmatprep.mubr.bf16.mxu1 %v3828_v18 }
 0x2e1   : > { %v3153_v33 = vpop.f32.mrf.mxu0  ;;  %4553 = vmatmul.mubr.bf16.gmra.mxu1 %v3827_v21  ;;  %v3736_v21 = vsel %vm3480_vm6, %v3337_v15, %v3608_v31  ;;  %v9377_v15 = vld [vmem:[#allocation50_spill] sm:$0xff] }
 0x2e2   : > { %v3346_v35 = vpop.f32.mrf.mxu1  ;;  %v3739_v37 = vsel %vm3483_vm5, %v3339_v49, %v3611_v11  ;;  %v3345_v59 = vadd.f32 %v3344_v43, %v3152_v14  ;;  %v3154_v47 = vadd.f32 %v3153_v33, %v9374_v52  ;;  %vm3484_vm7 = vcmp.gt.f32.partialorder %v3341_v63, 0.0 }
 0x2e3   : > { %v3831_v19 = vpack.c.bf16 %v3739_v37, %v3735_v48  ;;  %v3612_v7 = vmul.f32 0.2, %v3341_v63  ;;  %v3155_v16 = vpop.f32.mrf.mxu0 }
 0x2e4   : > { %v3348_v10 = vpop.f32.mrf.mxu1  ;;  %v3156_v58 = vadd.f32 %v3155_v16, %v9375_v9  ;;  %v3615_v22 = vmul.f32 0.2, %v3345_v59  ;;  %vm3487_vm8 = vcmp.gt.f32.partialorder %v3345_v59, 0.0  ;;  %v3347_v25 = vadd.f32 %v3346_v35, %v3154_v47 }
 0x2e5   : > { %v3157_v40 = vpop.f32.mrf.mxu0  ;;  %v3740_v44 = vsel %vm3484_vm7, %v3341_v63, %v3612_v7  ;;  %v2975_v63 = vadd.f32 %v9379_v60, %v2782_v50 }
 0x2e6   : > { %v3350_v54 = vpop.f32.mrf.mxu1  ;;  %v3349_v51 = vadd.f32 %v3348_v10, %v3156_v58  ;;  %v3158_v4 = vadd.f32 %v3157_v40, %v2965_v36  ;;  %v3832_v13 = vpack.c.bf16 %v3740_v44, %v3736_v21  ;;  %v3743_v3 = vsel %vm3487_vm8, %v3345_v59, %v3615_v22 }
 0x2e7   : > { %v3161_v42 = vpop.f32.mrf.mxu0  ;;  %v3616_v53 = vmul.f32 0.2, %v3347_v25  ;;  %vm3488_vm10 = vcmp.gt.f32.partialorder %v3347_v25, 0.0 }
 0x2e8   : > { %v3354_v12 = vpop.f32.mrf.mxu1  ;;  %vm3491_vm9 = vcmp.gt.f32.partialorder %v3349_v51, 0.0  ;;  %v3619_v17 = vmul.f32 0.2, %v3349_v51  ;;  %v3162_v57 = vadd.f32 %v3161_v42, %v8145_v28  ;;  %v3351_v5 = vadd.f32 %v3350_v54, %v3158_v4  ;;  %4562 = vmatprep.mubr.bf16.mxu1 %v3832_v13  ;;  %v9380_v13 = vld [vmem:[#allocation54_spill] sm:$0xff] }
 0x2e9   : > { %v3163_v49 = vpop.f32.mrf.mxu0  ;;  %4563 = vmatmul.mubr.bf16.gmra.mxu1 %v3831_v19  ;;  %v3744_v47 = vsel %vm3488_vm10, %v3347_v25, %v3616_v53 }
 0x2ea   : > { %v3356_v55 = vpop.f32.mrf.mxu1  ;;  %v3747_v6 = vsel %vm3491_vm9, %v3349_v51, %v3619_v17  ;;  %v3355_v43 = vadd.f32 %v3354_v12, %v3162_v57  ;;  %v3164_v18 = vadd.f32 %v3163_v49, %v9377_v15  ;;  %vm3492_vm11 = vcmp.gt.f32.partialorder %v3351_v5, 0.0 }
 0x2eb   : > { %v3835_v11 = vpack.c.bf16 %v3747_v6, %v3743_v3  ;;  %v3620_v14 = vmul.f32 0.2, %v3351_v5  ;;  %v3165_v0 = vpop.f32.mrf.mxu0  ;;  %v2985_v57 = vadd.f32 %v9381_v34, %v2792_v62 }
 0x2ec   : > { %v3358_v28 = vpop.f32.mrf.mxu1  ;;  %v3166_v48 = vadd.f32 %v3165_v0, %v9378_v32  ;;  %v3623_v33 = vmul.f32 0.2, %v3355_v43  ;;  %vm3495_vm12 = vcmp.gt.f32.partialorder %v3355_v43, 0.0  ;;  %v3357_v59 = vadd.f32 %v3356_v55, %v3164_v18 }
 0x2ed   : > { %v3167_v35 = vpop.f32.mrf.mxu0  ;;  %v3748_v37 = vsel %vm3492_vm11, %v3351_v5, %v3620_v14  ;;  %v2802_v0 = vadd.f32 %v8189_v29, %v7927_v45  ;;  %v9382_v29 = vld [vmem:[#allocation55_spill] sm:$0xff] }
 0x2ee   : > { %v3360_v31 = vpop.f32.mrf.mxu1  ;;  %v3359_v52 = vadd.f32 %v3358_v28, %v3166_v48  ;;  %v3168_v19 = vadd.f32 %v3167_v35, %v2975_v63  ;;  %v3836_v10 = vpack.c.bf16 %v3748_v37, %v3744_v47  ;;  %v3751_v36 = vsel %vm3495_vm12, %v3355_v43, %v3623_v33 }
 0x2ef   : > { %v3171_v7 = vpop.f32.mrf.mxu0  ;;  %v3624_v44 = vmul.f32 0.2, %v3357_v59  ;;  %vm3496_vm14 = vcmp.gt.f32.partialorder %v3357_v59, 0.0 }
 0x2f0   : > { %v3364_v16 = vpop.f32.mrf.mxu1  ;;  %vm3499_vm13 = vcmp.gt.f32.partialorder %v3359_v52, 0.0  ;;  %v3627_v9 = vmul.f32 0.2, %v3359_v52  ;;  %v3172_v58 = vadd.f32 %v3171_v7, %v8164_v27  ;;  %v3361_v22 = vadd.f32 %v3360_v31, %v3168_v19  ;;  %4572 = vmatprep.mubr.bf16.mxu1 %v3836_v10 }
 0x2f1   : > { %v3173_v40 = vpop.f32.mrf.mxu0  ;;  %4573 = vmatmul.mubr.bf16.gmra.mxu1 %v3835_v11  ;;  %v3752_v6 = vsel %vm3496_vm14, %v3357_v59, %v3624_v44  ;;  %v2995_v19 = vadd.f32 %v9382_v29, %v2802_v0 }
 0x2f2   : > { %v3366_v54 = vpop.f32.mrf.mxu1  ;;  %v3755_v51 = vsel %vm3499_vm13, %v3359_v52, %v3627_v9  ;;  %v3365_v21 = vadd.f32 %v3364_v16, %v3172_v58  ;;  %v3174_v25 = vadd.f32 %v3173_v40, %v8167_v23  ;;  %vm3500_vm15 = vcmp.gt.f32.partialorder %v3361_v22, 0.0 }
 0x2f3   : > { %v3839_v4 = vpack.c.bf16 %v3755_v51, %v3751_v36  ;;  %v3628_v42 = vmul.f32 0.2, %v3361_v22  ;;  %v3175_v12 = vpop.f32.mrf.mxu0 }
 0x2f4   : > { %v3368_v27 = vpop.f32.mrf.mxu1  ;;  %v3176_v17 = vadd.f32 %v3175_v12, %v9380_v13  ;;  %v3631_v50 = vmul.f32 0.2, %v3365_v21  ;;  %vm3503_vm1 = vcmp.gt.f32.partialorder %v3365_v21, 0.0  ;;  %v3367_v55 = vadd.f32 %v3366_v54, %v3174_v25 }
 0x2f5   : > { %v3177_v3 = vpop.f32.mrf.mxu0  ;;  %v3756_v49 = vsel %vm3500_vm15, %v3361_v22, %v3628_v42 }
 0x2f6   : > { %v3370_v5 = vpop.f32.mrf.mxu1  ;;  %v3369_v53 = vadd.f32 %v3368_v27, %v3176_v17  ;;  %v3178_v43 = vadd.f32 %v3177_v3, %v2985_v57  ;;  %v3840_v18 = vpack.c.bf16 %v3756_v49, %v3752_v6  ;;  %v3759_v28 = vsel %vm3503_vm1, %v3365_v21, %v3631_v50  ;;  %v9383_v3 = vld [vmem:[#allocation103_spill] sm:$0xff] }
 0x2f7   : > { %v3181_v23 = vpop.f32.mrf.mxu0  ;;  %v3632_v63 = vmul.f32 0.2, %v3367_v55  ;;  %vm3504_vm3 = vcmp.gt.f32.partialorder %v3367_v55, 0.0 }
 0x2f8   : > { %v3374_v15 = vpop.f32.mrf.mxu1  ;;  %vm3507_vm2 = vcmp.gt.f32.partialorder %v3369_v53, 0.0  ;;  %v3635_v11 = vmul.f32 0.2, %v3369_v53  ;;  %v3182_v14 = vadd.f32 %v3181_v23, %v8183_v56  ;;  %v3371_v32 = vadd.f32 %v3370_v5, %v3178_v43  ;;  %4582 = vmatprep.mubr.bf16.mxu1 %v3840_v18 }
 0x2f9   : > { %v3183_v48 = vpop.f32.mrf.mxu0  ;;  %4583 = vmatmul.mubr.bf16.gmra.mxu1 %v3839_v4  ;;  %v3760_v36 = vsel %vm3504_vm3, %v3367_v55, %v3632_v63 }
 0x2fa   : > { %v3376_v60 = vpop.f32.mrf.mxu1  ;;  %v3763_v33 = vsel %vm3507_vm2, %v3369_v53, %v3635_v11  ;;  %v3375_v35 = vadd.f32 %v3374_v15, %v3182_v14  ;;  %v3184_v31 = vadd.f32 %v3183_v48, %v8186_v30  ;;  %vm3508_vm4 = vcmp.gt.f32.partialorder %v3371_v32, 0.0 }
 0x2fb   : > { %v3843_v37 = vpack.c.bf16 %v3763_v33, %v3759_v28  ;;  %v3636_v59 = vmul.f32 0.2, %v3371_v32  ;;  %v3185_v52 = vpop.f32.mrf.mxu0  ;;  %v2822_v48 = vadd.f32 %v8227_v61, %v7927_v45  ;;  %v9385_v61 = vld [vmem:[#allocation104_spill] sm:$0xff] }
 0x2fc   : > { %v3378_v56 = vpop.f32.mrf.mxu1  ;;  %v3186_v47 = vadd.f32 %v3185_v52, %v8193_v46  ;;  %v3639_v7 = vmul.f32 0.2, %v3375_v35  ;;  %vm3511_vm0 = vcmp.gt.f32.partialorder %v3375_v35, 0.0  ;;  %v3377_v58 = vadd.f32 %v3376_v60, %v3184_v31 }
 0x2fd   : > { %v3187_v16 = vpop.f32.mrf.mxu0  ;;  %v3764_v9 = vsel %vm3508_vm4, %v3371_v32, %v3636_v59  ;;  %v2812_v46 = vadd.f32 %v8208_v41, %v7927_v45  ;;  %v9384_v41 = vld [vmem:[#allocation56_spill] sm:$0xff] }
 0x2fe   : > { %v3380_v10 = vpop.f32.mrf.mxu1  ;;  %v3379_v62 = vadd.f32 %v3378_v56, %v3186_v47  ;;  %v3188_v22 = vadd.f32 %v3187_v16, %v2995_v19  ;;  %v3844_v54 = vpack.c.bf16 %v3764_v9, %v3760_v36  ;;  %v3767_v21 = vsel %vm3511_vm0, %v3375_v35, %v3639_v7 }
 0x2ff   : > { %v3191_v30 = vpop.f32.mrf.mxu0  ;;  %v3640_v12 = vmul.f32 0.2, %v3377_v58  ;;  %vm3512_vm6 = vcmp.gt.f32.partialorder %v3377_v58, 0.0  ;;  %v3005_v49 = vadd.f32 %v9384_v41, %v2812_v46  ;;  %v3015_v7 = vadd.f32 %v9385_v61, %v2822_v48 }
 0x300   : > { %v3384_v40 = vpop.f32.mrf.mxu1  ;;  %vm3515_vm5 = vcmp.gt.f32.partialorder %v3379_v62, 0.0  ;;  %v3643_v44 = vmul.f32 0.2, %v3379_v62  ;;  %v3192_v51 = vadd.f32 %v3191_v30, %v8202_v1  ;;  %v3381_v25 = vadd.f32 %v3380_v10, %v3188_v22  ;;  %4592 = vmatprep.mubr.bf16.mxu1 %v3844_v54 }
 0x301   : > { %v3193_v4 = vpop.f32.mrf.mxu0  ;;  %4593 = vmatmul.mubr.bf16.gmra.mxu1 %v3843_v37  ;;  %v3768_v18 = vsel %vm3512_vm6, %v3377_v58, %v3640_v12 }
 0x302   : > { %v3386_v42 = vpop.f32.mrf.mxu1  ;;  %v3771_v27 = vsel %vm3515_vm5, %v3379_v62, %v3643_v44  ;;  %v3385_v13 = vadd.f32 %v3384_v40, %v3192_v51  ;;  %v3194_v17 = vadd.f32 %v3193_v4, %v8205_v38  ;;  %vm3516_vm7 = vcmp.gt.f32.partialorder %v3381_v25, 0.0 }
 0x303   : > { %v3847_v34 = vpack.c.bf16 %v3771_v27, %v3767_v21  ;;  %v3644_v57 = vmul.f32 0.2, %v3381_v25  ;;  %v3195_v50 = vpop.f32.mrf.mxu0 }
 0x304   : > { %v3388_v1 = vpop.f32.mrf.mxu1  ;;  %v3196_v5 = vadd.f32 %v3195_v50, %v9383_v3  ;;  %v3647_v55 = vmul.f32 0.2, %v3385_v13  ;;  %vm3519_vm8 = vcmp.gt.f32.partialorder %v3385_v13, 0.0  ;;  %v3387_v23 = vadd.f32 %v3386_v42, %v3194_v17 }
 0x305   : > { %v3197_v53 = vpop.f32.mrf.mxu0  ;;  %v3772_v43 = vsel %vm3516_vm7, %v3381_v25, %v3644_v57 }
 0x306   : > { %v3390_v6 = vpop.f32.mrf.mxu1  ;;  %v3389_v15 = vadd.f32 %v3388_v1, %v3196_v5  ;;  %v3198_v11 = vadd.f32 %v3197_v53, %v3005_v49  ;;  %v3848_v0 = vpack.c.bf16 %v3772_v43, %v3768_v18  ;;  %v3775_v60 = vsel %vm3519_vm8, %v3385_v13, %v3647_v55 }
 0x307   : > { %v3201_v38 = vpop.f32.mrf.mxu0  ;;  %v3648_v31 = vmul.f32 0.2, %v3387_v23  ;;  %vm3520_vm10 = vcmp.gt.f32.partialorder %v3387_v23, 0.0 }
 0x308   : > { %v3394_v14 = vpop.f32.mrf.mxu1  ;;  %vm3523_vm9 = vcmp.gt.f32.partialorder %v3389_v15, 0.0  ;;  %v3651_v28 = vmul.f32 0.2, %v3389_v15  ;;  %v3202_v32 = vadd.f32 %v3201_v38, %v8221_v24  ;;  %v3391_v63 = vadd.f32 %v3390_v6, %v3198_v11  ;;  %4602 = vmatprep.mubr.bf16.mxu1 %v3848_v0 }
 0x309   : > { %v3203_v33 = vpop.f32.mrf.mxu0  ;;  %4603 = vmatmul.mubr.bf16.gmra.mxu1 %v3847_v34  ;;  %v3776_v22 = vsel %vm3520_vm10, %v3387_v23, %v3648_v31 }
 0x30a   : > { %v3396_v35 = vpop.f32.mrf.mxu1  ;;  %v3779_v37 = vsel %vm3523_vm9, %v3389_v15, %v3651_v28  ;;  %v3395_v59 = vadd.f32 %v3394_v14, %v3202_v32  ;;  %v3204_v52 = vadd.f32 %v3203_v33, %v8224_v8  ;;  %vm3524_vm11 = vcmp.gt.f32.partialorder %v3391_v63, 0.0 }
 0x30b   : > { %v3851_v56 = vpack.c.bf16 %v3779_v37, %v3775_v60  ;;  %v3652_v47 = vmul.f32 0.2, %v3391_v63  ;;  %v3205_v29 = vpop.f32.mrf.mxu0 }
 0x30c   : > { %v3398_v24 = vpop.f32.mrf.mxu1  ;;  %v3206_v19 = vadd.f32 %v3205_v29, %v8231_v39  ;;  %v3655_v16 = vmul.f32 0.2, %v3395_v59  ;;  %vm3527_vm12 = vcmp.gt.f32.partialorder %v3395_v59, 0.0  ;;  %v3397_v62 = vadd.f32 %v3396_v35, %v3204_v52 }
 0x30d   : > { %v3207_v10 = vpop.f32.mrf.mxu0  ;;  %v3780_v58 = vsel %vm3524_vm11, %v3391_v63, %v3652_v47  ;;  %v2832_v39 = vadd.f32 %v8246_v20, %v7927_v45  ;;  %v9387_v45 = vld [vmem:[#allocation60_spill] sm:$0xff] }
 0x30e   : > { %v3400_v9 = vpop.f32.mrf.mxu1  ;;  %v3399_v36 = vadd.f32 %v3398_v24, %v3206_v19  ;;  %v3208_v30 = vadd.f32 %v3207_v10, %v3015_v7  ;;  %v3852_v54 = vpack.c.bf16 %v3780_v58, %v3776_v22  ;;  %v3783_v46 = vsel %vm3527_vm12, %v3395_v59, %v3655_v16 }
 0x30f   : > { %v3211_v8 = vpop.f32.mrf.mxu0  ;;  %v3656_v42 = vmul.f32 0.2, %v3397_v62  ;;  %vm3528_vm14 = vcmp.gt.f32.partialorder %v3397_v62, 0.0  ;;  %v3025_v20 = vadd.f32 %v9387_v45, %v2832_v39 }
 0x310   : > { %v3404_v40 = vpop.f32.mrf.mxu1  ;;  %vm3531_vm13 = vcmp.gt.f32.partialorder %v3399_v36, 0.0  ;;  %v3659_v44 = vmul.f32 0.2, %v3399_v36  ;;  %v3212_v51 = vadd.f32 %v3211_v8, %v8240_v26  ;;  %v3401_v21 = vadd.f32 %v3400_v9, %v3208_v30  ;;  %4612 = vmatprep.mubr.bf16.mxu1 %v3852_v54  ;;  %v9386_v26 = vld [vmem:[#allocation61_spill] sm:$0xff] }
 0x311   : > { %v3213_v25 = vpop.f32.mrf.mxu0  ;;  %4613 = vmatmul.mubr.bf16.gmra.mxu1 %v3851_v56  ;;  %v3784_v53 = vsel %vm3528_vm14, %v3397_v62, %v3656_v42  ;;  %v9388_v42 = vld [vmem:[#allocation58_spill] sm:$0xff] }
 0x312   : > { %v3406_v4 = vpop.f32.mrf.mxu1  ;;  %v3787_v12 = vsel %vm3531_vm13, %v3399_v36, %v3659_v44  ;;  %v3405_v27 = vadd.f32 %v3404_v40, %v3212_v51  ;;  %v3214_v13 = vadd.f32 %v3213_v25, %v8243_v2  ;;  %vm3532_vm15 = vcmp.gt.f32.partialorder %v3401_v21, 0.0  ;;  %v3925_v25 = vld [vmem:[%s8868_s4] sm:$0x3] }
 0x313   : > { %v3855_v17 = vpack.c.bf16 %v3787_v12, %v3783_v46  ;;  %v3660_v34 = vmul.f32 0.2, %v3401_v21  ;;  %v3215_v57 = vpop.f32.mrf.mxu0  ;;  %v8429_v12 = vrot.slane %v3925_v25, %v9388_v42 }
 0x314   : > { %v3216_v50 = vadd.f32 %v3215_v57, %v9386_v26  ;;  %v3408_v1 = vpop.f32.mrf.mxu1  ;;  %v3407_v3 = vadd.f32 %v3406_v4, %v3214_v13  ;;  %v3663_v49 = vmul.f32 0.2, %v3405_v27  ;;  %vm3535_vm1 = vcmp.gt.f32.partialorder %v3405_v27, 0.0 }
 0x315   : > { %v3217_v5 = vpop.f32.mrf.mxu0  ;;  %v3788_v41 = vsel %vm3532_vm15, %v3401_v21, %v3660_v34 }
 0x316   : > { %v3409_v55 = vadd.f32 %v3408_v1, %v3216_v50  ;;  %v3218_v6 = vadd.f32 %v3217_v5, %v3025_v20  ;;  %v3856_v2 = vpack.c.bf16 %v3788_v41, %v3784_v53  ;;  %v3410_v15 = vpop.f32.mrf.mxu1  ;;  %v3664_v18 = vmul.f32 0.2, %v3407_v3 }
 0x317   : > { %v4291_v43 = vpop.f32.mrf.mxu0  ;;  %v3791_v14 = vsel %vm3535_vm1, %v3405_v27, %v3663_v49  ;;  %vm3536_vm3 = vcmp.gt.f32.partialorder %v3407_v3, 0.0  ;;  %v9389_v27 = vld [vmem:[#allocation59_spill] sm:$0xff] }
 0x318   : > { %vm3539_vm2 = vcmp.gt.f32.partialorder %v3409_v55, 0.0  ;;  %v3667_v23 = vmul.f32 0.2, %v3409_v55  ;;  %v3411_v11 = vadd.f32 %v3410_v15, %v3218_v6  ;;  %4622 = vmatprep.mubr.bf16.mxu1 %v3856_v2  ;;  %v3792_v63 = vsel %vm3536_vm3, %v3407_v3, %v3664_v18 }
 0x319   : > { %v4293_v38 = vpop.f32.mrf.mxu0  ;;  %4623 = vmatmul.mubr.bf16.gmra.mxu1 %v3855_v17  ;;  %v8432_v13 = vrot.slane %v3925_v25, %v9389_v27  ;;  %v4292_v34 = vadd.f32 %v4291_v43, %v8429_v12 }
 0x31a   : > { %v3795_v0 = vsel %vm3539_vm2, %v3409_v55, %v3667_v23  ;;  %vm3540_vm4 = vcmp.gt.f32.partialorder %v3411_v11, 0.0  ;;  %v3668_v32 = vmul.f32 0.2, %v3411_v11 }
 0x31b   : > { %v3859_v28 = vpack.c.bf16 %v3795_v0, %v3791_v14  ;;  %v4295_v48 = vpop.f32.mrf.mxu0  ;;  %v4294_v26 = vadd.f32 %v4293_v38, %v8432_v13 }
 0x31c   : > { %v3796_v33 = vsel %vm3540_vm4, %v3411_v11, %v3668_v32  ;;  %v4296_v20 = vadd.f32 %v4295_v48, %v8429_v12 }
 0x31d   : > { %v4297_v60 = vpop.f32.mrf.mxu0  ;;  %v3860_v35 = vpack.c.bf16 %v3796_v33, %v3792_v63 }
 0x31e   : > { %v4298_v41 = vadd.f32 %v4297_v60, %v8432_v13 }
 0x31f   : > { %v4301_v31 = vpop.f32.mrf.mxu0  ;;  %4632 = vmatprep.mubr.bf16.mxu1 %v3860_v35 }
 0x320   : > { %v4302_v6 = vadd.f32 %v4301_v31, %v8429_v12 }
 0x321   : > { %v4303_v37 = vpop.f32.mrf.mxu0  ;;  %4633 = vmatmul.mubr.bf16.gmra.mxu1 %v3859_v28 }
 0x322   : > { %v4304_v23 = vadd.f32 %v4303_v37, %v8432_v13 }
 0x323   : > { %v4305_v59 = vpop.f32.mrf.mxu0 }
 0x324   : > { %v4306_v38 = vadd.f32 %v4305_v59, %v8429_v12 }
 0x325   : > { %v4307_v52 = vpop.f32.mrf.mxu0 }
 0x326   : > { %v4308_v28 = vadd.f32 %v4307_v52, %v8432_v13 }
 0x327   : > { %v4311_v56 = vpop.f32.mrf.mxu0 }
 0x328   : > { %v4312_v63 = vadd.f32 %v4311_v56, %v8429_v12 }
 0x329   : > { %v4313_v47 = vpop.f32.mrf.mxu0 }
 0x32a   : > { %v4314_v31 = vadd.f32 %v4313_v47, %v8432_v13 }
 0x32b   : > { %v4315_v29 = vpop.f32.mrf.mxu0 }
 0x32d   : > { %v4317_v24 = vpop.f32.mrf.mxu0 }
 0x32f   : > { %v8385_v19 = vpop.f32.mrf.mxu0 }
 0x330   : > { %v4322_v47 = vadd.f32 %v8385_v19, %v8429_v12 }
 0x331   : > { %v8387_v61 = vpop.f32.mrf.mxu0 }
 0x333   : > { %v8389_v7 = vpop.f32.mrf.mxu0 }
 0x335   : > { %v8391_v16 = vpop.f32.mrf.mxu0 }
 0x337   : > { %v8393_v10 = vpop.f32.mrf.mxu0 }
 0x339   : > { %v8395_v9 = vpop.f32.mrf.mxu0 }
 0x33b   : > { %v8397_v58 = vpop.f32.mrf.mxu0 }
 0x33d   : > { %v8399_v62 = vpop.f32.mrf.mxu0 }
 0x33f   : > { %v8401_v36 = vpop.f32.mrf.mxu0 }
 0x341   : > { %v8403_v22 = vpop.f32.mrf.mxu0 }
 0x343   : > { %v8405_v30 = vpop.f32.mrf.mxu0 }
 0x345   : > { %v8407_v8 = vpop.f32.mrf.mxu0 }
 0x347   : > { %v8409_v40 = vpop.f32.mrf.mxu0 }
 0x349   : > { %v8411_v54 = vpop.f32.mrf.mxu0 }
 0x34b   : > { %v8413_v44 = vpop.f32.mrf.mxu0 }
 0x34d   : > { %v8415_v51 = vpop.f32.mrf.mxu0 }
 0x34f   : > { %v8417_v39 = vpop.f32.mrf.mxu0 }
 0x351   : > { %v8419_v46 = vpop.f32.mrf.mxu0 }
 0x353   : > { %v8421_v21 = vpop.f32.mrf.mxu0 }
 0x355   : > { %v8426_v4 = vpop.f32.mrf.mxu0 }
 0x357   : > { %v8434_v17 = vpop.f32.mrf.mxu0 }
 0x359   : > { %v8440_v1 = vpop.f32.mrf.mxu0 }
 0x35b   : > { %v8448_v55 = vpop.f32.mrf.mxu0 }
 0x35d   : > { %v8456_v18 = vpop.f32.mrf.mxu0 }
 0x35f   : > { %v8464_v48 = vpop.f32.mrf.mxu0 }
 0x361   : > { %v8472_v59 = vpop.f32.mrf.mxu0 }
 0x363   : > { %v8480_v56 = vpop.f32.mrf.mxu0 }
 0x369   : > { %v4484_v57 = vpop.f32.mrf.mxu1 }
 0x36a   : > { %v8438_v50 = vadd.f32 %v4484_v57, %v4292_v34  ;;  %v4316_v34 = vadd.f32 %v4315_v29, %v8429_v12 }
 0x36b   : > { %v4486_v45 = vpop.f32.mrf.mxu1 }
 0x36c   : > { %9390 = vst [vmem:[#allocation62_spill] sm:$0xff] %v8438_v50  ;;  %v8443_v3 = vadd.f32 %v4486_v45, %v4294_v26  ;;  %v4318_v26 = vadd.f32 %v4317_v24, %v8432_v13  ;;  %v4326_v24 = vadd.f32 %v8389_v7, %v8429_v12  ;;  %v4364_v50 = vadd.f32 %v8419_v46, %v8432_v13 }
 0x36d   : > { %v4488_v5 = vpop.f32.mrf.mxu1 }
 0x36e   : > { %9391 = vst [vmem:[#allocation63_spill] sm:$0xff] %v8443_v3  ;;  %v8446_v49 = vadd.f32 %v4488_v5, %v4296_v20 }
 0x36f   : > { %v4490_v53 = vpop.f32.mrf.mxu1 }
 0x370   : > { %9392 = vst [vmem:[#allocation64_spill] sm:$0xff] %v8446_v49  ;;  %v8451_v43 = vadd.f32 %v4490_v53, %v4298_v41  ;;  %v4324_v53 = vadd.f32 %v8387_v61, %v8432_v13 }
 0x371   : > { %v4494_v2 = vpop.f32.mrf.mxu1 }
 0x372   : > { %9393 = vst [vmem:[#allocation65_spill] sm:$0xff] %v8451_v43  ;;  %v8454_v15 = vadd.f32 %v4494_v2, %v4302_v6  ;;  %v8490_v6 = vpop.f32.mrf.mxu0  ;;  %v4366_v43 = vadd.f32 %v8421_v21, %v8429_v12  ;;  %v4374_v21 = vadd.f32 %v8440_v1, %v8432_v13  ;;  %v4356_v1 = vadd.f32 %v8413_v44, %v8429_v12 }
 0x373   : > { %v4496_v11 = vpop.f32.mrf.mxu1 }
 0x374   : > { %9394 = vst [vmem:[#allocation68_spill] sm:$0xff] %v8454_v15  ;;  %v8459_v14 = vadd.f32 %v4496_v11, %v4304_v23  ;;  %v8498_v19 = vpop.f32.mrf.mxu0 }
 0x375   : > { %v4498_v0 = vpop.f32.mrf.mxu1 }
 0x376   : > { %9395 = vst [vmem:[#allocation69_spill] sm:$0xff] %v8459_v14  ;;  %v8462_v32 = vadd.f32 %v4498_v0, %v4306_v38  ;;  %v8504_v61 = vpop.f32.mrf.mxu0 }
 0x377   : > { %v4500_v60 = vpop.f32.mrf.mxu1 }
 0x378   : > { %9396 = vst [vmem:[#allocation71_spill] sm:$0xff] %v8462_v32  ;;  %v8467_v33 = vadd.f32 %v4500_v60, %v4308_v28  ;;  %v4368_v32 = vadd.f32 %v8426_v4, %v8432_v13 }
 0x379   : > { %v4504_v35 = vpop.f32.mrf.mxu1 }
 0x37a   : > { %9397 = vst [vmem:[#allocation75_spill] sm:$0xff] %v8467_v33  ;;  %v8470_v37 = vadd.f32 %v4504_v35, %v4312_v63  ;;  %v8510_v35 = vpop.f32.mrf.mxu0 }
 0x37b   : > { %v4506_v25 = vpop.f32.mrf.mxu1 }
 0x37c   : > { %9398 = vst [vmem:[#allocation76_spill] sm:$0xff] %v8470_v37  ;;  %v8475_v52 = vadd.f32 %v4506_v25, %v4314_v31  ;;  %v8516_v25 = vpop.f32.mrf.mxu0  ;;  %v4358_v37 = vadd.f32 %v8415_v51, %v8432_v13  ;;  %v8553_v51 = vld [vmem:[%s8869_s5] sm:$0x3] }
 0x37d   : > { %v4508_v57 = vpop.f32.mrf.mxu1  ;;  %9406 = vst [vmem:[#allocation96_spill] sm:$0xff] %v8553_v51 }
 0x37e   : > { %9399 = vst [vmem:[#allocation78_spill] sm:$0xff] %v8475_v52  ;;  %v8478_v45 = vadd.f32 %v4508_v57, %v4316_v34  ;;  %v4362_v52 = vadd.f32 %v8417_v39, %v8429_v12 }
 0x37f   : > { %v4510_v20 = vpop.f32.mrf.mxu1 }
 0x380   : > { %9400 = vst [vmem:[#allocation82_spill] sm:$0xff] %v8478_v45  ;;  %v8484_v5 = vadd.f32 %v4510_v20, %v4318_v26  ;;  %v8522_v26 = vpop.f32.mrf.mxu0 }
 0x381   : > { %v4514_v41 = vpop.f32.mrf.mxu1 }
 0x382   : > { %9401 = vst [vmem:[#allocation83_spill] sm:$0xff] %v8484_v5  ;;  %v8488_v29 = vadd.f32 %v4514_v41, %v4322_v47  ;;  %v8528_v41 = vpop.f32.mrf.mxu0 }
 0x383   : > { %v4516_v2 = vpop.f32.mrf.mxu1 }
 0x384   : > { %9402 = vst [vmem:[#allocation85_spill] sm:$0xff] %v8488_v29  ;;  %v8494_v23 = vadd.f32 %v4516_v2, %v4324_v53  ;;  %v4836_v29 = vld [vmem:[#allocation2] sm:$0x1] }
 0x385   : > { %v4518_v11 = vpop.f32.mrf.mxu1  ;;  %4839 = vperm.xlu0 %5386, %v4836_v29  }
 0x386   : > { %9403 = vst [vmem:[#allocation89_spill] sm:$0xff] %v8494_v23  ;;  %v8496_v38 = vadd.f32 %v4518_v11, %v4326_v24  ;;  %v8530_v24 = vpop.f32.mrf.mxu0 }
 0x387   : > { %v8500_v0 = vpop.f32.mrf.mxu1 }
 0x388   : > { %v8534_v3 = vpop.f32.mrf.mxu0 }
 0x389   : > { %v8502_v28 = vpop.f32.mrf.mxu1  ;;  %9404 = vst [vmem:[#allocation90_spill] sm:$0xff] %v8534_v3  ;;  %v4372_v3 = vadd.f32 %v8434_v17, %v8429_v12  ;;  %v4354_v17 = vadd.f32 %v8411_v54, %v8432_v13 }
 0x38a   : > { %v8544_v45 = vpop.f32.mrf.mxu0 }
 0x38b   : > { %v8506_v60 = vpop.f32.mrf.mxu1  ;;  %9405 = vst [vmem:[#allocation92_spill] sm:$0xff] %v8544_v45 }
 0x38d   : > { %v8508_v63 = vpop.f32.mrf.mxu1 }
 0x38f   : > { %v8512_v7 = vpop.f32.mrf.mxu1 }
 0x391   : > { %v8514_v31 = vpop.f32.mrf.mxu1 }
 0x393   : > { %v8518_v34 = vpop.f32.mrf.mxu1 }
 0x395   : > { %v8520_v57 = vpop.f32.mrf.mxu1 }
 0x397   : > { %v8524_v20 = vpop.f32.mrf.mxu1 }
 0x399   : > { %v8526_v47 = vpop.f32.mrf.mxu1 }
 0x39b   : > { %v4546_v53 = vpop.f32.mrf.mxu1 }
 0x39c   : > { %v4547_v54 = vadd.f32 %v4546_v53, %v4354_v17  ;;  %v4352_v53 = vadd.f32 %v8409_v40, %v8429_v12 }
 0x39d   : > { %v4548_v2 = vpop.f32.mrf.mxu1 }
 0x39e   : > { %vm4668_vm10 = vcmp.gt.f32.partialorder %v4547_v54, 0.0 }
 0x39f   : > { %v4550_v11 = vpop.f32.mrf.mxu1 }
 0x3a1   : > { %v4554_v42 = vpop.f32.mrf.mxu1 }
 0x3a2   : > { %v4555_v5 = vadd.f32 %v4554_v42, %v4362_v52  ;;  %v8561_v42 = vpop.f32.mrf.mxu0  ;;  %v4376_v52 = vadd.f32 %v8448_v55, %v8429_v12 }
 0x3a3   : > { %v4556_v49 = vpop.f32.mrf.mxu1  ;;  %9408 = vst [vmem:[#allocation98_spill] sm:$0xff] %v8561_v42 }
 0x3a4   : > { %v4557_v15 = vadd.f32 %v4556_v49, %v4364_v50  ;;  %v4551_v49 = vadd.f32 %v4550_v11, %v4358_v37  ;;  %v4854_v37 = vrot.slane %v8553_v51, %v9389_v27  ;;  %vm4671_vm7 = vcmp.gt.f32.partialorder %v4555_v5, 0.0 }
 0x3a5   : > { %v4558_v14 = vpop.f32.mrf.mxu1 }
 0x3a6   : > { %v4559_v33 = vadd.f32 %v4558_v14, %v4366_v43  ;;  %v4736_v4 = vmul.f32 0.2, %v4557_v15  ;;  %vm4672_vm6 = vcmp.gt.f32.partialorder %v4557_v15, 0.0  ;;  %4921 = vmatprep.mubr.f32.mxu0 %v4854_v37  ;;  %v4734_v23 = vmul.f32 0.2, %v4551_v49 }
 0x3a7   : > { %v4560_v46 = vpop.f32.mrf.mxu1  ;;  %vm4670_vm8 = vcmp.gt.f32.partialorder %v4551_v49, 0.0 }
 0x3a8   : > { %v4561_v50 = vadd.f32 %v4560_v46, %v4368_v32  ;;  %v4737_v43 = vmul.f32 0.2, %v4559_v33  ;;  %vm4673_vm0 = vcmp.gt.f32.partialorder %v4559_v33, 0.0  ;;  %v4800_v55 = vsel %vm4672_vm6, %v4557_v15, %v4736_v4 }
 0x3a9   : > { %v4564_v14 = vpop.f32.mrf.mxu1 }
 0x3aa   : > { %v4738_v39 = vmul.f32 0.2, %v4561_v50  ;;  %v8555_v45 = vadd.f32 %v4564_v14, %v4372_v3  ;;  %vm4674_vm5 = vcmp.gt.f32.partialorder %v4561_v50, 0.0  ;;  %v4378_v3 = vadd.f32 %v8456_v18, %v8432_v13 }
 0x3ab   : > { %v4566_v32 = vpop.f32.mrf.mxu1  ;;  %v4549_v14 = vadd.f32 %v4548_v2, %v4356_v1  ;;  %v4801_v42 = vsel %vm4673_vm0, %v4559_v33, %v4737_v43  ;;  %v4348_v18 = vadd.f32 %v8407_v8, %v8432_v13  ;;  %v8579_v2 = vpop.f32.mrf.mxu0  ;;  %v4382_v33 = vadd.f32 %v8464_v48, %v8429_v12 }
 0x3ac   : > { %9407 = vst [vmem:[#allocation97_spill] sm:$0xff] %v8555_v45  ;;  %v8569_v11 = vadd.f32 %v4566_v32, %v4374_v21  ;;  %v4802_v46 = vsel %vm4674_vm5, %v4561_v50, %v4738_v39  ;;  %v4735_v45 = vmul.f32 0.2, %v4555_v5  ;;  %v4384_v50 = vadd.f32 %v8472_v59, %v8432_v13 }
 0x3ad   : > { %v4568_v44 = vpop.f32.mrf.mxu1  ;;  %4857 = vmatprep.subr.mxu0 %v4802_v46  ;;  %v4541_v15 = vadd.f32 %v8524_v20, %v4348_v18  ;;  %v4545_v8 = vadd.f32 %v8526_v47, %v4352_v53  ;;  %v4733_v29 = vmul.f32 0.2, %v4549_v14  ;;  %v4732_v39 = vmul.f32 0.2, %v4547_v54 }
 0x3ae   : > { %v8572_v27 = vadd.f32 %v4568_v44, %v4376_v52  ;;  %4858 = vmatpush1.xpose.msra.mxu0 %v4801_v42  ;;  %v4799_v40 = vsel %vm4671_vm7, %v4555_v5, %v4735_v45  ;;  %vm4669_vm9 = vcmp.gt.f32.partialorder %v4549_v14, 0.0  ;;  %v4798_v1 = vsel %vm4670_vm8, %v4551_v49, %v4734_v23  ;;  %v8596_v42 = vpop.f32.mrf.mxu0 }
 0x3af   : > { %v4570_v21 = vpop.f32.mrf.mxu1  ;;  %4859 = vmatprep.subr.mxu0 %v4800_v55  ;;  %v4344_v48 = vadd.f32 %v8403_v22, %v8432_v13  ;;  %v4346_v59 = vadd.f32 %v8405_v30, %v8429_v12  ;;  %v4386_v45 = vadd.f32 %v8480_v56, %v8429_v12  ;;  %v4388_v5 = vadd.f32 %v8490_v6, %v8432_v13 }
 0x3b0   : > { %v8585_v43 = vadd.f32 %v4570_v21, %v4378_v3  ;;  %v4731_v49 = vmul.f32 0.2, %v4545_v8  ;;  %v4797_v30 = vsel %vm4669_vm9, %v4549_v14, %v4733_v29  ;;  %v4730_v37 = vmul.f32 0.2, %v4541_v15  ;;  %v8613_v46 = vpop.f32.mrf.mxu0 }
 0x3b1   : > { %v4574_v4 = vpop.f32.mrf.mxu1  ;;  %v4537_v23 = vadd.f32 %v8518_v34, %v4344_v48  ;;  %v4539_v22 = vadd.f32 %v8520_v57, %v4346_v59  ;;  %vm4667_vm11 = vcmp.gt.f32.partialorder %v4545_v8, 0.0  ;;  %v4796_v3 = vsel %vm4668_vm10, %v4547_v54, %v4732_v39 }
 0x3b2   : > { %v8590_v17 = vadd.f32 %v4574_v4, %v4382_v33  ;;  %4860 = vmatpush1.xpose.msra.mxu0 %v4799_v40  ;;  %v4338_v56 = vadd.f32 %v8399_v62, %v8432_v13  ;;  %v4342_v6 = vadd.f32 %v8401_v36, %v8429_v12  ;;  %vm4666_vm12 = vcmp.gt.f32.partialorder %v4541_v15, 0.0 }
 0x3b3   : > { %v4576_v20 = vpop.f32.mrf.mxu1  ;;  %4861 = vmatprep.subr.mxu0 %v4798_v1  ;;  %v4392_v57 = vadd.f32 %v8498_v19, %v8429_v12  ;;  %v4394_v14 = vadd.f32 %v8504_v61, %v8432_v13  ;;  %v4729_v55 = vmul.f32 0.2, %v4539_v22  ;;  %v4795_v36 = vsel %vm4667_vm11, %v4545_v8, %v4731_v49 }
 0x3b4   : > { %v8602_v47 = vadd.f32 %v4576_v20, %v4384_v50  ;;  %v4531_v54 = vadd.f32 %v8512_v7, %v4338_v56  ;;  %v4535_v62 = vadd.f32 %v8514_v31, %v4342_v6  ;;  %v4728_v53 = vmul.f32 0.2, %v4537_v23  ;;  %v8630_v50 = vpop.f32.mrf.mxu0 }
 0x3b5   : > { %v4578_v32 = vpop.f32.mrf.mxu1  ;;  %vm4665_vm13 = vcmp.gt.f32.partialorder %v4539_v22, 0.0  ;;  %v4794_v33 = vsel %vm4666_vm12, %v4541_v15, %v4730_v37  ;;  %v4334_v19 = vadd.f32 %v8395_v9, %v8432_v13  ;;  %v4336_v61 = vadd.f32 %v8397_v58, %v8429_v12 }
 0x3b6   : > { %v8607_v52 = vadd.f32 %v4578_v32, %v4386_v45  ;;  %4862 = vmatpush1.xpose.msra.mxu0 %v4797_v30  ;;  %vm4664_vm14 = vcmp.gt.f32.partialorder %v4537_v23, 0.0  ;;  %v4396_v31 = vadd.f32 %v8510_v35, %v8429_v12  ;;  %v4398_v8 = vadd.f32 %v8516_v25, %v8432_v13  ;;  %v8647_v59 = vpop.f32.mrf.mxu0 }
 0x3b7   : > { %v4580_v34 = vpop.f32.mrf.mxu1  ;;  %4863 = vmatprep.subr.mxu0 %v4796_v3  ;;  %v4527_v15 = vadd.f32 %v8506_v60, %v4334_v19  ;;  %v4529_v9 = vadd.f32 %v8508_v63, %v4336_v61  ;;  %v4727_v4 = vmul.f32 0.2, %v4535_v62  ;;  %v4793_v58 = vsel %vm4665_vm13, %v4539_v22, %v4729_v55  ;;  %v9410_v61 = vld [vmem:[#allocation85_spill] sm:$0xff] }
 0x3b8   : > { %v8619_v44 = vadd.f32 %v4580_v34, %v4388_v5  ;;  %v4726_v39 = vmul.f32 0.2, %v4531_v54  ;;  %vm4663_vm15 = vcmp.gt.f32.partialorder %v4535_v62, 0.0  ;;  %v4792_v48 = vsel %vm4664_vm14, %v4537_v23, %v4728_v53 }
 0x3b9   : > { %v4584_v18 = vpop.f32.mrf.mxu1  ;;  %v4328_v35 = vadd.f32 %v8391_v16, %v8432_v13  ;;  %v4332_v25 = vadd.f32 %v8393_v10, %v8429_v12  ;;  %vm4662_vm1 = vcmp.gt.f32.partialorder %v4531_v54, 0.0  ;;  %v4402_v63 = vadd.f32 %v8522_v26, %v8429_v12  ;;  %v8660_v26 = vpop.f32.mrf.mxu0 }
 0x3ba   : > { %v8624_v21 = vadd.f32 %v4584_v18, %v4392_v57  ;;  %4864 = vmatpush1.xpose.msra.mxu0 %v4795_v36  ;;  %v4404_v20 = vadd.f32 %v8528_v41, %v8432_v13  ;;  %v4725_v23 = vmul.f32 0.2, %v4529_v9  ;;  %v4791_v10 = vsel %vm4663_vm15, %v4535_v62, %v4727_v4  ;;  %v9409_v18 = vld [vmem:[#allocation89_spill] sm:$0xff] }
 0x3bb   : > { %v4586_v7 = vpop.f32.mrf.mxu1  ;;  %4865 = vmatprep.subr.mxu0 %v4794_v33  ;;  %v4521_v5 = vadd.f32 %v8500_v0, %v4328_v35  ;;  %v4525_v16 = vadd.f32 %v8502_v28, %v4332_v25  ;;  %v4724_v49 = vmul.f32 0.2, %v4527_v15  ;;  %vm4661_vm2 = vcmp.gt.f32.partialorder %v4529_v9, 0.0  ;;  %v9413_v25 = vld [vmem:[#allocation78_spill] sm:$0xff] }
 0x3bc   : > { %v8636_v29 = vadd.f32 %v4586_v7, %v4394_v14  ;;  %v4790_v30 = vsel %vm4662_vm1, %v4531_v54, %v4726_v39  ;;  %vm4660_vm3 = vcmp.gt.f32.partialorder %v4527_v15, 0.0  ;;  %v4406_v0 = vadd.f32 %v8530_v24, %v8429_v12  ;;  %v8668_v14 = vpop.f32.mrf.mxu0  ;;  %v9412_v39 = vld [vmem:[#allocation82_spill] sm:$0xff] }
 0x3bd   : > { %v4588_v40 = vpop.f32.mrf.mxu1  ;;  %v4723_v28 = vmul.f32 0.2, %v4525_v16  ;;  %v4789_v56 = vsel %vm4661_vm2, %v4529_v9, %v4725_v23  ;;  %v4722_v6 = vmul.f32 0.2, %v4521_v5  ;;  %vm4659_vm4 = vcmp.gt.f32.partialorder %v4525_v16, 0.0 }
 0x3be   : > { %v8641_v1 = vadd.f32 %v4588_v40, %v4396_v31  ;;  %4866 = vmatpush1.xpose.msra.mxu0 %v4793_v58  ;;  %v4788_v57 = vsel %vm4660_vm3, %v4527_v15, %v4724_v49  ;;  %vm4658_vm0 = vcmp.gt.f32.partialorder %v4521_v5, 0.0  ;;  %v4721_v62 = vmul.f32 0.2, %v8496_v38  ;;  %v8677_v33 = vpop.f32.mrf.mxu0  ;;  %v9411_v15 = vld [vmem:[#allocation83_spill] sm:$0xff] }
 0x3bf   : > { %v4590_v60 = vpop.f32.mrf.mxu1  ;;  %4867 = vmatprep.subr.mxu0 %v4792_v48  ;;  %v4787_v55 = vsel %vm4659_vm4, %v4525_v16, %v4723_v28  ;;  %v4720_v36 = vmul.f32 0.2, %v9409_v18  ;;  %vm4657_vm5 = vcmp.gt.f32.partialorder %v8496_v38, 0.0  ;;  %v4786_v53 = vsel %vm4658_vm0, %v4521_v5, %v4722_v6  ;;  %v9414_v16 = vld [vmem:[#allocation76_spill] sm:$0xff]  ;;  %v9415_v49 = vld [vmem:[#allocation75_spill] sm:$0xff] }
 0x3c0   : > { %v8653_v45 = vadd.f32 %v4590_v60, %v4398_v8  ;;  %vm4656_vm6 = vcmp.gt.f32.partialorder %v9409_v18, 0.0  ;;  %v4719_v7 = vmul.f32 0.2, %v9410_v61  ;;  %v4785_v8 = vsel %vm4657_vm5, %v8496_v38, %v4721_v62  ;;  %v8689_v40 = vpop.f32.mrf.mxu0  ;;  %v9417_v62 = vld [vmem:[#allocation69_spill] sm:$0xff] }
 0x3c1   : > { %v4594_v22 = vpop.f32.mrf.mxu1  ;;  %v4718_v9 = vmul.f32 0.2, %v9411_v15  ;;  %vm4655_vm7 = vcmp.gt.f32.partialorder %v9410_v61, 0.0  ;;  %v4784_v4 = vsel %vm4656_vm6, %v9409_v18, %v4720_v36  ;;  %vm4654_vm8 = vcmp.gt.f32.partialorder %v9411_v15, 0.0 }
 0x3c2   : > { %v8658_v32 = vadd.f32 %v4594_v22, %v4402_v63  ;;  %4868 = vmatpush1.xpose.msra.mxu0 %v4791_v10  ;;  %v4717_v48 = vmul.f32 0.2, %v9412_v39  ;;  %v4783_v38 = vsel %vm4655_vm7, %v9410_v61, %v4719_v7  ;;  %v4716_v60 = vmul.f32 0.2, %v9413_v25  ;;  %v9418_v61 = vld [vmem:[#allocation68_spill] sm:$0xff] }
 0x3c3   : > { %v4596_v37 = vpop.f32.mrf.mxu1  ;;  %4869 = vmatprep.subr.mxu0 %v4790_v30  ;;  %vm4653_vm9 = vcmp.gt.f32.partialorder %v9412_v39, 0.0  ;;  %v4782_v63 = vsel %vm4654_vm8, %v9411_v15, %v4718_v9  ;;  %vm4652_vm10 = vcmp.gt.f32.partialorder %v9413_v25, 0.0  ;;  %v4715_v23 = vmul.f32 0.2, %v9414_v16  ;;  %v9419_v9 = vld [vmem:[#allocation65_spill] sm:$0xff] }
 0x3c4   : > { %v8664_v41 = vadd.f32 %v4596_v37, %v4404_v20  ;;  %v4437_v20 = vpop.f32.mrf.mxu0  ;;  %v4781_v10 = vsel %vm4653_vm9, %v9412_v39, %v4717_v48  ;;  %v4714_v30 = vmul.f32 0.2, %v9415_v49  ;;  %vm4651_vm11 = vcmp.gt.f32.partialorder %v9414_v16, 0.0 }
 0x3c5   : > { %v4598_v3 = vpop.f32.mrf.mxu1  ;;  %v4780_v37 = vsel %vm4652_vm10, %v9413_v25, %v4716_v60  ;;  %vm4650_vm12 = vcmp.gt.f32.partialorder %v9415_v49, 0.0  ;;  %vm4648_vm14 = vcmp.gt.f32.partialorder %v9417_v62, 0.0  ;;  %v4711_v7 = vmul.f32 0.2, %v9418_v61  ;;  %v9420_v25 = vld [vmem:[#allocation64_spill] sm:$0xff] }
 0x3c6   : > { %v8666_v34 = vadd.f32 %v4598_v3, %v4406_v0  ;;  %4870 = vmatpush1.xpose.msra.mxu0 %v4789_v56  ;;  %v4441_v0 = vpop.f32.mrf.mxu0  ;;  %v9416_v3 = vld [vmem:[#allocation71_spill] sm:$0xff]  ;;  %v4778_v18 = vsel %vm4650_vm12, %v9415_v49, %v4714_v30  ;;  %vm4647_vm15 = vcmp.gt.f32.partialorder %v9418_v61, 0.0  ;;  %vm4646_vm1 = vcmp.gt.f32.partialorder %v9419_v9, 0.0 }
 0x3c7   : > { %v8670_v54 = vpop.f32.mrf.mxu1  ;;  %4871 = vmatprep.subr.mxu0 %v4788_v57  ;;  %v4713_v56 = vmul.f32 0.2, %v9416_v3  ;;  %v4779_v57 = vsel %vm4651_vm11, %v9414_v16, %v4715_v23  ;;  %vm4649_vm13 = vcmp.gt.f32.partialorder %v9416_v3, 0.0  ;;  %v4709_v60 = vmul.f32 0.2, %v9420_v25  ;;  %v9421_v23 = vld [vmem:[#allocation63_spill] sm:$0xff] }
 0x3c8   : > { %v4443_v36 = vpop.f32.mrf.mxu0  ;;  %v4775_v16 = vsel %vm4647_vm15, %v9418_v61, %v4711_v7  ;;  %vm4645_vm2 = vcmp.gt.f32.partialorder %v9420_v25, 0.0  ;;  %vm4644_vm3 = vcmp.gt.f32.partialorder %v9421_v23, 0.0 }
 0x3c9   : > { %v8673_v24 = vpop.f32.mrf.mxu1  ;;  %v4777_v15 = vsel %vm4649_vm13, %v9416_v3, %v4713_v56  ;;  %v4444_v3 = vadd.f32 %v4443_v36, %v8432_v13  ;;  %v4442_v36 = vadd.f32 %v4441_v0, %v8429_v12  ;;  %v4434_v0 = vadd.f32 %v8677_v33, %v8432_v13 }
 0x3ca   : > { %4872 = vmatpush1.xpose.msra.mxu0 %v4787_v55  ;;  %v4712_v55 = vmul.f32 0.2, %v9417_v62  ;;  %v4445_v48 = vpop.f32.mrf.mxu0 }
 0x3cb   : > { %v8679_v19 = vpop.f32.mrf.mxu1  ;;  %4873 = vmatprep.subr.mxu0 %v4786_v53  ;;  %v4446_v56 = vadd.f32 %v4445_v48, %v8429_v12 }
 0x3cc   : > { %v4776_v39 = vsel %vm4648_vm14, %v9417_v62, %v4712_v55  ;;  %v4447_v30 = vpop.f32.mrf.mxu0 }
 0x3cd   : > { %v8683_v31 = vpop.f32.mrf.mxu1  ;;  %v4448_v61 = vadd.f32 %v4447_v30, %v8432_v13 }
 0x3ce   : > { %4874 = vmatpush1.xpose.msra.mxu0 %v4785_v8 }
 0x3cf   : > { %v8691_v58 = vpop.f32.mrf.mxu1  ;;  %4875 = vmatprep.subr.mxu0 %v4784_v4  ;;  %v4710_v4 = vmul.f32 0.2, %v9419_v9 }
 0x3d1   : > { %v8695_v35 = vpop.f32.mrf.mxu1  ;;  %v4774_v49 = vsel %vm4646_vm1, %v9419_v9, %v4710_v4  ;;  %v4438_v4 = vadd.f32 %v4437_v20, %v8432_v13  ;;  %v4436_v20 = vadd.f32 %v8689_v40, %v8429_v12  ;;  %v4428_v40 = vadd.f32 %v8660_v26, %v8432_v13 }
 0x3d2   : > { %4876 = vmatpush1.xpose.msra.mxu0 %v4783_v38 }
 0x3d3   : > { %v8701_v5 = vpop.f32.mrf.mxu1  ;;  %4877 = vmatprep.subr.mxu0 %v4782_v63 }
 0x3d5   : > { %v8705_v22 = vpop.f32.mrf.mxu1 }
 0x3d6   : > { %4878 = vmatpush1.xpose.msra.mxu0 %v4781_v10  ;;  %v4708_v10 = vmul.f32 0.2, %v9421_v23 }
 0x3d7   : > { %v8711_v28 = vpop.f32.mrf.mxu1  ;;  %4879 = vmatprep.subr.mxu0 %v4780_v37 }
 0x3d8   : > { %v4772_v9 = vsel %vm4644_vm3, %v9421_v23, %v4708_v10 }
 0x3d9   : > { %v8715_v6 = vpop.f32.mrf.mxu1 }
 0x3da   : > { %4880 = vmatpush1.xpose.msra.mxu0 %v4779_v57  ;;  %v9422_v57 = vld [vmem:[#allocation62_spill] sm:$0xff] }
 0x3db   : > { %v4626_v53 = vpop.f32.mrf.mxu1  ;;  %4881 = vmatprep.subr.mxu0 %v4778_v18  ;;  %vm4643_vm4 = vcmp.gt.f32.partialorder %v9422_v57, 0.0  ;;  %v4707_v62 = vmul.f32 0.2, %v9422_v57  ;;  %v4773_v18 = vsel %vm4645_vm2, %v9420_v25, %v4709_v60 }
 0x3dd   : > { %v4628_v8 = vpop.f32.mrf.mxu1  ;;  %v4771_v25 = vsel %vm4643_vm4, %v9422_v57, %v4707_v62  ;;  %v4432_v57 = vadd.f32 %v8668_v14, %v8429_v12  ;;  %v4424_v14 = vadd.f32 %v8630_v50, %v8432_v13 }
 0x3de   : > { %4882 = vmatpush1.xpose.msra.mxu0 %v4777_v15 }
 0x3df   : > { %v4630_v38 = vpop.f32.mrf.mxu1  ;;  %4883 = vmatprep.subr.mxu0 %v4776_v39  ;;  %v4625_v33 = vadd.f32 %v8715_v6, %v4432_v57  ;;  %v4752_v57 = vmul.f32 0.2, %v8664_v41 }
 0x3e1   : > { %v4634_v63 = vpop.f32.mrf.mxu1  ;;  %vm4699_vm11 = vcmp.gt.f32.partialorder %v4625_v33, 0.0 }
 0x3e2   : > { %4884 = vmatpush1.xpose.msra.mxu0 %v4775_v16  ;;  %v4631_v16 = vadd.f32 %v4630_v38, %v4438_v4  ;;  %v4629_v38 = vadd.f32 %v4628_v8, %v4436_v20 }
 0x3e3   : > { %v4636_v37 = vpop.f32.mrf.mxu1  ;;  %4885 = vmatprep.subr.mxu0 %v4774_v49  ;;  %v4635_v49 = vadd.f32 %v4634_v63, %v4442_v36 }
 0x3e4   : > { %v4637_v7 = vadd.f32 %v4636_v37, %v4444_v3  ;;  %v4627_v37 = vadd.f32 %v4626_v53, %v4434_v0  ;;  %v4766_v3 = vmul.f32 0.2, %v4631_v16  ;;  %vm4702_vm8 = vcmp.gt.f32.partialorder %v4631_v16, 0.0 }
 0x3e5   : > { %v4638_v55 = vpop.f32.mrf.mxu1  ;;  %v4767_v63 = vmul.f32 0.2, %v4635_v49  ;;  %vm4703_vm7 = vcmp.gt.f32.partialorder %v4635_v49, 0.0  ;;  %v4765_v62 = vmul.f32 0.2, %v4629_v38  ;;  %vm4701_vm9 = vcmp.gt.f32.partialorder %v4629_v38, 0.0 }
 0x3e6   : > { %v4639_v15 = vadd.f32 %v4638_v55, %v4446_v56  ;;  %4886 = vmatpush1.xpose.msra.mxu0 %v4773_v18  ;;  %v4768_v60 = vmul.f32 0.2, %v4637_v7  ;;  %vm4704_vm6 = vcmp.gt.f32.partialorder %v4637_v7, 0.0  ;;  %v4621_v55 = vadd.f32 %v8711_v28, %v4428_v40 }
 0x3e7   : > { %v4640_v39 = vpop.f32.mrf.mxu1  ;;  %4887 = vmatprep.subr.mxu0 %v4772_v9  ;;  %v4831_v8 = vsel %vm4703_vm7, %v4635_v49, %v4767_v63  ;;  %v4830_v53 = vsel %vm4702_vm8, %v4631_v16, %v4766_v3  ;;  %v4426_v18 = vadd.f32 %v8647_v59, %v8429_v12  ;;  %vm4700_vm10 = vcmp.gt.f32.partialorder %v4627_v37, 0.0 }
 0x3e8   : > { %v4641_v48 = vadd.f32 %v4640_v39, %v4448_v61  ;;  %v4769_v51 = vmul.f32 0.2, %v4639_v15  ;;  %vm4705_vm0 = vcmp.gt.f32.partialorder %v4639_v15, 0.0  ;;  %v4832_v56 = vsel %vm4704_vm6, %v4637_v7, %v4768_v60 }
 0x3e9   : > { %v4619_v26 = vadd.f32 %v8705_v22, %v4426_v18  ;;  %v4763_v61 = vmul.f32 0.2, %v4625_v33  ;;  %v4829_v6 = vsel %vm4701_vm9, %v4629_v38, %v4765_v62  ;;  %v4617_v7 = vadd.f32 %v8701_v5, %v4424_v14 }
 0x3ea   : > { %v4770_v30 = vmul.f32 0.2, %v4641_v48  ;;  %4888 = vmatpush1.xpose.msra.mxu0 %v4771_v25  ;;  %vm4706_vm5 = vcmp.gt.f32.partialorder %v4641_v48, 0.0  ;;  %v4833_v10 = vsel %vm4705_vm0, %v4639_v15, %v4769_v51  ;;  %v4764_v51 = vmul.f32 0.2, %v4627_v37 }
 0x3eb   : > { %v4762_v15 = vmul.f32 0.2, %v4621_v55  ;;  %v4422_v9 = vadd.f32 %v8613_v46, %v8429_v12  ;;  %vm4698_vm12 = vcmp.gt.f32.partialorder %v4621_v55, 0.0  ;;  %v4418_v59 = vadd.f32 %v8596_v42, %v8432_v13  ;;  %v9423_v46 = vld [vmem:[#allocation98_spill] sm:$0xff] }
 0x3ec   : > { %v4834_v23 = vsel %vm4706_vm5, %v4641_v48, %v4770_v30  ;;  %v4828_v28 = vsel %vm4700_vm10, %v4627_v37, %v4764_v51  ;;  %v4761_v4 = vmul.f32 0.2, %v4619_v26  ;;  %v4827_v22 = vsel %vm4699_vm11, %v4625_v33, %v4763_v61  ;;  %v9424_v30 = vld [vmem:[#allocation92_spill] sm:$0xff] }
 0x3ed   : > { %4889 = vmatprep.subr.mxu0 %v4834_v23  ;;  %v4615_v50 = vadd.f32 %v8695_v35, %v4422_v9  ;;  %v4611_v36 = vadd.f32 %v8691_v58, %v4418_v59  ;;  %v4760_v39 = vmul.f32 0.2, %v4617_v7  ;;  %vm4697_vm13 = vcmp.gt.f32.partialorder %v4619_v26, 0.0  ;;  %v9426_v9 = vld [vmem:[#allocation97_spill] sm:$0xff] }
 0x3ee   : > { %4890 = vmatpush2.xpose.msra.mxu0 %v4833_v10  ;;  %v4826_v5 = vsel %vm4698_vm12, %v4621_v55, %v4762_v15  ;;  %v4416_v48 = vadd.f32 %v8579_v2, %v8429_v12  ;;  %vm4696_vm14 = vcmp.gt.f32.partialorder %v4617_v7, 0.0  ;;  %v4414_v16 = vadd.f32 %v9423_v46, %v8432_v13  ;;  %v9425_v2 = vld [vmem:[#allocation90_spill] sm:$0xff] }
 0x3ef   : > { %4891 = vmatprep.subr.mxu0 %v4832_v56  ;;  %v4759_v49 = vmul.f32 0.2, %v4615_v50  ;;  %v4825_v35 = vsel %vm4697_vm13, %v4619_v26, %v4761_v4  ;;  %v4758_v60 = vmul.f32 0.2, %v4611_v36  ;;  %vm4695_vm15 = vcmp.gt.f32.partialorder %v4615_v50, 0.0  ;;  %v9427_v4 = vld [vmem:[#allocation58_spill] sm:$0xff] }
 0x3f0   : > { %v4609_v42 = vadd.f32 %v8683_v31, %v4416_v48  ;;  %v4607_v25 = vadd.f32 %v8679_v19, %v4414_v16  ;;  %v4824_v58 = vsel %vm4696_vm14, %v4617_v7, %v4760_v39  ;;  %v4412_v20 = vadd.f32 %v9424_v30, %v8429_v12 }
 0x3f1   : > { %vm4694_vm1 = vcmp.gt.f32.partialorder %v4611_v36, 0.0  ;;  %v4408_v0 = vadd.f32 %v9425_v2, %v8432_v13  ;;  %v4823_v31 = vsel %vm4695_vm15, %v4615_v50, %v4759_v49  ;;  %v4753_v13 = vmul.f32 0.2, %v8666_v34  ;;  %v9429_v2 = vld [vmem:[#allocation57_spill] sm:$0xff] }
 0x3f2   : > { %4892 = vmatpush2.xpose.msra.mxu0 %v4831_v8  ;;  %v4605_v23 = vadd.f32 %v8673_v24, %v4412_v20  ;;  %v4757_v38 = vmul.f32 0.2, %v4609_v42  ;;  %v4756_v10 = vmul.f32 0.2, %v4607_v25  ;;  %vm4693_vm2 = vcmp.gt.f32.partialorder %v4609_v42, 0.0 }
 0x3f3   : > { %4893 = vmatprep.subr.mxu0 %v4830_v53  ;;  %v4601_v63 = vadd.f32 %v8670_v54, %v4408_v0  ;;  %v4822_v19 = vsel %vm4694_vm1, %v4611_v36, %v4758_v60  ;;  %vm4692_vm3 = vcmp.gt.f32.partialorder %v4607_v25, 0.0  ;;  %vm4689_vm5 = vcmp.gt.f32.partialorder %v8666_v34, 0.0 }
 0x3f4   : > { %v4755_v37 = vmul.f32 0.2, %v4605_v23  ;;  %v4821_v3 = vsel %vm4693_vm2, %v4609_v42, %v4757_v38  ;;  %vm4691_vm4 = vcmp.gt.f32.partialorder %v4605_v23, 0.0  ;;  %v4820_v56 = vsel %vm4692_vm3, %v4607_v25, %v4756_v10 }
 0x3f5   : > { %v4754_v12 = vmul.f32 0.2, %v4601_v63  ;;  %vm4690_vm0 = vcmp.gt.f32.partialorder %v4601_v63, 0.0  ;;  %vm4688_vm6 = vcmp.gt.f32.partialorder %v8664_v41, 0.0  ;;  %v4751_v40 = vmul.f32 0.2, %v8658_v32 }
 0x3f6   : > { %4894 = vmatpush2.xpose.msra.mxu0 %v4829_v6  ;;  %v4819_v24 = vsel %vm4691_vm4, %v4605_v23, %v4755_v37  ;;  %v4817_v33 = vsel %vm4689_vm5, %v8666_v34, %v4753_v13  ;;  %v4750_v62 = vmul.f32 0.2, %v8653_v45  ;;  %vm4687_vm7 = vcmp.gt.f32.partialorder %v8658_v32, 0.0 }
 0x3f7   : > { %4895 = vmatprep.subr.mxu0 %v4828_v28  ;;  %v4818_v54 = vsel %vm4690_vm0, %v4601_v63, %v4754_v12  ;;  %v4816_v8 = vsel %vm4688_vm6, %v8664_v41, %v4752_v57  ;;  %vm4686_vm8 = vcmp.gt.f32.partialorder %v8653_v45, 0.0  ;;  %v4749_v55 = vmul.f32 0.2, %v8641_v1 }
 0x3f8   : > { %v4815_v51 = vsel %vm4687_vm7, %v8658_v32, %v4751_v40  ;;  %v4748_v53 = vmul.f32 0.2, %v8636_v29  ;;  %vm4685_vm9 = vcmp.gt.f32.partialorder %v8641_v1, 0.0  ;;  %v4814_v34 = vsel %vm4686_vm8, %v8653_v45, %v4750_v62 }
 0x3f9   : > { %vm4684_vm10 = vcmp.gt.f32.partialorder %v8636_v29, 0.0  ;;  %v4747_v18 = vmul.f32 0.2, %v8624_v21  ;;  %v4813_v41 = vsel %vm4685_vm9, %v8641_v1, %v4749_v55  ;;  %v4746_v14 = vmul.f32 0.2, %v8619_v44 }
 0x3fa   : > { %4896 = vmatpush2.xpose.msra.mxu0 %v4827_v22  ;;  %vm4683_vm11 = vcmp.gt.f32.partialorder %v8624_v21, 0.0  ;;  %v4812_v32 = vsel %vm4684_vm10, %v8636_v29, %v4748_v53  ;;  %vm4682_vm12 = vcmp.gt.f32.partialorder %v8619_v44, 0.0  ;;  %v4745_v26 = vmul.f32 0.2, %v8607_v52  ;;  %v9428_v22 = vld [vmem:[#allocation96_spill] sm:$0xff] }
 0x3fb   : > { %4897 = vmatprep.subr.mxu0 %v4826_v5  ;;  %v4811_v45 = vsel %vm4683_vm11, %v8624_v21, %v4747_v18  ;;  %v4744_v61 = vmul.f32 0.2, %v8602_v47  ;;  %vm4681_vm13 = vcmp.gt.f32.partialorder %v8607_v52, 0.0  ;;  %v4810_v1 = vsel %vm4682_vm12, %v8619_v44, %v4746_v14 }
 0x3fc   : > { %vm4680_vm14 = vcmp.gt.f32.partialorder %v8602_v47, 0.0  ;;  %v4743_v6 = vmul.f32 0.2, %v8590_v17  ;;  %v4809_v29 = vsel %vm4681_vm13, %v8607_v52, %v4745_v26  ;;  %v4742_v7 = vmul.f32 0.2, %v8585_v43 }
 0x3fd   : > { %vm4679_vm15 = vcmp.gt.f32.partialorder %v8590_v17, 0.0  ;;  %v4808_v21 = vsel %vm4680_vm14, %v8602_v47, %v4744_v61  ;;  %vm4678_vm1 = vcmp.gt.f32.partialorder %v8585_v43, 0.0  ;;  %v4741_v15 = vmul.f32 0.2, %v8572_v27 }
 0x3fe   : > { %4898 = vmatpush2.xpose.msra.mxu0 %v4825_v35  ;;  %v4807_v44 = vsel %vm4679_vm15, %v8590_v17, %v4743_v6  ;;  %v4740_v28 = vmul.f32 0.2, %v8569_v11  ;;  %vm4677_vm2 = vcmp.gt.f32.partialorder %v8572_v27, 0.0  ;;  %v4806_v52 = vsel %vm4678_vm1, %v8585_v43, %v4742_v7 }
 0x3ff   : > { %4899 = vmatprep.subr.mxu0 %v4824_v58  ;;  %vm4676_vm3 = vcmp.gt.f32.partialorder %v8569_v11, 0.0  ;;  %v4739_v59 = vmul.f32 0.2, %v9426_v9  ;;  %v4805_v47 = vsel %vm4677_vm2, %v8572_v27, %v4741_v15  ;;  %vm4675_vm4 = vcmp.gt.f32.partialorder %v9426_v9, 0.0 }
 0x400   : > { %v4804_v50 = vsel %vm4676_vm3, %v8569_v11, %v4740_v28  ;;  %v4850_v36 = vrot.slane %v9428_v22, %v9427_v4  ;;  %v4840_v43 = vpop.permute.xlu0 %4839  ;;  %v5849_v60 = vmov 1966171168   ;;  %v9430_v63 = vlaneseq }
 0x401   : > { %v4803_v17 = vsel %vm4675_vm4, %v9426_v9, %v4739_v59  ;;  %v4845_v39 = vrot.slane %v4840_v43, %v9427_v4  ;;  %v4944_v58 = vunpack.c.l.s4 %v5849_v60 }
 0x402   : > { %4900 = vmatpush2.xpose.msra.mxu0 %v4823_v31  ;;  %vm4960_vm0 = vcmp.lt.s32.totalorder %v9430_v63, 256 }
 0x403   : > { %4901 = vmatprep.subr.mxu0 %v4822_v19  ;;  %v4945_v30 = vunpack.c.0.s8 %v4944_v58 }
 0x405   : > { %v4948_v0 = vsub.s32 %v4945_v30, %v9429_v2 }
 0x406   : > { %4902 = vmatpush2.xpose.msra.mxu0 %v4821_v3 }
 0x407   : > { %4903 = vmatprep.subr.mxu0 %v4820_v56 }
 0x40a   : > { %4904 = vmatpush2.xpose.msra.mxu0 %v4819_v24 }
 0x40b   : > { %4905 = vmatprep.subr.mxu0 %v4818_v54 }
 0x40e   : > { %4906 = vmatpush2.xpose.msra.mxu0 %v4817_v33 }
 0x40f   : > { %4907 = vmatprep.subr.mxu0 %v4816_v8 }
 0x412   : > { %4908 = vmatpush2.xpose.msra.mxu0 %v4815_v51 }
 0x413   : > { %4909 = vmatprep.subr.mxu0 %v4814_v34 }
 0x416   : > { %4910 = vmatpush2.xpose.msra.mxu0 %v4813_v41 }
 0x417   : > { %4911 = vmatprep.subr.mxu0 %v4812_v32 }
 0x41a   : > { %4912 = vmatpush2.xpose.msra.mxu0 %v4811_v45 }
 0x41b   : > { %4913 = vmatprep.subr.mxu0 %v4810_v1 }
 0x41e   : > { %4914 = vmatpush2.xpose.msra.mxu0 %v4809_v29 }
 0x41f   : > { %4915 = vmatprep.subr.mxu0 %v4808_v21 }
 0x422   : > { %4916 = vmatpush2.xpose.msra.mxu0 %v4807_v44 }
 0x423   : > { %4917 = vmatprep.subr.mxu0 %v4806_v52 }
 0x426   : > { %4918 = vmatpush2.xpose.msra.mxu0 %v4805_v47 }
 0x427   : > { %4919 = vmatprep.subr.mxu0 %v4804_v50 }
 0x42a   : > { %4920 = vmatpush2.xpose.msra.mxu0 %v4803_v17 }
 0x42d   : > { %4922 = vmatmul.mubr.f32.vlgmr.msra.gmra.mxu0 %v4850_v36 }
 0x4ed   : > { %v4923_v5 = vpop.f32.mrf.mxu0 }
 0x4ee   : > { %v4924_v48 = vadd.f32 %v4923_v5, %v4845_v39 }
 0x4ef   : > { %v4925_v27 = vpop.f32.mrf.mxu0 }
 0x4f0   : > { %v5336_v46 = vmul.f32 -1.442695, %v4924_v48  ;;  %v4926_v16 = vadd.f32 %v4925_v27, %v4845_v39 }
 0x4f2   : > { %5777 = vpow2.f32 %v5336_v46  ;;  %v5337_v42 = vmul.f32 -1.442695, %v4926_v16 }
 0x4f4   : > { %5779 = vpow2.f32 %v5337_v42 }
 0x4ff   : > { %v5778_v11 = vpop.eup %5777 }
 0x500   : > { %v4934_v49 = vadd.f32 1.0, %v5778_v11 }
 0x501   : > { %v5780_v35 = vpop.eup %5779 }
 0x502   : > { %v4935_v25 = vadd.f32 1.0, %v5780_v35  ;;  %5781 = vrcp.f32 %v4934_v49 }
 0x504   : > { %5783 = vrcp.f32 %v4935_v25 }
 0x50f   : > { %v5782_v20 = vpop.eup %5781 }
 0x511   : > { %v5784_v23 = vpop.eup %5783 }
 0x512   : > { %v4942_v38 = vcombine.low %v5782_v20, %v5784_v23 }
 0x514   : > { %v4949_v31 = vrot.slane %v4942_v38, %v4948_v0 }
 0x516   : > { %v4956_v10 = vrot.slane %v4949_v31, %v4948_v0 }
 0x518   : > { %4962 = vst.msk [vmem:[%s276_s25] sm:$0x3] %vm4960_vm0, %v4956_v10 }
 0x519   : > { %5799 = shalt.err (!%p5796_p3)
}
 0x51a   : > { %s5800_s17 = scalar_lea.hbm %s4976_s15, 32  ;;  %s5804_s22 = scalar_lea.hbm %s8871_s7, 64 }
 0x51b   : > { %p5801_p4 = scmp.ne.s32.totalorder %s4976_s15, %s5800_s17  ;;  %p5805_p9 = scmp.lt.s32.totalorder %s4976_s15, %s8871_s7 }
 0x51c   : > { %p5806_p10 = scmp.lt.s32.totalorder %s5804_s22, %s5800_s17 }
 0x51d   : > { %p5802_p7 = pnand %p5801_p4, %p5931_p5 }
 0x51e   : > { %p5807_p11 = por %p5806_p10, %p5805_p9 }
 0x51f   : > { %p5803_p8 = pneg %p5802_p7 }
 0x521   : > { %p5808_p12 = pnand %p5807_p11, %p5803_p8 }
 0x523   : > { %5811 = shalt.err (!%p5808_p12)
}
 0x524   : > { %5345 = dma.vmem_to_hbm [thread:$0]  (%p5931_p5), %s4979_s10, 32, %s4976_s15, %s4964_s16  }
 0x525 PF: > { %p5351_p13 = scmp.ge.s32.totalorder %s5846_s29, 2  ;;  %s4990_s25 = sand.u32 1, %s5834_s26  }
 0x526   : > { %s4991_s30 = scalar_lea.sflag [#allocation4], %s4990_s25 }
 0x527   : > { %p5348_p0 = pnand %p5351_p13, %p5935_p6 }
 0x529   : > { %p5349_p1 = pneg %p5348_p0 }
 0x52b   : > { %5829 = dma.done.wait (%p5349_p1), %s4991_s30, 32  }
 0x52c   : > { %5831 = vsyncadd (%p5349_p1), %s4991_s30, 4294967264  ;;  %p19_p2 = scmp.ge.s32.totalorder %s5917_s8, 4   ;;  %s9431_s26 = smov %s5838_s27 }
 0x52d   : > { %s9432_s27 = smov %s5842_s28  ;;  %s9433_s28 = smov %s5929_s11 }
 0x52e   : > { %s9434_s29 = smov %s5917_s8  ;;  %21 = sbr.rel (!%p19_p2) target bundleno = 6 (0x6), region = 83 }
 0x533   :  { %4996 = vsyncpa [#allocation4], 1 }
 0x534   :  { %4998 = vsyncpa [#allocation4 + $0x1], 1 }

</bundles_post_ra>
